<compile_context>
chip_gen: v7x
topology: tpu7x:2x2x1
jax: 0.10.0
libtpu: 0.0.40
codegen_flags: <defaults>
</compile_context>

<pallas_src>
import jax
import jax.numpy as jnp
from jax import lax
from jax.experimental import pallas as pl
from jax.experimental.pallas import tpu as pltpu

EPS = 1e-5
LANES = 128
ROW_ALIGN = 8  # f32 sublane tile


# ----------------------------- small math helpers -----------------------------
def _layernorm(x, g, b):
    m = jnp.mean(x, axis=-1, keepdims=True)
    v = jnp.mean((x - m) ** 2, axis=-1, keepdims=True)
    return (x - m) * lax.rsqrt(v + EPS) * g + b


def _softplus(x):
    return jnp.log1p(jnp.exp(-jnp.abs(x))) + jnp.maximum(x, 0.0)


# ----------------------------- slab layouts (shared by pack + kernel) -----------------------------
def _weight_layout(A, H, L):
    """Row offsets of each weight block inside the (rows, 128) weights slab."""
    entries = [("wih", A), ("whh", H), ("w1_0", H)]
    entries += [(f"w1_{i}", LANES) for i in range(1, L)]
    entries += [("w2", LANES)]
    entries += [(f"w3_{i}", LANES) for i in range(L)]
    layout, off = {}, 0
    for name, rows in entries:
        layout[name] = off
        off += -(-rows // ROW_ALIGN) * ROW_ALIGN
    return layout, off


def _vector_layout(L):
    names = (["ln_f_g", "ln_f_b", "bih", "bhh"]
             + [f"b1_{i}" for i in range(L)] + ["b2"]
             + [f"b3_{i}" for i in range(L)])
    return {n: i for i, n in enumerate(names)}, len(names)


# ----------------------------- one-time parameter packing -----------------------------
def pack_params(p):
    A = p["wih"].shape[0]
    H = p["whh"].shape[0]
    I = p["mu2_w"].shape[1]
    L = p["mu1_w"].shape[0]

    wl, wrows = _weight_layout(A, H, L)
    vl, vrows = _vector_layout(L)
    vrows_p = -(-vrows // 8) * 8

    def put(slab, off, mat, col0=0):
        r, c = mat.shape
        return slab.at[off:off + r, col0:col0 + c].set(mat)

    def putv(slab, row, vec, col0=0):
        v = vec.reshape(-1)
        return slab.at[row, col0:col0 + v.shape[0]].set(v)

    # fold the input-LayerNorm affine into the GRU input projection
    wih_f = p["wih"] * p["ln_in_g"].reshape(A, 1)               # (A, 3H)
    bih_f = p["ln_in_b"].reshape(1, A) @ p["wih"] + p["bih"]    # (1, 3H)

    wts = jnp.zeros((wrows, LANES), jnp.float32)
    wts = put(wts, wl["wih"], wih_f)
    wts = put(wts, wl["whh"], p["whh"])
    # enc1 layer 0: horizontally stacked (H, 2H) -> no lane-concat on the matmul chain
    wts = put(wts, wl["w1_0"], jnp.concatenate([p["mu1_w"][0], p["std1_w"][0]], axis=1))
    # enc1 layers 1..L-1: block-diagonal, padded to (128,128)
    for i in range(1, L):
        wts = put(wts, wl[f"w1_{i}"], p["mu1_w"][i], 0)
        wts = put(wts, wl[f"w1_{i}"] + H, p["std1_w"][i], H)
    # enc2: (2H -> 2I) block-diagonal
    wts = put(wts, wl["w2"], p["mu2_w"], 0)
    wts = put(wts, wl["w2"] + H, p["std2_w"], I)
    # enc3
    for i in range(L):
        wts = put(wts, wl[f"w3_{i}"], p["mu3_w"][i], 0)
        wts = put(wts, wl[f"w3_{i}"] + I, p["std3_w"][i], I)

    vecs = jnp.zeros((vrows_p, LANES), jnp.float32)
    vecs = putv(vecs, vl["ln_f_g"], p["ln_f_g"])
    vecs = putv(vecs, vl["ln_f_b"], p["ln_f_b"])
    vecs = putv(vecs, vl["bih"], bih_f)
    vecs = putv(vecs, vl["bhh"], p["bhh"])
    for i in range(L):
        vecs = putv(vecs, vl[f"b1_{i}"], p["mu1_b"][i])
        vecs = putv(vecs, vl[f"b1_{i}"], p["std1_b"][i], H)
    vecs = putv(vecs, vl["b2"], p["mu2_b"])
    vecs = putv(vecs, vl["b2"], p["std2_b"], I)
    for i in range(L):
        vecs = putv(vecs, vl[f"b3_{i}"], p["mu3_b"][i])
        vecs = putv(vecs, vl[f"b3_{i}"], p["std3_b"][i], I)

    return {"wts": wts, "vecs": vecs, "dims": dict(A=A, H=H, I=I, L=L)}


# ----------------------------- the kernel -----------------------------
def _make_kernel(T, B, A, H, I, L, wl, vl):
    TWOH, THREEH, TWOI = 2 * H, 3 * H, 2 * I

    def kernel(x_ref, vecs_ref, wts_ref, musd_ref, hstate_ref):
        f32 = jnp.float32

        def vrow(name):
            r = vl[name]
            return vecs_ref[r:r + 1, :]                       # (1, 128)

        def wmat(name, rows):
            off = wl[name]
            return wts_ref[off:off + rows, :]                 # (rows, 128)

        # ---- hoisted input LayerNorm (affine folded into W_ih) + input projection ----
        x_all = x_ref[...].reshape(B * T, A)                  # batch-major rows: b*T + t
        m = jnp.mean(x_all, axis=-1, keepdims=True)
        v = jnp.mean((x_all - m) ** 2, axis=-1, keepdims=True)
        xhat = (x_all - m) * lax.rsqrt(v + EPS)
        gi_all = jnp.dot(xhat, wmat("wih", A),
                         preferred_element_type=f32) + vrow("bih")      # (B*T, 128)
        gi3 = gi_all.reshape(B, T, LANES)

        w_hh = wmat("whh", H)                                 # (H, 128), gates zero-padded past 3H
        b_hh = vrow("bhh")

        # ---- GRU recurrence, fully unrolled (T static, small) ----
        h = jnp.zeros((B, H), f32)                            # hidden=None -> zero init
        for t in range(T):
            gi = gi3[:, t, :]                                 # off the serial chain
            gh = jnp.dot(h, w_hh, preferred_element_type=f32) + b_hh
            gsum = gi + gh                                    # one full-lane add
            rz = jax.nn.sigmoid(gsum[:, 0:TWOH])              # single EUP pass for r and z
            r = rz[:, 0:H]
            z = rz[:, H:TWOH]
            n = jnp.tanh(gi[:, TWOH:THREEH] + r * gh[:, TWOH:THREEH])
            h = n + z * (h - n)                               # == (1-z)*n + z*h

        hstate_ref[0] = h                                     # temp_rnn_state (1, B, H)

        # ---- feature_norm (+ dropout == identity in eval mode) ----
        g_f = vrow("ln_f_g")[:, 0:H]
        b_f = vrow("ln_f_b")[:, 0:H]
        mh = jnp.mean(h, axis=-1, keepdims=True)
        vh = jnp.mean((h - mh) ** 2, axis=-1, keepdims=True)
        xf = (h - mh) * lax.rsqrt(vh + EPS) * g_f + b_f       # (B, H)

        # ---- fused mu/std MLP on a full 128-lane path ----
        # lanes [0:w) = mu (ReLU), [w:2w) = std (Softplus); pad lanes feed zero weight rows.
        lane = lax.broadcasted_iota(jnp.int32, (B, LANES), 1)
        mask_h = lane < H
        mask_i = lane < I

        def fused_act(y, mask):
            relu = jnp.maximum(y, 0.0)
            sp = jnp.log1p(jnp.exp(-jnp.abs(y))) + relu       # stable softplus, exp computed once
            return jnp.where(mask, relu, sp)

        # enc1 layer 0: xf @ [mu1_w0 | std1_w0]
        hc = fused_act(jnp.dot(xf, wmat("w1_0", H),
                               preferred_element_type=f32) + vrow("b1_0"), mask_h)
        for i in range(1, L):
            hc = fused_act(jnp.dot(hc, wmat(f"w1_{i}", LANES),
                                   preferred_element_type=f32) + vrow(f"b1_{i}"), mask_h)
        # residual (+x on both halves) -- the concat is only here, off the matmul chain
        x2 = jnp.concatenate([xf, xf, jnp.zeros((B, LANES - TWOH), f32)], axis=-1)
        hc = hc + x2
        # enc2
        hc = fused_act(jnp.dot(hc, wmat("w2", LANES),
                               preferred_element_type=f32) + vrow("b2"), mask_i)
        hres = hc
        # enc3
        for i in range(L):
            hc = fused_act(jnp.dot(hc, wmat(f"w3_{i}", LANES),
                                   preferred_element_type=f32) + vrow(f"b3_{i}"), mask_i)
        hc = hc + hres

        # single lane-contiguous mu|std store (split in the wrapper)
        musd_ref[...] = hc[:, 0:TWOI]

    return kernel


# ----------------------------- wrapper -----------------------------
def encoder_forward(actions, packed):
    """actions: (B, T, A) float32 -> (zI_mu (B,I), zI_std (B,I), rnn_state (1,B,H))."""
    d = packed["dims"]
    A, H, I, L = d["A"], d["H"], d["I"], d["L"]
    B, T, A_in = actions.shape
    assert A_in == A
    wl, _ = _weight_layout(A, H, L)
    vl, _ = _vector_layout(L)
    kernel = _make_kernel(T, B, A, H, I, L, wl, vl)

    vmem = lambda: pl.BlockSpec(memory_space=pltpu.MemorySpace.VMEM)
    musd, hstate = pl.pallas_call(
        kernel,
        out_shape=(jax.ShapeDtypeStruct((B, 2 * I), jnp.float32),
                   jax.ShapeDtypeStruct((1, B, H), jnp.float32)),
        in_specs=[vmem(), vmem(), vmem()],
        out_specs=(vmem(), vmem()),
    )(actions.astype(jnp.float32), packed["vecs"], packed["wts"])
    return musd[:, :I], musd[:, I:], hstate


# ----------------------------- deterministic parameter init -----------------------------
def _xavier_normal(key, shape):
    fan_in, fan_out = shape[-2], shape[-1]    # (in, out) layout
    std = (2.0 / (fan_in + fan_out)) ** 0.5
    return std * jax.random.normal(key, shape, jnp.float32)


def _orthogonal(key, rows, cols):
    big, small = max(rows, cols), min(rows, cols)
    a = jax.random.normal(key, (big, small), jnp.float32)
    q, r = jnp.linalg.qr(a)
    q = q * jnp.sign(jnp.diag(r))
    return q if rows >= cols else q.T


def make_params(key, A, H, I, L):
    ks = list(jax.random.split(key, 8 + 4 * L))
    p = {}
    p["ln_in_g"] = jnp.ones((1, A), jnp.float32)
    p["ln_in_b"] = jnp.zeros((1, A), jnp.float32)
    p["ln_f_g"] = jnp.ones((1, H), jnp.float32)
    p["ln_f_b"] = jnp.zeros((1, H), jnp.float32)
    # GRU (orthogonal weights, zero biases) -- stored transposed: (in, out), gate order r,z,n
    p["wih"] = _orthogonal(ks[0], 3 * H, A).T            # (A, 3H)
    p["whh"] = _orthogonal(ks[1], 3 * H, H).T            # (H, 3H)
    p["bih"] = jnp.zeros((1, 3 * H), jnp.float32)
    p["bhh"] = jnp.zeros((1, 3 * H), jnp.float32)
    # MLP stacks (xavier_normal weights, bias = 0.1)
    p["mu1_w"] = jnp.stack([_xavier_normal(ks[2 + i], (H, H)) for i in range(L)])
    p["mu1_b"] = jnp.full((L, 1, H), 0.1, jnp.float32)
    p["mu2_w"] = _xavier_normal(ks[2 + L], (H, I))
    p["mu2_b"] = jnp.full((1, I), 0.1, jnp.float32)
    p["mu3_w"] = jnp.stack([_xavier_normal(ks[3 + L + i], (I, I)) for i in range(L)])
    p["mu3_b"] = jnp.full((L, 1, I), 0.1, jnp.float32)
    p["std1_w"] = jnp.stack([_xavier_normal(ks[3 + 2 * L + i], (H, H)) for i in range(L)])
    p["std1_b"] = jnp.full((L, 1, H), 0.1, jnp.float32)
    p["std2_w"] = _xavier_normal(ks[3 + 3 * L], (H, I))
    p["std2_b"] = jnp.full((1, I), 0.1, jnp.float32)
    p["std3_w"] = jnp.stack([_xavier_normal(ks[4 + 3 * L + i], (I, I)) for i in range(L)])
    p["std3_b"] = jnp.full((L, 1, I), 0.1, jnp.float32)
    return p


# ----------------------------- plain-JAX reference -----------------------------
def reference_forward(actions, p):
    x = actions.astype(jnp.float32)                     # (B, T, A)
    B, T, A = x.shape
    H = p["whh"].shape[0]
    L = p["mu1_w"].shape[0]
    xn = _layernorm(x, p["ln_in_g"], p["ln_in_b"])
    h = jnp.zeros((B, H), jnp.float32)
    for t in range(T):
        gi = xn[:, t, :] @ p["wih"] + p["bih"]
        gh = h @ p["whh"] + p["bhh"]
        r = jax.nn.sigmoid(gi[:, :H] + gh[:, :H])
        z = jax.nn.sigmoid(gi[:, H:2 * H] + gh[:, H:2 * H])
        n = jnp.tanh(gi[:, 2 * H:] + r * gh[:, 2 * H:])
        h = (1.0 - z) * n + z * h
    hstate = h[None]
    xf = _layernorm(h, p["ln_f_g"], p["ln_f_b"])
    mu = xf
    for i in range(L):
        mu = jnp.maximum(mu @ p["mu1_w"][i] + p["mu1_b"][i], 0.0)
    mu = mu + xf
    mu = jnp.maximum(mu @ p["mu2_w"] + p["mu2_b"], 0.0)
    mu_i = mu
    for i in range(L):
        mu = jnp.maximum(mu @ p["mu3_w"][i] + p["mu3_b"][i], 0.0)
    mu = mu + mu_i
    s = xf
    for i in range(L):
        s = _softplus(s @ p["std1_w"][i] + p["std1_b"][i])
    s = s + xf
    s = _softplus(s @ p["std2_w"] + p["std2_b"])
    s_i = s
    for i in range(L):
        s = _softplus(s @ p["std3_w"][i] + p["std3_b"][i])
    s = s + s_i
    return mu, s, hstate


if __name__ == "__main__":
    # small shapes: batch=8, seq=8, action_dim=4, hidden=32, intention=16, layer_N=1 (-> 2 layers)
    B, T, A = 8, 8, 4
    H, I, L = 32, 16, 2

    key = jax.random.PRNGKey(0)
    k_act, k_par = jax.random.split(key)
    actions = jax.random.normal(k_act, (B, T, A), jnp.float32)
    params = make_params(k_par, A, H, I, L)
    packed = pack_params(params)            # one-time weight packing (LN fold / block-diag / slabs)

    mu, std, hstate = jax.block_until_ready(encoder_forward(actions, packed))

    mu_r, std_r, h_r = reference_forward(actions, params)
    assert mu.shape == (B, I) and std.shape == (B, I) and hstate.shape == (1, B, H)
    assert bool(jnp.all(jnp.isfinite(mu)) & jnp.all(jnp.isfinite(std)))
    assert jnp.allclose(mu, mu_r, atol=2e-2, rtol=2e-2)
    assert jnp.allclose(std, std_r, atol=2e-2, rtol=2e-2)
    assert jnp.allclose(hstate, h_r, atol=2e-2, rtol=2e-2)

    print("KERNEL_OK")
</pallas_src>

<mosaic_0001>
module attributes {stable_mosaic.version = 11 : i64} {
  func.func @kernel(%arg0: memref<8x8x4xf32, #tpu.memory_space<vmem>>, %arg1: memref<16x128xf32, #tpu.memory_space<vmem>>, %arg2: memref<584x128xf32, #tpu.memory_space<vmem>>, %arg3: memref<8x32xf32, #tpu.memory_space<vmem>>, %arg4: memref<1x8x32xf32, #tpu.memory_space<vmem>>) attributes {dimension_semantics = [], scalar_prefetch = 0 : i64, scratch_operands = 0 : i64, tpu.core_type = #tpu.core_type<tc>} {
    %c0 = arith.constant 0 : index
    %c0_0 = arith.constant 0 : index
    %c0_1 = arith.constant 0 : index
    %0 = vector.load %arg0[%c0, %c0_0, %c0_1] : memref<8x8x4xf32, #tpu.memory_space<vmem>>, vector<8x8x4xf32>
    %1 = vector.shape_cast %0 : vector<8x8x4xf32> to vector<64x4xf32>
    %cst = arith.constant dense<0.000000e+00> : vector<64xf32>
    %2 = vector.multi_reduction <add>, %1, %cst [1] : vector<64x4xf32> to vector<64xf32>
    %3 = vector.shape_cast %2 : vector<64xf32> to vector<64x1xf32>
    %cst_2 = arith.constant 4.000000e+00 : f32
    %4 = vector.broadcast %cst_2 : f32 to vector<64x1xf32>
    %5 = arith.divf %3, %4 : vector<64x1xf32>
    %6 = vector.broadcast %5 : vector<64x1xf32> to vector<64x4xf32>
    %7 = arith.subf %1, %6 : vector<64x4xf32>
    %8 = arith.mulf %7, %7 : vector<64x4xf32>
    %cst_3 = arith.constant dense<0.000000e+00> : vector<64xf32>
    %9 = vector.multi_reduction <add>, %8, %cst_3 [1] : vector<64x4xf32> to vector<64xf32>
    %10 = vector.shape_cast %9 : vector<64xf32> to vector<64x1xf32>
    %cst_4 = arith.constant 4.000000e+00 : f32
    %11 = vector.broadcast %cst_4 : f32 to vector<64x1xf32>
    %12 = arith.divf %10, %11 : vector<64x1xf32>
    %13 = vector.broadcast %5 : vector<64x1xf32> to vector<64x4xf32>
    %14 = arith.subf %1, %13 : vector<64x4xf32>
    %cst_5 = arith.constant 9.99999974E-6 : f32
    %15 = vector.broadcast %cst_5 : f32 to vector<64x1xf32>
    %16 = arith.addf %12, %15 : vector<64x1xf32>
    %17 = math.rsqrt %16 : vector<64x1xf32>
    %18 = vector.broadcast %17 : vector<64x1xf32> to vector<64x4xf32>
    %19 = arith.mulf %14, %18 : vector<64x4xf32>
    %c0_6 = arith.constant 0 : index
    %c0_7 = arith.constant 0 : index
    %20 = vector.load %arg2[%c0_6, %c0_7] : memref<584x128xf32, #tpu.memory_space<vmem>>, vector<4x128xf32>
    %cst_8 = arith.constant dense<0.000000e+00> : vector<64x128xf32>
    %21 = tpu.matmul %19, %20, %cst_8 {dimension_numbers = #tpu.dot_dimension_numbers<[1], [0], [0], [1], [0, 0, 1, 1], [], []>} : vector<64x4xf32>, vector<4x128xf32>, vector<64x128xf32> -> vector<64x128xf32>
    %c2 = arith.constant 2 : index
    %c0_9 = arith.constant 0 : index
    %22 = vector.load %arg1[%c2, %c0_9] : memref<16x128xf32, #tpu.memory_space<vmem>>, vector<1x128xf32>
    %23 = vector.broadcast %22 : vector<1x128xf32> to vector<64x128xf32>
    %24 = arith.addf %21, %23 : vector<64x128xf32>
    %25 = vector.shape_cast %24 : vector<64x128xf32> to vector<8x8x128xf32>
    %c8 = arith.constant 8 : index
    %c0_10 = arith.constant 0 : index
    %26 = vector.load %arg2[%c8, %c0_10] : memref<584x128xf32, #tpu.memory_space<vmem>>, vector<32x128xf32>
    %c3 = arith.constant 3 : index
    %c0_11 = arith.constant 0 : index
    %27 = vector.load %arg1[%c3, %c0_11] : memref<16x128xf32, #tpu.memory_space<vmem>>, vector<1x128xf32>
    %cst_12 = arith.constant 0.000000e+00 : f32
    %28 = vector.broadcast %cst_12 : f32 to vector<8x32xf32>
    %29 = vector.extract_strided_slice %25 {offsets = [0, 0, 0], sizes = [8, 1, 128], strides = [1, 1, 1]} : vector<8x8x128xf32> to vector<8x1x128xf32>
    %30 = vector.shape_cast %29 : vector<8x1x128xf32> to vector<8x128xf32>
    %cst_13 = arith.constant dense<0.000000e+00> : vector<8x128xf32>
    %31 = tpu.matmul %28, %26, %cst_13 {dimension_numbers = #tpu.dot_dimension_numbers<[1], [0], [0], [1], [0, 0, 1, 1], [], []>} : vector<8x32xf32>, vector<32x128xf32>, vector<8x128xf32> -> vector<8x128xf32>
    %32 = vector.broadcast %27 : vector<1x128xf32> to vector<8x128xf32>
    %33 = arith.addf %31, %32 : vector<8x128xf32>
    %34 = arith.addf %30, %33 : vector<8x128xf32>
    %35 = vector.extract_strided_slice %34 {offsets = [0, 0], sizes = [8, 64], strides = [1, 1]} : vector<8x128xf32> to vector<8x64xf32>
    %36 = arith.negf %35 : vector<8x64xf32>
    %37 = math.exp %36 : vector<8x64xf32>
    %cst_14 = arith.constant 1.000000e+00 : f32
    %38 = vector.broadcast %cst_14 : f32 to vector<8x64xf32>
    %39 = arith.addf %38, %37 : vector<8x64xf32>
    %40 = arith.divf %38, %39 : vector<8x64xf32>
    %41 = vector.extract_strided_slice %40 {offsets = [0, 0], sizes = [8, 32], strides = [1, 1]} : vector<8x64xf32> to vector<8x32xf32>
    %42 = vector.extract_strided_slice %40 {offsets = [0, 32], sizes = [8, 32], strides = [1, 1]} : vector<8x64xf32> to vector<8x32xf32>
    %43 = vector.extract_strided_slice %30 {offsets = [0, 64], sizes = [8, 32], strides = [1, 1]} : vector<8x128xf32> to vector<8x32xf32>
    %44 = vector.extract_strided_slice %33 {offsets = [0, 64], sizes = [8, 32], strides = [1, 1]} : vector<8x128xf32> to vector<8x32xf32>
    %45 = arith.mulf %41, %44 : vector<8x32xf32>
    %46 = arith.addf %43, %45 : vector<8x32xf32>
    %47 = math.tanh %46 : vector<8x32xf32>
    %48 = arith.subf %28, %47 : vector<8x32xf32>
    %49 = arith.mulf %42, %48 : vector<8x32xf32>
    %50 = arith.addf %47, %49 : vector<8x32xf32>
    %51 = vector.extract_strided_slice %25 {offsets = [0, 1, 0], sizes = [8, 1, 128], strides = [1, 1, 1]} : vector<8x8x128xf32> to vector<8x1x128xf32>
    %52 = vector.shape_cast %51 : vector<8x1x128xf32> to vector<8x128xf32>
    %cst_15 = arith.constant dense<0.000000e+00> : vector<8x128xf32>
    %53 = tpu.matmul %50, %26, %cst_15 {dimension_numbers = #tpu.dot_dimension_numbers<[1], [0], [0], [1], [0, 0, 1, 1], [], []>} : vector<8x32xf32>, vector<32x128xf32>, vector<8x128xf32> -> vector<8x128xf32>
    %54 = vector.broadcast %27 : vector<1x128xf32> to vector<8x128xf32>
    %55 = arith.addf %53, %54 : vector<8x128xf32>
    %56 = arith.addf %52, %55 : vector<8x128xf32>
    %57 = vector.extract_strided_slice %56 {offsets = [0, 0], sizes = [8, 64], strides = [1, 1]} : vector<8x128xf32> to vector<8x64xf32>
    %58 = arith.negf %57 : vector<8x64xf32>
    %59 = math.exp %58 : vector<8x64xf32>
    %cst_16 = arith.constant 1.000000e+00 : f32
    %60 = vector.broadcast %cst_16 : f32 to vector<8x64xf32>
    %61 = arith.addf %60, %59 : vector<8x64xf32>
    %62 = arith.divf %60, %61 : vector<8x64xf32>
    %63 = vector.extract_strided_slice %62 {offsets = [0, 0], sizes = [8, 32], strides = [1, 1]} : vector<8x64xf32> to vector<8x32xf32>
    %64 = vector.extract_strided_slice %62 {offsets = [0, 32], sizes = [8, 32], strides = [1, 1]} : vector<8x64xf32> to vector<8x32xf32>
    %65 = vector.extract_strided_slice %52 {offsets = [0, 64], sizes = [8, 32], strides = [1, 1]} : vector<8x128xf32> to vector<8x32xf32>
    %66 = vector.extract_strided_slice %55 {offsets = [0, 64], sizes = [8, 32], strides = [1, 1]} : vector<8x128xf32> to vector<8x32xf32>
    %67 = arith.mulf %63, %66 : vector<8x32xf32>
    %68 = arith.addf %65, %67 : vector<8x32xf32>
    %69 = math.tanh %68 : vector<8x32xf32>
    %70 = arith.subf %50, %69 : vector<8x32xf32>
    %71 = arith.mulf %64, %70 : vector<8x32xf32>
    %72 = arith.addf %69, %71 : vector<8x32xf32>
    %73 = vector.extract_strided_slice %25 {offsets = [0, 2, 0], sizes = [8, 1, 128], strides = [1, 1, 1]} : vector<8x8x128xf32> to vector<8x1x128xf32>
    %74 = vector.shape_cast %73 : vector<8x1x128xf32> to vector<8x128xf32>
    %cst_17 = arith.constant dense<0.000000e+00> : vector<8x128xf32>
    %75 = tpu.matmul %72, %26, %cst_17 {dimension_numbers = #tpu.dot_dimension_numbers<[1], [0], [0], [1], [0, 0, 1, 1], [], []>} : vector<8x32xf32>, vector<32x128xf32>, vector<8x128xf32> -> vector<8x128xf32>
    %76 = vector.broadcast %27 : vector<1x128xf32> to vector<8x128xf32>
    %77 = arith.addf %75, %76 : vector<8x128xf32>
    %78 = arith.addf %74, %77 : vector<8x128xf32>
    %79 = vector.extract_strided_slice %78 {offsets = [0, 0], sizes = [8, 64], strides = [1, 1]} : vector<8x128xf32> to vector<8x64xf32>
    %80 = arith.negf %79 : vector<8x64xf32>
    %81 = math.exp %80 : vector<8x64xf32>
    %cst_18 = arith.constant 1.000000e+00 : f32
    %82 = vector.broadcast %cst_18 : f32 to vector<8x64xf32>
    %83 = arith.addf %82, %81 : vector<8x64xf32>
    %84 = arith.divf %82, %83 : vector<8x64xf32>
    %85 = vector.extract_strided_slice %84 {offsets = [0, 0], sizes = [8, 32], strides = [1, 1]} : vector<8x64xf32> to vector<8x32xf32>
    %86 = vector.extract_strided_slice %84 {offsets = [0, 32], sizes = [8, 32], strides = [1, 1]} : vector<8x64xf32> to vector<8x32xf32>
    %87 = vector.extract_strided_slice %74 {offsets = [0, 64], sizes = [8, 32], strides = [1, 1]} : vector<8x128xf32> to vector<8x32xf32>
    %88 = vector.extract_strided_slice %77 {offsets = [0, 64], sizes = [8, 32], strides = [1, 1]} : vector<8x128xf32> to vector<8x32xf32>
    %89 = arith.mulf %85, %88 : vector<8x32xf32>
    %90 = arith.addf %87, %89 : vector<8x32xf32>
    %91 = math.tanh %90 : vector<8x32xf32>
    %92 = arith.subf %72, %91 : vector<8x32xf32>
    %93 = arith.mulf %86, %92 : vector<8x32xf32>
    %94 = arith.addf %91, %93 : vector<8x32xf32>
    %95 = vector.extract_strided_slice %25 {offsets = [0, 3, 0], sizes = [8, 1, 128], strides = [1, 1, 1]} : vector<8x8x128xf32> to vector<8x1x128xf32>
    %96 = vector.shape_cast %95 : vector<8x1x128xf32> to vector<8x128xf32>
    %cst_19 = arith.constant dense<0.000000e+00> : vector<8x128xf32>
    %97 = tpu.matmul %94, %26, %cst_19 {dimension_numbers = #tpu.dot_dimension_numbers<[1], [0], [0], [1], [0, 0, 1, 1], [], []>} : vector<8x32xf32>, vector<32x128xf32>, vector<8x128xf32> -> vector<8x128xf32>
    %98 = vector.broadcast %27 : vector<1x128xf32> to vector<8x128xf32>
    %99 = arith.addf %97, %98 : vector<8x128xf32>
    %100 = arith.addf %96, %99 : vector<8x128xf32>
    %101 = vector.extract_strided_slice %100 {offsets = [0, 0], sizes = [8, 64], strides = [1, 1]} : vector<8x128xf32> to vector<8x64xf32>
    %102 = arith.negf %101 : vector<8x64xf32>
    %103 = math.exp %102 : vector<8x64xf32>
    %cst_20 = arith.constant 1.000000e+00 : f32
    %104 = vector.broadcast %cst_20 : f32 to vector<8x64xf32>
    %105 = arith.addf %104, %103 : vector<8x64xf32>
    %106 = arith.divf %104, %105 : vector<8x64xf32>
    %107 = vector.extract_strided_slice %106 {offsets = [0, 0], sizes = [8, 32], strides = [1, 1]} : vector<8x64xf32> to vector<8x32xf32>
    %108 = vector.extract_strided_slice %106 {offsets = [0, 32], sizes = [8, 32], strides = [1, 1]} : vector<8x64xf32> to vector<8x32xf32>
    %109 = vector.extract_strided_slice %96 {offsets = [0, 64], sizes = [8, 32], strides = [1, 1]} : vector<8x128xf32> to vector<8x32xf32>
    %110 = vector.extract_strided_slice %99 {offsets = [0, 64], sizes = [8, 32], strides = [1, 1]} : vector<8x128xf32> to vector<8x32xf32>
    %111 = arith.mulf %107, %110 : vector<8x32xf32>
    %112 = arith.addf %109, %111 : vector<8x32xf32>
    %113 = math.tanh %112 : vector<8x32xf32>
    %114 = arith.subf %94, %113 : vector<8x32xf32>
    %115 = arith.mulf %108, %114 : vector<8x32xf32>
    %116 = arith.addf %113, %115 : vector<8x32xf32>
    %117 = vector.extract_strided_slice %25 {offsets = [0, 4, 0], sizes = [8, 1, 128], strides = [1, 1, 1]} : vector<8x8x128xf32> to vector<8x1x128xf32>
    %118 = vector.shape_cast %117 : vector<8x1x128xf32> to vector<8x128xf32>
    %cst_21 = arith.constant dense<0.000000e+00> : vector<8x128xf32>
    %119 = tpu.matmul %116, %26, %cst_21 {dimension_numbers = #tpu.dot_dimension_numbers<[1], [0], [0], [1], [0, 0, 1, 1], [], []>} : vector<8x32xf32>, vector<32x128xf32>, vector<8x128xf32> -> vector<8x128xf32>
    %120 = vector.broadcast %27 : vector<1x128xf32> to vector<8x128xf32>
    %121 = arith.addf %119, %120 : vector<8x128xf32>
    %122 = arith.addf %118, %121 : vector<8x128xf32>
    %123 = vector.extract_strided_slice %122 {offsets = [0, 0], sizes = [8, 64], strides = [1, 1]} : vector<8x128xf32> to vector<8x64xf32>
    %124 = arith.negf %123 : vector<8x64xf32>
    %125 = math.exp %124 : vector<8x64xf32>
    %cst_22 = arith.constant 1.000000e+00 : f32
    %126 = vector.broadcast %cst_22 : f32 to vector<8x64xf32>
    %127 = arith.addf %126, %125 : vector<8x64xf32>
    %128 = arith.divf %126, %127 : vector<8x64xf32>
    %129 = vector.extract_strided_slice %128 {offsets = [0, 0], sizes = [8, 32], strides = [1, 1]} : vector<8x64xf32> to vector<8x32xf32>
    %130 = vector.extract_strided_slice %128 {offsets = [0, 32], sizes = [8, 32], strides = [1, 1]} : vector<8x64xf32> to vector<8x32xf32>
    %131 = vector.extract_strided_slice %118 {offsets = [0, 64], sizes = [8, 32], strides = [1, 1]} : vector<8x128xf32> to vector<8x32xf32>
    %132 = vector.extract_strided_slice %121 {offsets = [0, 64], sizes = [8, 32], strides = [1, 1]} : vector<8x128xf32> to vector<8x32xf32>
    %133 = arith.mulf %129, %132 : vector<8x32xf32>
    %134 = arith.addf %131, %133 : vector<8x32xf32>
    %135 = math.tanh %134 : vector<8x32xf32>
    %136 = arith.subf %116, %135 : vector<8x32xf32>
    %137 = arith.mulf %130, %136 : vector<8x32xf32>
    %138 = arith.addf %135, %137 : vector<8x32xf32>
    %139 = vector.extract_strided_slice %25 {offsets = [0, 5, 0], sizes = [8, 1, 128], strides = [1, 1, 1]} : vector<8x8x128xf32> to vector<8x1x128xf32>
    %140 = vector.shape_cast %139 : vector<8x1x128xf32> to vector<8x128xf32>
    %cst_23 = arith.constant dense<0.000000e+00> : vector<8x128xf32>
    %141 = tpu.matmul %138, %26, %cst_23 {dimension_numbers = #tpu.dot_dimension_numbers<[1], [0], [0], [1], [0, 0, 1, 1], [], []>} : vector<8x32xf32>, vector<32x128xf32>, vector<8x128xf32> -> vector<8x128xf32>
    %142 = vector.broadcast %27 : vector<1x128xf32> to vector<8x128xf32>
    %143 = arith.addf %141, %142 : vector<8x128xf32>
    %144 = arith.addf %140, %143 : vector<8x128xf32>
    %145 = vector.extract_strided_slice %144 {offsets = [0, 0], sizes = [8, 64], strides = [1, 1]} : vector<8x128xf32> to vector<8x64xf32>
    %146 = arith.negf %145 : vector<8x64xf32>
    %147 = math.exp %146 : vector<8x64xf32>
    %cst_24 = arith.constant 1.000000e+00 : f32
    %148 = vector.broadcast %cst_24 : f32 to vector<8x64xf32>
    %149 = arith.addf %148, %147 : vector<8x64xf32>
    %150 = arith.divf %148, %149 : vector<8x64xf32>
    %151 = vector.extract_strided_slice %150 {offsets = [0, 0], sizes = [8, 32], strides = [1, 1]} : vector<8x64xf32> to vector<8x32xf32>
    %152 = vector.extract_strided_slice %150 {offsets = [0, 32], sizes = [8, 32], strides = [1, 1]} : vector<8x64xf32> to vector<8x32xf32>
    %153 = vector.extract_strided_slice %140 {offsets = [0, 64], sizes = [8, 32], strides = [1, 1]} : vector<8x128xf32> to vector<8x32xf32>
    %154 = vector.extract_strided_slice %143 {offsets = [0, 64], sizes = [8, 32], strides = [1, 1]} : vector<8x128xf32> to vector<8x32xf32>
    %155 = arith.mulf %151, %154 : vector<8x32xf32>
    %156 = arith.addf %153, %155 : vector<8x32xf32>
    %157 = math.tanh %156 : vector<8x32xf32>
    %158 = arith.subf %138, %157 : vector<8x32xf32>
    %159 = arith.mulf %152, %158 : vector<8x32xf32>
    %160 = arith.addf %157, %159 : vector<8x32xf32>
    %161 = vector.extract_strided_slice %25 {offsets = [0, 6, 0], sizes = [8, 1, 128], strides = [1, 1, 1]} : vector<8x8x128xf32> to vector<8x1x128xf32>
    %162 = vector.shape_cast %161 : vector<8x1x128xf32> to vector<8x128xf32>
    %cst_25 = arith.constant dense<0.000000e+00> : vector<8x128xf32>
    %163 = tpu.matmul %160, %26, %cst_25 {dimension_numbers = #tpu.dot_dimension_numbers<[1], [0], [0], [1], [0, 0, 1, 1], [], []>} : vector<8x32xf32>, vector<32x128xf32>, vector<8x128xf32> -> vector<8x128xf32>
    %164 = vector.broadcast %27 : vector<1x128xf32> to vector<8x128xf32>
    %165 = arith.addf %163, %164 : vector<8x128xf32>
    %166 = arith.addf %162, %165 : vector<8x128xf32>
    %167 = vector.extract_strided_slice %166 {offsets = [0, 0], sizes = [8, 64], strides = [1, 1]} : vector<8x128xf32> to vector<8x64xf32>
    %168 = arith.negf %167 : vector<8x64xf32>
    %169 = math.exp %168 : vector<8x64xf32>
    %cst_26 = arith.constant 1.000000e+00 : f32
    %170 = vector.broadcast %cst_26 : f32 to vector<8x64xf32>
    %171 = arith.addf %170, %169 : vector<8x64xf32>
    %172 = arith.divf %170, %171 : vector<8x64xf32>
    %173 = vector.extract_strided_slice %172 {offsets = [0, 0], sizes = [8, 32], strides = [1, 1]} : vector<8x64xf32> to vector<8x32xf32>
    %174 = vector.extract_strided_slice %172 {offsets = [0, 32], sizes = [8, 32], strides = [1, 1]} : vector<8x64xf32> to vector<8x32xf32>
    %175 = vector.extract_strided_slice %162 {offsets = [0, 64], sizes = [8, 32], strides = [1, 1]} : vector<8x128xf32> to vector<8x32xf32>
    %176 = vector.extract_strided_slice %165 {offsets = [0, 64], sizes = [8, 32], strides = [1, 1]} : vector<8x128xf32> to vector<8x32xf32>
    %177 = arith.mulf %173, %176 : vector<8x32xf32>
    %178 = arith.addf %175, %177 : vector<8x32xf32>
    %179 = math.tanh %178 : vector<8x32xf32>
    %180 = arith.subf %160, %179 : vector<8x32xf32>
    %181 = arith.mulf %174, %180 : vector<8x32xf32>
    %182 = arith.addf %179, %181 : vector<8x32xf32>
    %183 = vector.extract_strided_slice %25 {offsets = [0, 7, 0], sizes = [8, 1, 128], strides = [1, 1, 1]} : vector<8x8x128xf32> to vector<8x1x128xf32>
    %184 = vector.shape_cast %183 : vector<8x1x128xf32> to vector<8x128xf32>
    %cst_27 = arith.constant dense<0.000000e+00> : vector<8x128xf32>
    %185 = tpu.matmul %182, %26, %cst_27 {dimension_numbers = #tpu.dot_dimension_numbers<[1], [0], [0], [1], [0, 0, 1, 1], [], []>} : vector<8x32xf32>, vector<32x128xf32>, vector<8x128xf32> -> vector<8x128xf32>
    %186 = vector.broadcast %27 : vector<1x128xf32> to vector<8x128xf32>
    %187 = arith.addf %185, %186 : vector<8x128xf32>
    %188 = arith.addf %184, %187 : vector<8x128xf32>
    %189 = vector.extract_strided_slice %188 {offsets = [0, 0], sizes = [8, 64], strides = [1, 1]} : vector<8x128xf32> to vector<8x64xf32>
    %190 = arith.negf %189 : vector<8x64xf32>
    %191 = math.exp %190 : vector<8x64xf32>
    %cst_28 = arith.constant 1.000000e+00 : f32
    %192 = vector.broadcast %cst_28 : f32 to vector<8x64xf32>
    %193 = arith.addf %192, %191 : vector<8x64xf32>
    %194 = arith.divf %192, %193 : vector<8x64xf32>
    %195 = vector.extract_strided_slice %194 {offsets = [0, 0], sizes = [8, 32], strides = [1, 1]} : vector<8x64xf32> to vector<8x32xf32>
    %196 = vector.extract_strided_slice %194 {offsets = [0, 32], sizes = [8, 32], strides = [1, 1]} : vector<8x64xf32> to vector<8x32xf32>
    %197 = vector.extract_strided_slice %184 {offsets = [0, 64], sizes = [8, 32], strides = [1, 1]} : vector<8x128xf32> to vector<8x32xf32>
    %198 = vector.extract_strided_slice %187 {offsets = [0, 64], sizes = [8, 32], strides = [1, 1]} : vector<8x128xf32> to vector<8x32xf32>
    %199 = arith.mulf %195, %198 : vector<8x32xf32>
    %200 = arith.addf %197, %199 : vector<8x32xf32>
    %201 = math.tanh %200 : vector<8x32xf32>
    %202 = arith.subf %182, %201 : vector<8x32xf32>
    %203 = arith.mulf %196, %202 : vector<8x32xf32>
    %204 = arith.addf %201, %203 : vector<8x32xf32>
    %c0_29 = arith.constant 0 : index
    %c0_30 = arith.constant 0 : index
    %c0_31 = arith.constant 0 : index
    %205 = vector.load %arg4[%c0_29, %c0_30, %c0_31] : memref<1x8x32xf32, #tpu.memory_space<vmem>>, vector<1x8x32xf32>
    %206 = vector.shape_cast %205 : vector<1x8x32xf32> to vector<8x32xf32>
    %207 = vector.shape_cast %204 : vector<8x32xf32> to vector<1x8x32xf32>
    tpu.vector_store %arg4[%c0_29, %c0_30, %c0_31], %207 {strides = array<i32>} : memref<1x8x32xf32, #tpu.memory_space<vmem>>, vector<1x8x32xf32>,
    %c0_32 = arith.constant 0 : index
    %c0_33 = arith.constant 0 : index
    %208 = vector.load %arg1[%c0_32, %c0_33] : memref<16x128xf32, #tpu.memory_space<vmem>>, vector<1x128xf32>
    %209 = vector.extract_strided_slice %208 {offsets = [0, 0], sizes = [1, 32], strides = [1, 1]} : vector<1x128xf32> to vector<1x32xf32>
    %c1 = arith.constant 1 : index
    %c0_34 = arith.constant 0 : index
    %210 = vector.load %arg1[%c1, %c0_34] : memref<16x128xf32, #tpu.memory_space<vmem>>, vector<1x128xf32>
    %211 = vector.extract_strided_slice %210 {offsets = [0, 0], sizes = [1, 32], strides = [1, 1]} : vector<1x128xf32> to vector<1x32xf32>
    %cst_35 = arith.constant dense<0.000000e+00> : vector<8xf32>
    %212 = vector.multi_reduction <add>, %204, %cst_35 [1] : vector<8x32xf32> to vector<8xf32>
    %213 = vector.shape_cast %212 : vector<8xf32> to vector<8x1xf32>
    %cst_36 = arith.constant 3.200000e+01 : f32
    %214 = vector.broadcast %cst_36 : f32 to vector<8x1xf32>
    %215 = arith.divf %213, %214 : vector<8x1xf32>
    %216 = vector.broadcast %215 : vector<8x1xf32> to vector<8x32xf32>
    %217 = arith.subf %204, %216 : vector<8x32xf32>
    %218 = arith.mulf %217, %217 : vector<8x32xf32>
    %cst_37 = arith.constant dense<0.000000e+00> : vector<8xf32>
    %219 = vector.multi_reduction <add>, %218, %cst_37 [1] : vector<8x32xf32> to vector<8xf32>
    %220 = vector.shape_cast %219 : vector<8xf32> to vector<8x1xf32>
    %cst_38 = arith.constant 3.200000e+01 : f32
    %221 = vector.broadcast %cst_38 : f32 to vector<8x1xf32>
    %222 = arith.divf %220, %221 : vector<8x1xf32>
    %223 = vector.broadcast %215 : vector<8x1xf32> to vector<8x32xf32>
    %224 = arith.subf %204, %223 : vector<8x32xf32>
    %cst_39 = arith.constant 9.99999974E-6 : f32
    %225 = vector.broadcast %cst_39 : f32 to vector<8x1xf32>
    %226 = arith.addf %222, %225 : vector<8x1xf32>
    %227 = math.rsqrt %226 : vector<8x1xf32>
    %228 = vector.broadcast %227 : vector<8x1xf32> to vector<8x32xf32>
    %229 = arith.mulf %224, %228 : vector<8x32xf32>
    %230 = vector.broadcast %209 : vector<1x32xf32> to vector<8x32xf32>
    %231 = arith.mulf %229, %230 : vector<8x32xf32>
    %232 = vector.broadcast %211 : vector<1x32xf32> to vector<8x32xf32>
    %233 = arith.addf %231, %232 : vector<8x32xf32>
    %234 = tpu.iota {dimensions = array<i32: 1>} : vector<8x128xi32>
    %c32_i32 = arith.constant 32 : i32
    %235 = vector.broadcast %c32_i32 : i32 to vector<8x128xi32>
    %236 = arith.cmpi slt, %234, %235 : vector<8x128xi32>
    %c16_i32 = arith.constant 16 : i32
    %237 = vector.broadcast %c16_i32 : i32 to vector<8x128xi32>
    %238 = arith.cmpi slt, %234, %237 : vector<8x128xi32>
    %c40 = arith.constant 40 : index
    %c0_40 = arith.constant 0 : index
    %239 = vector.load %arg2[%c40, %c0_40] : memref<584x128xf32, #tpu.memory_space<vmem>>, vector<32x128xf32>
    %cst_41 = arith.constant dense<0.000000e+00> : vector<8x128xf32>
    %240 = tpu.matmul %233, %239, %cst_41 {dimension_numbers = #tpu.dot_dimension_numbers<[1], [0], [0], [1], [0, 0, 1, 1], [], []>} : vector<8x32xf32>, vector<32x128xf32>, vector<8x128xf32> -> vector<8x128xf32>
    %c4 = arith.constant 4 : index
    %c0_42 = arith.constant 0 : index
    %241 = vector.load %arg1[%c4, %c0_42] : memref<16x128xf32, #tpu.memory_space<vmem>>, vector<1x128xf32>
    %242 = vector.broadcast %241 : vector<1x128xf32> to vector<8x128xf32>
    %243 = arith.addf %240, %242 : vector<8x128xf32>
    %cst_43 = arith.constant 0.000000e+00 : f32
    %244 = vector.broadcast %cst_43 : f32 to vector<8x128xf32>
    %245 = arith.maximumf %243, %244 : vector<8x128xf32>
    %246 = math.absf %243 : vector<8x128xf32>
    %cst_44 = arith.constant 0.000000e+00 : f32
    %247 = vector.broadcast %cst_44 : f32 to vector<8x128xf32>
    %248 = arith.subf %247, %246 : vector<8x128xf32>
    %249 = math.exp %248 : vector<8x128xf32>
    %250 = math.log1p %249 : vector<8x128xf32>
    %251 = arith.addf %250, %245 : vector<8x128xf32>
    %252 = arith.select %236, %245, %251 : vector<8x128xi1>, vector<8x128xf32>
    %c72 = arith.constant 72 : index
    %c0_45 = arith.constant 0 : index
    %253 = vector.load %arg2[%c72, %c0_45] : memref<584x128xf32, #tpu.memory_space<vmem>>, vector<128x128xf32>
    %cst_46 = arith.constant dense<0.000000e+00> : vector<8x128xf32>
    %254 = tpu.matmul %252, %253, %cst_46 {dimension_numbers = #tpu.dot_dimension_numbers<[1], [0], [0], [1], [0, 0, 1, 1], [], []>} : vector<8x128xf32>, vector<128x128xf32>, vector<8x128xf32> -> vector<8x128xf32>
    %c5 = arith.constant 5 : index
    %c0_47 = arith.constant 0 : index
    %255 = vector.load %arg1[%c5, %c0_47] : memref<16x128xf32, #tpu.memory_space<vmem>>, vector<1x128xf32>
    %256 = vector.broadcast %255 : vector<1x128xf32> to vector<8x128xf32>
    %257 = arith.addf %254, %256 : vector<8x128xf32>
    %cst_48 = arith.constant 0.000000e+00 : f32
    %258 = vector.broadcast %cst_48 : f32 to vector<8x128xf32>
    %259 = arith.maximumf %257, %258 : vector<8x128xf32>
    %260 = math.absf %257 : vector<8x128xf32>
    %cst_49 = arith.constant 0.000000e+00 : f32
    %261 = vector.broadcast %cst_49 : f32 to vector<8x128xf32>
    %262 = arith.subf %261, %260 : vector<8x128xf32>
    %263 = math.exp %262 : vector<8x128xf32>
    %264 = math.log1p %263 : vector<8x128xf32>
    %265 = arith.addf %264, %259 : vector<8x128xf32>
    %266 = arith.select %236, %259, %265 : vector<8x128xi1>, vector<8x128xf32>
    %cst_50 = arith.constant 0.000000e+00 : f32
    %267 = vector.broadcast %cst_50 : f32 to vector<8x64xf32>
    %268 = tpu.concatenate %233, %233, %267 in 1 : vector<8x32xf32>, vector<8x32xf32>, vector<8x64xf32> -> vector<8x128xf32>
    %269 = arith.addf %266, %268 : vector<8x128xf32>
    %c200 = arith.constant 200 : index
    %c0_51 = arith.constant 0 : index
    %270 = vector.load %arg2[%c200, %c0_51] : memref<584x128xf32, #tpu.memory_space<vmem>>, vector<128x128xf32>
    %cst_52 = arith.constant dense<0.000000e+00> : vector<8x128xf32>
    %271 = tpu.matmul %269, %270, %cst_52 {dimension_numbers = #tpu.dot_dimension_numbers<[1], [0], [0], [1], [0, 0, 1, 1], [], []>} : vector<8x128xf32>, vector<128x128xf32>, vector<8x128xf32> -> vector<8x128xf32>
    %c6 = arith.constant 6 : index
    %c0_53 = arith.constant 0 : index
    %272 = vector.load %arg1[%c6, %c0_53] : memref<16x128xf32, #tpu.memory_space<vmem>>, vector<1x128xf32>
    %273 = vector.broadcast %272 : vector<1x128xf32> to vector<8x128xf32>
    %274 = arith.addf %271, %273 : vector<8x128xf32>
    %cst_54 = arith.constant 0.000000e+00 : f32
    %275 = vector.broadcast %cst_54 : f32 to vector<8x128xf32>
    %276 = arith.maximumf %274, %275 : vector<8x128xf32>
    %277 = math.absf %274 : vector<8x128xf32>
    %cst_55 = arith.constant 0.000000e+00 : f32
    %278 = vector.broadcast %cst_55 : f32 to vector<8x128xf32>
    %279 = arith.subf %278, %277 : vector<8x128xf32>
    %280 = math.exp %279 : vector<8x128xf32>
    %281 = math.log1p %280 : vector<8x128xf32>
    %282 = arith.addf %281, %276 : vector<8x128xf32>
    %283 = arith.select %238, %276, %282 : vector<8x128xi1>, vector<8x128xf32>
    %c328 = arith.constant 328 : index
    %c0_56 = arith.constant 0 : index
    %284 = vector.load %arg2[%c328, %c0_56] : memref<584x128xf32, #tpu.memory_space<vmem>>, vector<128x128xf32>
    %cst_57 = arith.constant dense<0.000000e+00> : vector<8x128xf32>
    %285 = tpu.matmul %283, %284, %cst_57 {dimension_numbers = #tpu.dot_dimension_numbers<[1], [0], [0], [1], [0, 0, 1, 1], [], []>} : vector<8x128xf32>, vector<128x128xf32>, vector<8x128xf32> -> vector<8x128xf32>
    %c7 = arith.constant 7 : index
    %c0_58 = arith.constant 0 : index
    %286 = vector.load %arg1[%c7, %c0_58] : memref<16x128xf32, #tpu.memory_space<vmem>>, vector<1x128xf32>
    %287 = vector.broadcast %286 : vector<1x128xf32> to vector<8x128xf32>
    %288 = arith.addf %285, %287 : vector<8x128xf32>
    %cst_59 = arith.constant 0.000000e+00 : f32
    %289 = vector.broadcast %cst_59 : f32 to vector<8x128xf32>
    %290 = arith.maximumf %288, %289 : vector<8x128xf32>
    %291 = math.absf %288 : vector<8x128xf32>
    %cst_60 = arith.constant 0.000000e+00 : f32
    %292 = vector.broadcast %cst_60 : f32 to vector<8x128xf32>
    %293 = arith.subf %292, %291 : vector<8x128xf32>
    %294 = math.exp %293 : vector<8x128xf32>
    %295 = math.log1p %294 : vector<8x128xf32>
    %296 = arith.addf %295, %290 : vector<8x128xf32>
    %297 = arith.select %238, %290, %296 : vector<8x128xi1>, vector<8x128xf32>
    %c456 = arith.constant 456 : index
    %c0_61 = arith.constant 0 : index
    %298 = vector.load %arg2[%c456, %c0_61] : memref<584x128xf32, #tpu.memory_space<vmem>>, vector<128x128xf32>
    %cst_62 = arith.constant dense<0.000000e+00> : vector<8x128xf32>
    %299 = tpu.matmul %297, %298, %cst_62 {dimension_numbers = #tpu.dot_dimension_numbers<[1], [0], [0], [1], [0, 0, 1, 1], [], []>} : vector<8x128xf32>, vector<128x128xf32>, vector<8x128xf32> -> vector<8x128xf32>
    %c8_63 = arith.constant 8 : index
    %c0_64 = arith.constant 0 : index
    %300 = vector.load %arg1[%c8_63, %c0_64] : memref<16x128xf32, #tpu.memory_space<vmem>>, vector<1x128xf32>
    %301 = vector.broadcast %300 : vector<1x128xf32> to vector<8x128xf32>
    %302 = arith.addf %299, %301 : vector<8x128xf32>
    %cst_65 = arith.constant 0.000000e+00 : f32
    %303 = vector.broadcast %cst_65 : f32 to vector<8x128xf32>
    %304 = arith.maximumf %302, %303 : vector<8x128xf32>
    %305 = math.absf %302 : vector<8x128xf32>
    %cst_66 = arith.constant 0.000000e+00 : f32
    %306 = vector.broadcast %cst_66 : f32 to vector<8x128xf32>
    %307 = arith.subf %306, %305 : vector<8x128xf32>
    %308 = math.exp %307 : vector<8x128xf32>
    %309 = math.log1p %308 : vector<8x128xf32>
    %310 = arith.addf %309, %304 : vector<8x128xf32>
    %311 = arith.select %238, %304, %310 : vector<8x128xi1>, vector<8x128xf32>
    %312 = arith.addf %311, %283 : vector<8x128xf32>
    %313 = vector.extract_strided_slice %312 {offsets = [0, 0], sizes = [8, 32], strides = [1, 1]} : vector<8x128xf32> to vector<8x32xf32>
    %c0_67 = arith.constant 0 : index
    %c0_68 = arith.constant 0 : index
    %314 = vector.load %arg3[%c0_67, %c0_68] : memref<8x32xf32, #tpu.memory_space<vmem>>, vector<8x32xf32>
    tpu.vector_store %arg3[%c0_67, %c0_68], %313 {strides = array<i32>} : memref<8x32xf32, #tpu.memory_space<vmem>>, vector<8x32xf32>,
    return
  }
}

</mosaic_0001>

<bundles_post_ra>
// kernel: tpu_custom_call.1
= control target key start
LH: loop header
LB: loop body
LE: loop exit
PB: predicated region body
PF: predicated region fallthrough
CT: control target
= control target key end

     0   :  { %10 = vsyncpa [#allocation3], 0  ;;  %s6661_s0 = inlined_call_operand.vmem [shape: f32[8,8,4], index: 0, kind: input, shape index: {}]   ;;  %s6662_s1 = inlined_call_operand.vmem [shape: f32[16,128], index: 1, kind: input, shape index: {}]   ;;  %s6663_s2 = inlined_call_operand.hbm [shape: f32[584,128], index: 2, kind: input, shape index: {}]   ;;  %s6664_s3 = inlined_call_operand.hbm [shape: f32[8,32], index: 3, kind: output, shape index: {0}]   ;;  %s6665_s4 = inlined_call_operand.hbm [shape: f32[1,8,32], index: 4, kind: output, shape index: {1}]  }
   0x1   :  { %11 = vsyncpa [#allocation4], 0 }
   0x2   :  { %12 = vsyncpa [#allocation7], 0  ;;  %s5108_s15 = smov [#allocation2]   ;;  %s5036_s19 = scalar_lea.hbm %s6663_s2, 9344 }
   0x3   :  { %s22_s16 = sshll.u32 %s5108_s15, 4  ;;  %p5037_p0 = scmp.ne.s32.totalorder %s6663_s2, %s5036_s19  ;;  %s23_s16 = int_to_ptr.vmem [resolvable:$true] %s22_s16 }
   0x4   :  { %p5040_p1 = scmp.lt.u32.totalorder %s5036_s19, %s6663_s2 }
   0x6   :  { %p5042_p2 = pnand %p5040_p1, %p5037_p0 }
   0x8   :  { %5045 = shalt.err (!%p5042_p2)
}
   0x9   :  { %s5046_s24 = scalar_lea.vmem %s23_s16, 9344  ;;  %p5051_p4 = scmp.lt.s32.totalorder %s23_s16, %s23_s16 }
   0xa   :  { %p5047_p3 = scmp.ne.s32.totalorder %s23_s16, %s5046_s24  ;;  %p5052_p5 = scmp.lt.s32.totalorder %s5046_s24, %s5046_s24 }
   0xc   :  { %p5053_p6 = por %p5052_p5, %p5051_p4 }
   0xe   :  { %p5054_p7 = pnand %p5053_p6, %p5047_p3 }
  0x10   :  { %5057 = shalt.err (!%p5054_p7)
}
  0x11   :  { %s5109_s25 = smov 128   ;;  %s5110_s26 = smov 8  }
  0x12   :  { %28 = dma.hbm_to_vmem [thread:$0]  %s6663_s2, 9344, %s23_s16, [#allocation3], %s5109_s25, %s5109_s25, %s5110_s26  }
  0x13   :  { %5102 = dma.done.wait [#allocation3], 9344  }
  0x14   :  { %5103 = vsyncadd [#allocation3], 4294957952  ;;  %vm40_vm0 = vcmask 31744   ;;  %v32_v0 = vld [vmem:[%s6661_s0] sm:$0xff]  ;;  %v34_v1 = vld [vmem:[%s6661_s0 + $0x10] sm:$0xff]  ;;  %v5111_v19 = vmov 0.0|0.0  }
  0x15   :  { %v33_v2 = vld [vmem:[%s6661_s0 + $0x8] sm:$0xff]  ;;  %v41_v3 = vsel %vm40_vm0, %v32_v0, 0.0  ;;  %v47_v4 = vsel %vm40_vm0, %v34_v1, 0.0  ;;  %v35_v5 = vld [vmem:[%s6661_s0 + $0x18] sm:$0xff]  ;;  %v36_v8 = vld [vmem:[%s6661_s0 + $0x20] sm:$0xff]  ;;  %4449 = vmatprep.subr.bf16.mxu1 %v5111_v19  ;;  %vm5112_vm1 = vmmov 0  }
  0x16   :  { %42 = vadd.xlane.f32.xlu0 %v41_v3  ;;  %48 = vadd.xlane.f32.xlu1 %v47_v4  ;;  %v44_v6 = vsel %vm40_vm0, %v33_v2, 0.0  ;;  %v50_v7 = vsel %vm40_vm0, %v35_v5, 0.0  ;;  %v37_v9 = vld [vmem:[%s6661_s0 + $0x28] sm:$0xff]  ;;  %v53_v10 = vsel %vm40_vm0, %v36_v8, 0.0  ;;  %v5183_v12 = vld [vmem:[%s6661_s0 + $0x30] sm:$0xff]  ;;  %v5188_v13 = vld [vmem:[%s6661_s0 + $0x38] sm:$0xff] }
  0x17   :  { %v56_v11 = vsel %vm40_vm0, %v37_v9, 0.0  ;;  %v59_v14 = vsel %vm40_vm0, %v5183_v12, 0.0  ;;  %v62_v15 = vsel %vm40_vm0, %v5188_v13, 0.0  ;;  %v285_v16 = vld [vmem:[#allocation2 + $0x8] sm:$0xff]  ;;  %v286_v17 = vld [vmem:[#allocation2 + $0x10] sm:$0xff]  ;;  %v287_v18 = vld [vmem:[#allocation2 + $0x18] sm:$0xff] }
  0x18   :  { %v5195_v20 = vpack.c.bf16 %v286_v17, %v285_v16  ;;  %v288_v21 = vld [vmem:[#allocation2 + $0x20] sm:$0xff]  ;;  %v5113_v22 = vmov 0.0   ;;  %vm176_vm2 = vcmask 1043456   ;;  %s5114_s19 = smov 64   ;;  %s5115_s22 = smov 96   ;;  %vm617_vm3 = vcmask 1041409  }
  0x19   :  { %4218 = vmatprep.mubr.msk.f32.mxu1 %vm5112_vm1, %v5113_v22  ;;  %v5200_v23 = vpack.c.bf16 %v288_v21, %v287_v18  ;;  %s5116_s23 = smov 32   ;;  %vm620_vm4 = vcmask 1042434   ;;  %vm623_vm5 = vcmask 1043459   ;;  %vm626_vm6 = vcmask 1044484   ;;  %s5117_s13 = smov [#allocation6]  }
  0x1a   :  { %45 = vadd.xlane.f32.xlu0 %v44_v6  ;;  %51 = vadd.xlane.f32.xlu1 %v50_v7  ;;  %vm629_vm7 = vcmask 1045509   ;;  %vm632_vm8 = vcmask 1046534   ;;  %vm635_vm9 = vcmask 1047559   ;;  %vm294_vm10 = vcmask 261120   ;;  %s3971_s14 = sshll.u32 %s5117_s13, 4  ;;  %s3972_s14 = int_to_ptr.vmem [resolvable:$true] %s3971_s14 }
  0x1b   :  { %4451 = vmatpush3.bf16.msra.mxu1 %v5195_v20  ;;  %vm3218_vm11 = vcmask 261127   ;;  %vm3220_vm12 = vcmask 260096   ;;  %vm3621_vm15 = vcmask 523264   ;;  %s5058_s15 = scalar_lea.vmem %s3972_s14, 128  ;;  %p5063_p9 = scmp.lt.s32.totalorder %s3972_s14, %s3972_s14 }
  0x1c   :  { %4452 = vmatprep.subr.bf16.mxu1 %v5111_v19  ;;  %p5059_p8 = scmp.ne.s32.totalorder %s3972_s14, %s5058_s15  ;;  %p5064_p10 = scmp.lt.s32.totalorder %s5058_s15, %s5058_s15 }
  0x1e   :  { %54 = vadd.xlane.f32.xlu0 %v53_v10  ;;  %57 = vadd.xlane.f32.xlu1 %v56_v11  ;;  %p5065_p11 = por %p5064_p10, %p5063_p9 }
  0x1f   :  { %4454 = vmatpush3.bf16.msra.mxu1 %v5200_v23 }
  0x20   :  { %4455 = vmatprep.subr.bf16.mxu1 %v5111_v19  ;;  %p5066_p12 = pnand %p5065_p11, %p5059_p8 }
  0x22   :  { %60 = vadd.xlane.f32.xlu0 %v59_v14  ;;  %63 = vadd.xlane.f32.xlu1 %v62_v15 }
  0x23   :  { %4219 = vmatmul.mubr.f32.vlgmr.msra.gmra.mrb[0].mxu1 %v5113_v22 }
  0x24   :  { %4457 = vmatpush3.bf16.msra.mxu1 %v5195_v20  ;;  %4229 = vmatprep.mubr.msk.f32.mxu1 %vm5112_vm1, %v5113_v22 }
  0x25   :  { %4458 = vmatprep.subr.bf16.mxu1 %v5111_v19 }
  0x28   :  { %4460 = vmatpush3.bf16.msra.mxu1 %v5200_v23 }
  0x29   :  { %4467 = vmatprep.subr.bf16.mxu1 %v5111_v19 }
  0xa3   :  { %v43_v24 = vpop.xlane.xlu0 %42  ;;  %v49_v25 = vpop.xlane.xlu1 %48 }
  0xa4   :  { %v66_v26 = vmul.f32 0.25, %v43_v24  ;;  %v68_v27 = vmul.f32 0.25, %v49_v25 }
  0xa6   :  { %v5212_v28 = vsub.f32 %v32_v0, %v66_v26  ;;  %v5214_v29 = vsub.f32 %v34_v1, %v68_v27  ;;  %v146_v0 = vld [vmem:[#allocation2] sm:$0xf] }
  0xa7   :  { %v46_v30 = vpop.xlane.xlu0 %45  ;;  %v52_v31 = vpop.xlane.xlu1 %51  ;;  %4196 = vmatprep.subr.msk.mxu0 %vm176_vm2, %v146_v0  ;;  %v5258_v1 = vld [vmem:[%s6662_s1 + $0x3] ss:$0 sm:$0xff] }
  0xa8   :  { %v67_v32 = vmul.f32 0.25, %v46_v30  ;;  %v69_v33 = vmul.f32 0.25, %v52_v31  ;;  %v82_v34 = vmul.f32 %v5212_v28, %v5212_v28  ;;  %v84_v35 = vmul.f32 %v5214_v29, %v5214_v29  ;;  %4197 = vmatpush3.msk.msra.mxu0 %vm176_vm2, %v146_v0 }
  0xa9   :  { %4461 = vmatprep.subr.bf16.mxu0 %v5111_v19  ;;  %vm3626_vm2 = vcmask 1040384  }
  0xaa   :  { %v5220_v36 = vsub.f32 %v33_v2, %v67_v32  ;;  %v5222_v37 = vsub.f32 %v35_v5, %v69_v33  ;;  %v90_v38 = vsel %vm40_vm0, %v82_v34, 0.0  ;;  %v96_v41 = vsel %vm40_vm0, %v84_v35, 0.0 }
  0xab   :  { %91 = vadd.xlane.f32.xlu0 %v90_v38  ;;  %v55_v39 = vpop.xlane.xlu0 %54  ;;  %v58_v40 = vpop.xlane.xlu1 %57 }
  0xac   :  { %v70_v42 = vmul.f32 0.25, %v55_v39  ;;  %v71_v43 = vmul.f32 0.25, %v58_v40  ;;  %v83_v44 = vmul.f32 %v5220_v36, %v5220_v36  ;;  %v85_v45 = vmul.f32 %v5222_v37, %v5222_v37 }
  0xae   :  { %v5230_v46 = vsub.f32 %v36_v8, %v70_v42  ;;  %v5232_v47 = vsub.f32 %v37_v9, %v71_v43  ;;  %v93_v48 = vsel %vm40_vm0, %v83_v44, 0.0  ;;  %v99_v51 = vsel %vm40_vm0, %v85_v45, 0.0 }
  0xaf   :  { %97 = vadd.xlane.f32.xlu0 %v96_v41  ;;  %94 = vadd.xlane.f32.xlu1 %v93_v48  ;;  %v61_v49 = vpop.xlane.xlu0 %60  ;;  %v64_v50 = vpop.xlane.xlu1 %63 }
  0xb0   :  { %v72_v52 = vmul.f32 0.25, %v61_v49  ;;  %v73_v53 = vmul.f32 0.25, %v64_v50  ;;  %v86_v54 = vmul.f32 %v5230_v46, %v5230_v46  ;;  %v87_v55 = vmul.f32 %v5232_v47, %v5232_v47 }
  0xb2   :  { %v5241_v56 = vsub.f32 %v5183_v12, %v72_v52  ;;  %v5244_v57 = vsub.f32 %v5188_v13, %v73_v53  ;;  %v102_v58 = vsel %vm40_vm0, %v86_v54, 0.0  ;;  %v105_v59 = vsel %vm40_vm0, %v87_v55, 0.0 }
  0xb3   :  { %100 = vadd.xlane.f32.xlu1 %v99_v51  ;;  %103 = vadd.xlane.f32.xlu0 %v102_v58 }
  0xb4   :  { %v88_v60 = vmul.f32 %v5241_v56, %v5241_v56  ;;  %v89_v61 = vmul.f32 %v5244_v57, %v5244_v57 }
  0xb6   :  { %v108_v62 = vsel %vm40_vm0, %v88_v60, 0.0  ;;  %v111_v63 = vsel %vm40_vm0, %v89_v61, 0.0 }
  0xb7   :  { %106 = vadd.xlane.f32.xlu1 %v105_v59  ;;  %109 = vadd.xlane.f32.xlu0 %v108_v62 }
  0xbb   :  { %112 = vadd.xlane.f32.xlu1 %v111_v63 }
  0xf6   :  { %v364_v2 = vpop.f32.mrb[0].mxu1 }
  0xf7   :  { %v5261_v3 = vadd.f32 %v5258_v1, %v364_v2  ;;  %v4220_v4 = vpop.f32.mrb[1].mxu1 }
  0xf9   :  { %440 = vrot.lane.b32.xlu1 %v5261_v3, %s5114_s19  ;;  %v370_v5 = vrot.slane %v5261_v3, 2  ;;  %v369_v6 = vrot.slane %v5261_v3, 1  ;;  %v372_v7 = vrot.slane %v5261_v3, 4  ;;  %v371_v8 = vrot.slane %v5261_v3, 3 }
  0xfa   :  { %v374_v9 = vrot.slane %v5261_v3, 6  ;;  %v373_v10 = vrot.slane %v5261_v3, 5  ;;  %v375_v11 = vrot.slane %v5261_v3, 7 }
  0xfb   :  { %442 = vrot.lane.b32.xlu0 %v369_v6, %s5114_s19 }
  0xfd   :  { %444 = vrot.lane.b32.xlu1 %v370_v5, %s5114_s19 }
  0xff   :  { %448 = vrot.lane.b32.xlu0 %v372_v7, %s5114_s19 }
 0x101   :  { %446 = vrot.lane.b32.xlu1 %v371_v8, %s5114_s19 }
 0x103   :  { %452 = vrot.lane.b32.xlu0 %v374_v9, %s5114_s19 }
 0x105   :  { %450 = vrot.lane.b32.xlu1 %v373_v10, %s5114_s19 }
 0x109   :  { %454 = vrot.lane.b32.xlu1 %v375_v11, %s5114_s19 }
 0x138   :  { %v92_v12 = vpop.xlane.xlu0 %91 }
 0x139   :  { %v114_v13 = vmul.f32 0.25, %v92_v12 }
 0x13b   :  { %v122_v14 = vadd.f32 1e-05, %v114_v13 }
 0x13c   :  { %v95_v15 = vpop.xlane.xlu1 %94  ;;  %v98_v16 = vpop.xlane.xlu0 %97 }
 0x13d   :  { %4610 = vrsqrt.f32 %v122_v14  ;;  %v115_v17 = vmul.f32 0.25, %v95_v15  ;;  %v116_v18 = vmul.f32 0.25, %v98_v16 }
 0x13f   :  { %v123_v21 = vadd.f32 1e-05, %v115_v17  ;;  %v124_v24 = vadd.f32 1e-05, %v116_v18 }
 0x140   :  { %v101_v25 = vpop.xlane.xlu1 %100  ;;  %v104_v26 = vpop.xlane.xlu0 %103 }
 0x141   :  { %4612 = vrsqrt.f32 %v123_v21  ;;  %v117_v27 = vmul.f32 0.25, %v101_v25  ;;  %v118_v30 = vmul.f32 0.25, %v104_v26 }
 0x142   :  { %4614 = vrsqrt.f32 %v124_v24 }
 0x143   :  { %v125_v31 = vadd.f32 1e-05, %v117_v27  ;;  %v126_v32 = vadd.f32 1e-05, %v118_v30 }
 0x144   :  { %v107_v33 = vpop.xlane.xlu1 %106  ;;  %v110_v34 = vpop.xlane.xlu0 %109 }
 0x145   :  { %4616 = vrsqrt.f32 %v125_v31  ;;  %v119_v35 = vmul.f32 0.25, %v107_v33  ;;  %v120_v38 = vmul.f32 0.25, %v110_v34 }
 0x146   :  { %4618 = vrsqrt.f32 %v126_v32 }
 0x147   :  { %v4611_v39 = vpop.eup %4610  ;;  %v127_v40 = vadd.f32 1e-05, %v119_v35  ;;  %v128_v41 = vadd.f32 1e-05, %v120_v38 }
 0x148   :  { %v113_v42 = vpop.xlane.xlu1 %112  ;;  %v138_v43 = vmul.f32 %v4611_v39, %v5212_v28 }
 0x149   :  { %4620 = vrsqrt.f32 %v127_v40  ;;  %v121_v44 = vmul.f32 0.25, %v113_v42 }
 0x14a   :  { %4622 = vrsqrt.f32 %v128_v41  ;;  %4198 = vmatprep.mubr.msk.f32.mxu0 %vm40_vm0, %v138_v43 }
 0x14b   :  { %v4613_v45 = vpop.eup %4612  ;;  %v129_v48 = vadd.f32 1e-05, %v121_v44 }
 0x14c   :  { %v4615_v49 = vpop.eup %4614  ;;  %v139_v50 = vmul.f32 %v4613_v45, %v5220_v36 }
 0x14d   :  { %4624 = vrsqrt.f32 %v129_v48  ;;  %v140_v51 = vmul.f32 %v4615_v49, %v5214_v29 }
 0x14e   :  { %4199 = vmatmul.mubr.msk.f32.vlgmr.msra.gmra.mrb[0].mxu0 %vm40_vm0, %v139_v50 }
 0x14f   :  { %v4617_v52 = vpop.eup %4616  ;;  %4201 = vmatprep.mubr.msk.f32.mxu0 %vm40_vm0, %v140_v51  ;;  %4463 = vmatpush3.bf16.msra.mxu0 %v5195_v20 }
 0x150   :  { %v4619_v28 = vpop.eup %4618  ;;  %v141_v53 = vmul.f32 %v4617_v52, %v5222_v37  ;;  %4464 = vmatprep.subr.bf16.mxu0 %v5111_v19 }
 0x151   :  { %v142_v54 = vmul.f32 %v4619_v28, %v5230_v46 }
 0x152   :  { %4202 = vmatmul.mubr.msk.f32.gmra.mrb[2].mxu0 %vm40_vm0, %v141_v53 }
 0x153   :  { %v4621_v36 = vpop.eup %4620  ;;  %4204 = vmatprep.mubr.msk.f32.mxu0 %vm40_vm0, %v142_v54  ;;  %4466 = vmatpush3.bf16.msra.mxu0 %v5200_v23 }
 0x154   :  { %v4623_v29 = vpop.eup %4622  ;;  %v143_v55 = vmul.f32 %v4621_v36, %v5232_v47  ;;  %4473 = vmatprep.subr.bf16.mxu0 %v5111_v19  ;;  %v3984_v47 = vld [vmem:[%s6662_s1 + $0x2] ss:$0 sm:$0xff] }
 0x155   :  { %v144_v58 = vmul.f32 %v4623_v29, %v5241_v56 }
 0x156   :  { %4205 = vmatmul.mubr.msk.f32.gmra.mrb[4].mxu0 %vm40_vm0, %v143_v55 }
 0x157   :  { %v4625_v37 = vpop.eup %4624  ;;  %4207 = vmatprep.mubr.msk.f32.mxu0 %vm40_vm0, %v144_v58 }
 0x158   :  { %v145_v46 = vmul.f32 %v4625_v37, %v5244_v57 }
 0x15a   :  { %4208 = vmatmul.mubr.msk.f32.gmra.mrb[6].mxu0 %vm40_vm0, %v145_v46 }
 0x15b   :  { %4240 = vmatprep.mubr.msk.f32.mxu0 %vm5112_vm1, %v5113_v22 }
 0x16b   :  { %v441_v43 = vpop.permute.xlu1 %440 }
 0x16d   :  { %v443_v52 = vpop.permute.xlu0 %442 }
 0x16f   :  { %v445_v49 = vpop.permute.xlu1 %444 }
 0x173   :  { %v447_v58 = vpop.permute.xlu1 %446 }
 0x221   :  { %v4200_v59 = vpop.f32.mrb[0].mxu0 }
 0x222   :  { %v5318_v60 = vadd.f32 %v4200_v59, %v3984_v47  ;;  %v246_v56 = vpop.f32.mrb[1].mxu0 }
 0x223   :  { %v5320_v61 = vadd.f32 %v3984_v47, %v246_v56 }
 0x224   :  { %v385_v62 = vadd.f32 %v369_v6, %v5318_v60 }
 0x225   :  { %v4203_v57 = vpop.f32.mrb[2].mxu0  ;;  %v384_v63 = vadd.f32 %v5261_v3, %v5320_v61 }
 0x226   :  { %v5327_v0 = vadd.f32 %v4203_v57, %v3984_v47  ;;  %v256_v2 = vpop.f32.mrb[3].mxu0  ;;  %v3996_v4 = vmul.f32 -1.442695, %v385_v62  ;;  %v449_v62 = vpop.permute.xlu0 %448 }
 0x227   :  { %v5329_v12 = vadd.f32 %v3984_v47, %v256_v2  ;;  %v3995_v13 = vmul.f32 -1.442695, %v384_v63  ;;  %v451_v63 = vpop.permute.xlu1 %450 }
 0x228   :  { %v387_v14 = vadd.f32 %v371_v8, %v5327_v0  ;;  %4626 = vpow2.f32 %v3996_v4 }
 0x229   :  { %v4206_v15 = vpop.f32.mrb[4].mxu0  ;;  %4628 = vpow2.f32 %v3995_v13  ;;  %v386_v6 = vadd.f32 %v370_v5, %v5329_v12 }
 0x22a   :  { %v5337_v16 = vadd.f32 %v4206_v15, %v3984_v47  ;;  %v266_v17 = vpop.f32.mrb[5].mxu0  ;;  %v3998_v18 = vmul.f32 -1.442695, %v387_v14  ;;  %v453_v15 = vpop.permute.xlu0 %452 }
 0x22b   :  { %v5339_v21 = vadd.f32 %v3984_v47, %v266_v17  ;;  %v3997_v24 = vmul.f32 -1.442695, %v386_v6  ;;  %v455_v6 = vpop.permute.xlu1 %454 }
 0x22c   :  { %4630 = vpow2.f32 %v3998_v18  ;;  %v389_v25 = vadd.f32 %v373_v10, %v5337_v16 }
 0x22d   :  { %v4209_v8 = vpop.f32.mrb[6].mxu0  ;;  %4632 = vpow2.f32 %v3997_v24  ;;  %v388_v26 = vadd.f32 %v372_v7, %v5339_v21 }
 0x22e   :  { %v5347_v27 = vadd.f32 %v4209_v8, %v3984_v47  ;;  %v276_v5 = vpop.f32.mrb[7].mxu0  ;;  %v4000_v30 = vmul.f32 -1.442695, %v389_v25 }
 0x22f   :  { %v5349_v31 = vadd.f32 %v3984_v47, %v276_v5  ;;  %v3999_v32 = vmul.f32 -1.442695, %v388_v26 }
 0x230   :  { %4634 = vpow2.f32 %v4000_v30  ;;  %v391_v33 = vadd.f32 %v375_v11, %v5347_v27 }
 0x231   :  { %4636 = vpow2.f32 %v3999_v32  ;;  %v390_v10 = vadd.f32 %v374_v9, %v5349_v31 }
 0x232   :  { %v4627_v34 = vpop.eup %4626  ;;  %v4002_v35 = vmul.f32 -1.442695, %v391_v33 }
 0x233   :  { %v4629_v7 = vpop.eup %4628  ;;  %v417_v38 = vadd.f32 1.0, %v4627_v34  ;;  %v4001_v39 = vmul.f32 -1.442695, %v390_v10 }
 0x234   :  { %v416_v40 = vadd.f32 1.0, %v4629_v7  ;;  %4638 = vpow2.f32 %v4002_v35 }
 0x235   :  { %4640 = vrcp.f32 %v417_v38 }
 0x236   :  { %v4631_v41 = vpop.eup %4630  ;;  %4642 = vrcp.f32 %v416_v40 }
 0x237   :  { %v4633_v42 = vpop.eup %4632  ;;  %v419_v44 = vadd.f32 1.0, %v4631_v41  ;;  %4644 = vpow2.f32 %v4001_v39 }
 0x238   :  { %v418_v11 = vadd.f32 1.0, %v4633_v42 }
 0x239   :  { %4646 = vrcp.f32 %v419_v44 }
 0x23a   :  { %v4635_v45 = vpop.eup %4634  ;;  %4648 = vrcp.f32 %v418_v11 }
 0x23b   :  { %v4637_v48 = vpop.eup %4636  ;;  %v421_v3 = vadd.f32 1.0, %v4635_v45 }
 0x23c   :  { %v420_v9 = vadd.f32 1.0, %v4637_v48 }
 0x23e   :  { %v4639_v50 = vpop.eup %4638  ;;  %4650 = vrcp.f32 %v420_v9 }
 0x23f   :  { %v5357_v51 = vpop.eup %4640  ;;  %4652 = vrcp.f32 %v421_v3  ;;  %v423_v28 = vadd.f32 1.0, %v4639_v50 }
 0x240   :  { %v5359_v53 = vpop.eup %4642  ;;  %v465_v54 = vmul.f32 %v5357_v51, %v443_v52 }
 0x241   :  { %v4645_v36 = vpop.eup %4644  ;;  %4654 = vrcp.f32 %v423_v28  ;;  %v464_v37 = vmul.f32 %v5359_v53, %v441_v43 }
 0x242   :  { %v422_v29 = vadd.f32 1.0, %v4645_v36  ;;  %482 = vrot.lane.b32.xlu0 %v465_v54, %s5114_s19 }
 0x243   :  { %v5363_v55 = vpop.eup %4646 }
 0x244   :  { %v467_v46 = vmul.f32 %v5363_v55, %v447_v58  ;;  %4656 = vrcp.f32 %v422_v29  ;;  %v5367_v47 = vpop.eup %4648 }
 0x245   :  { %v466_v56 = vmul.f32 %v5367_v47, %v445_v49 }
 0x246   :  { %486 = vrot.lane.b32.xlu1 %v467_v46, %s5114_s19  ;;  %480 = vrot.lane.b32.xlu0 %v464_v37, %s5114_s19 }
 0x248   :  { %v5371_v59 = vpop.eup %4650 }
 0x249   :  { %v5374_v57 = vpop.eup %4652  ;;  %v468_v2 = vmul.f32 %v5371_v59, %v449_v62 }
 0x24a   :  { %484 = vrot.lane.b32.xlu1 %v466_v56, %s5114_s19  ;;  %v469_v4 = vmul.f32 %v5374_v57, %v451_v63 }
 0x24b   :  { %488 = vrot.lane.b32.xlu0 %v468_v2, %s5114_s19  ;;  %v5380_v13 = vpop.eup %4654 }
 0x24c   :  { %v471_v18 = vmul.f32 %v5380_v13, %v455_v6 }
 0x24e   :  { %v5382_v14 = vpop.eup %4656  ;;  %490 = vrot.lane.b32.xlu1 %v469_v4, %s5114_s19 }
 0x24f   :  { %v470_v17 = vmul.f32 %v5382_v14, %v453_v15 }
 0x251   :  { %492 = vrot.lane.b32.xlu0 %v470_v17, %s5114_s19 }
 0x252   :  { %494 = vrot.lane.b32.xlu1 %v471_v18, %s5114_s19 }
 0x2b4   :  { %v483_v24 = vpop.permute.xlu0 %482 }
 0x2b5   :  { %v505_v25 = vadd.f32 %v483_v24, %v5318_v60 }
 0x2b7   :  { %4658 = vtanh.f32 %v505_v25 }
 0x2b8   :  { %v487_v8 = vpop.permute.xlu1 %486  ;;  %v481_v26 = vpop.permute.xlu0 %480 }
 0x2b9   :  { %v507_v5 = vadd.f32 %v487_v8, %v5327_v0  ;;  %v504_v30 = vadd.f32 %v481_v26, %v5320_v61 }
 0x2bb   :  { %4660 = vtanh.f32 %v507_v5 }
 0x2bc   :  { %4662 = vtanh.f32 %v504_v30  ;;  %v485_v32 = vpop.permute.xlu1 %484 }
 0x2bd   :  { %v506_v33 = vadd.f32 %v485_v32, %v5329_v12  ;;  %v489_v10 = vpop.permute.xlu0 %488 }
 0x2be   :  { %v508_v34 = vadd.f32 %v489_v10, %v5339_v21 }
 0x2bf   :  { %4664 = vtanh.f32 %v506_v33 }
 0x2c0   :  { %4666 = vtanh.f32 %v508_v34  ;;  %v491_v35 = vpop.permute.xlu1 %490 }
 0x2c1   :  { %v4659_v7 = vpop.eup %4658  ;;  %v509_v38 = vadd.f32 %v491_v35, %v5337_v16 }
 0x2c2   :  { %v521_v39 = vsub.f32 0.0, %v4659_v7 }
 0x2c3   :  { %4668 = vtanh.f32 %v509_v38  ;;  %v493_v40 = vpop.permute.xlu0 %492 }
 0x2c4   :  { %v510_v41 = vadd.f32 %v493_v40, %v5349_v31  ;;  %v495_v42 = vpop.permute.xlu1 %494  ;;  %538 = vrot.lane.b32.xlu0 %v521_v39, %s5115_s22 }
 0x2c5   :  { %v4661_v43 = vpop.eup %4660  ;;  %v511_v44 = vadd.f32 %v495_v42, %v5347_v27 }
 0x2c6   :  { %v4663_v11 = vpop.eup %4662  ;;  %4670 = vtanh.f32 %v510_v41  ;;  %v523_v45 = vsub.f32 0.0, %v4661_v43 }
 0x2c7   :  { %4672 = vtanh.f32 %v511_v44  ;;  %v520_v48 = vsub.f32 0.0, %v4663_v11 }
 0x2c8   :  { %542 = vrot.lane.b32.xlu1 %v523_v45, %s5115_s22 }
 0x2c9   :  { %v4665_v3 = vpop.eup %4664  ;;  %536 = vrot.lane.b32.xlu0 %v520_v48, %s5115_s22 }
 0x2ca   :  { %v4667_v9 = vpop.eup %4666  ;;  %v522_v49 = vsub.f32 0.0, %v4665_v3 }
 0x2cb   :  { %v524_v50 = vsub.f32 0.0, %v4667_v9 }
 0x2cc   :  { %540 = vrot.lane.b32.xlu1 %v522_v49, %s5115_s22 }
 0x2cd   :  { %v4669_v52 = vpop.eup %4668  ;;  %544 = vrot.lane.b32.xlu0 %v524_v50, %s5115_s22 }
 0x2ce   :  { %v525_v28 = vsub.f32 0.0, %v4669_v52 }
 0x2d0   :  { %v4671_v54 = vpop.eup %4670  ;;  %546 = vrot.lane.b32.xlu1 %v525_v28, %s5115_s22 }
 0x2d1   :  { %v4673_v36 = vpop.eup %4672  ;;  %v526_v29 = vsub.f32 0.0, %v4671_v54 }
 0x2d2   :  { %v527_v58 = vsub.f32 0.0, %v4673_v36 }
 0x2d3   :  { %548 = vrot.lane.b32.xlu0 %v526_v29, %s5115_s22 }
 0x2d4   :  { %550 = vrot.lane.b32.xlu1 %v527_v58, %s5115_s22 }
 0x336   :  { %v539_v37 = vpop.permute.xlu0 %538 }
 0x337   :  { %v561_v46 = vmul.f32 %v5357_v51, %v539_v37 }
 0x339   :  { %578 = vrot.lane.b32.xlu0 %v561_v46, %s5116_s23 }
 0x33a   :  { %v543_v56 = vpop.permute.xlu1 %542 }
 0x33b   :  { %v563_v62 = vmul.f32 %v5363_v55, %v543_v56  ;;  %v537_v63 = vpop.permute.xlu0 %536 }
 0x33c   :  { %v560_v2 = vmul.f32 %v5359_v53, %v537_v63 }
 0x33d   :  { %582 = vrot.lane.b32.xlu1 %v563_v62, %s5116_s23 }
 0x33e   :  { %576 = vrot.lane.b32.xlu0 %v560_v2, %s5116_s23  ;;  %v541_v4 = vpop.permute.xlu1 %540 }
 0x33f   :  { %v562_v15 = vmul.f32 %v5367_v47, %v541_v4  ;;  %v545_v6 = vpop.permute.xlu0 %544 }
 0x340   :  { %v564_v17 = vmul.f32 %v5371_v59, %v545_v6 }
 0x341   :  { %580 = vrot.lane.b32.xlu1 %v562_v15, %s5116_s23 }
 0x342   :  { %v547_v51 = vpop.permute.xlu1 %546  ;;  %584 = vrot.lane.b32.xlu0 %v564_v17, %s5116_s23 }
 0x343   :  { %v565_v55 = vmul.f32 %v5374_v57, %v547_v51 }
 0x345   :  { %v549_v18 = vpop.permute.xlu0 %548  ;;  %586 = vrot.lane.b32.xlu1 %v565_v55, %s5116_s23 }
 0x346   :  { %v566_v53 = vmul.f32 %v5382_v14, %v549_v18  ;;  %v551_v24 = vpop.permute.xlu1 %550 }
 0x347   :  { %v567_v25 = vmul.f32 %v5380_v13, %v551_v24 }
 0x348   :  { %588 = vrot.lane.b32.xlu0 %v566_v53, %s5116_s23 }
 0x349   :  { %590 = vrot.lane.b32.xlu1 %v567_v25, %s5116_s23 }
 0x3ab   :  { %v579_v47 = vpop.permute.xlu0 %578 }
 0x3ac   :  { %v5421_v26 = vadd.f32 %v4659_v7, %v579_v47 }
 0x3ae   :  { %v616_v13 = vrot.slane %v5421_v26, 7 }
 0x3af   :  { %v583_v59 = vpop.permute.xlu1 %582 }
 0x3b0   :  { %v577_v8 = vpop.permute.xlu0 %576  ;;  %v5423_v5 = vadd.f32 %v4661_v43, %v583_v59 }
 0x3b1   :  { %v5425_v57 = vadd.f32 %v4663_v11, %v577_v8 }
 0x3b2   :  { %v622_v34 = vrot.slane %v5423_v5, 5 }
 0x3b3   :  { %v581_v30 = vpop.permute.xlu1 %580  ;;  %v618_v35 = vsel %vm617_vm3, %v616_v13, %v5425_v57 }
 0x3b4   :  { %v5427_v32 = vadd.f32 %v4665_v3, %v581_v30  ;;  %v585_v14 = vpop.permute.xlu0 %584 }
 0x3b5   :  { %v5430_v33 = vadd.f32 %v4667_v9, %v585_v14 }
 0x3b6   :  { %v619_v10 = vrot.slane %v5427_v32, 6 }
 0x3b7   :  { %v625_v7 = vrot.slane %v5430_v33, 4  ;;  %v587_v38 = vpop.permute.xlu1 %586 }
 0x3b8   :  { %v621_v39 = vsel %vm620_vm4, %v619_v10, %v618_v35  ;;  %v5438_v40 = vadd.f32 %v4669_v52, %v587_v38 }
 0x3b9   :  { %v624_v41 = vsel %vm623_vm5, %v622_v34, %v621_v39 }
 0x3ba   :  { %v627_v42 = vsel %vm626_vm6, %v625_v7, %v624_v41  ;;  %v628_v43 = vrot.slane %v5438_v40, 3  ;;  %v589_v44 = vpop.permute.xlu0 %588 }
 0x3bb   :  { %v5443_v11 = vadd.f32 %v4671_v54, %v589_v44  ;;  %v591_v45 = vpop.permute.xlu1 %590 }
 0x3bc   :  { %v5445_v48 = vadd.f32 %v4673_v36, %v591_v45  ;;  %v630_v3 = vsel %vm629_vm7, %v628_v43, %v627_v42 }
 0x3bd   :  { %v631_v9 = vrot.slane %v5443_v11, 2 }
 0x3be   :  { %v634_v49 = vrot.slane %v5445_v48, 1 }
 0x3bf   :  { %v633_v50 = vsel %vm632_vm8, %v631_v9, %v630_v3 }
 0x3c0   :  { %v636_v52 = vsel %vm635_vm9, %v634_v49, %v633_v50 }
 0x3c1   :  { %637 = vrot.lane.b32.xlu0 %v636_v52, %s5114_s19 }
 0x433   :  { %v638_v28 = vpop.permute.xlu0 %637 }
 0x434   :  { %4230 = vmatmul.mubr.msk.f32.vlgmr.msra.gmra.mrb[2].mxu1 %vm294_vm10, %v638_v28 }
 0x435   :  { %4469 = vmatpush3.bf16.msra.mxu1 %v5195_v20  ;;  %4251 = vmatprep.mubr.msk.f32.mxu1 %vm5112_vm1, %v5113_v22 }
 0x436   :  { %4470 = vmatprep.subr.bf16.mxu1 %v5111_v19 }
 0x439   :  { %4472 = vmatpush3.bf16.msra.mxu1 %v5200_v23 }
 0x43a   :  { %4479 = vmatprep.subr.bf16.mxu1 %v5111_v19 }
 0x507   :  { %v707_v54 = vpop.f32.mrb[2].mxu1 }
 0x508   :  { %v708_v36 = vadd.f32 %v5258_v1, %v707_v54  ;;  %v4231_v29 = vpop.f32.mrb[3].mxu1 }
 0x50a   :  { %785 = vrot.lane.b32.xlu1 %v708_v36, %s5114_s19  ;;  %v713_v58 = vrot.slane %v708_v36, 1  ;;  %v712_v37 = vrot.slane %v708_v36, 7  ;;  %v714_v46 = vrot.slane %v708_v36, 2  ;;  %v715_v56 = vrot.slane %v708_v36, 3 }
 0x50b   :  { %v716_v62 = vrot.slane %v708_v36, 4  ;;  %v717_v63 = vrot.slane %v708_v36, 5  ;;  %v718_v1 = vrot.slane %v708_v36, 6  ;;  %v728_v2 = vadd.f32 %v708_v36, %v5318_v60 }
 0x50c   :  { %787 = vrot.lane.b32.xlu0 %v713_v58, %s5114_s19  ;;  %v729_v4 = vadd.f32 %v713_v58, %v5329_v12  ;;  %v727_v15 = vadd.f32 %v712_v37, %v5320_v61  ;;  %v730_v51 = vadd.f32 %v714_v46, %v5327_v0  ;;  %v731_v18 = vadd.f32 %v715_v56, %v5339_v21 }
 0x50d   :  { %v4005_v6 = vmul.f32 -1.442695, %v728_v2  ;;  %v732_v24 = vadd.f32 %v716_v62, %v5337_v16  ;;  %v733_v47 = vadd.f32 %v717_v63, %v5349_v31  ;;  %v734_v8 = vadd.f32 %v718_v1, %v5347_v27 }
 0x50e   :  { %783 = vrot.lane.b32.xlu1 %v712_v37, %s5114_s19  ;;  %v4006_v17 = vmul.f32 -1.442695, %v729_v4  ;;  %v4004_v55 = vmul.f32 -1.442695, %v727_v15  ;;  %v4007_v53 = vmul.f32 -1.442695, %v730_v51 }
 0x50f   :  { %4674 = vpow2.f32 %v4005_v6  ;;  %v4008_v25 = vmul.f32 -1.442695, %v731_v18  ;;  %v4009_v59 = vmul.f32 -1.442695, %v732_v24  ;;  %v4010_v30 = vmul.f32 -1.442695, %v733_v47 }
 0x510   :  { %789 = vrot.lane.b32.xlu0 %v714_v46, %s5114_s19  ;;  %4676 = vpow2.f32 %v4006_v17  ;;  %v4011_v13 = vmul.f32 -1.442695, %v734_v8 }
 0x511   :  { %4678 = vpow2.f32 %v4004_v55 }
 0x512   :  { %791 = vrot.lane.b32.xlu1 %v715_v56, %s5114_s19  ;;  %4680 = vpow2.f32 %v4007_v53 }
 0x513   :  { %4682 = vpow2.f32 %v4008_v25 }
 0x514   :  { %793 = vrot.lane.b32.xlu0 %v716_v62, %s5114_s19  ;;  %4684 = vpow2.f32 %v4009_v59 }
 0x515   :  { %4686 = vpow2.f32 %v4010_v30 }
 0x516   :  { %795 = vrot.lane.b32.xlu1 %v717_v63, %s5114_s19  ;;  %4688 = vpow2.f32 %v4011_v13 }
 0x518   :  { %797 = vrot.lane.b32.xlu0 %v718_v1, %s5114_s19 }
 0x519   :  { %v4675_v14 = vpop.eup %4674 }
 0x51a   :  { %v4677_v10 = vpop.eup %4676  ;;  %v760_v34 = vadd.f32 1.0, %v4675_v14 }
 0x51b   :  { %v4679_v35 = vpop.eup %4678  ;;  %v761_v7 = vadd.f32 1.0, %v4677_v10 }
 0x51c   :  { %v4681_v38 = vpop.eup %4680  ;;  %v759_v39 = vadd.f32 1.0, %v4679_v35  ;;  %4690 = vrcp.f32 %v760_v34 }
 0x51d   :  { %v4683_v41 = vpop.eup %4682  ;;  %4692 = vrcp.f32 %v761_v7  ;;  %v762_v42 = vadd.f32 1.0, %v4681_v38 }
 0x51e   :  { %v4685_v43 = vpop.eup %4684  ;;  %4694 = vrcp.f32 %v759_v39  ;;  %v763_v44 = vadd.f32 1.0, %v4683_v41 }
 0x51f   :  { %v4687_v45 = vpop.eup %4686  ;;  %4696 = vrcp.f32 %v762_v42  ;;  %v764_v3 = vadd.f32 1.0, %v4685_v43 }
 0x520   :  { %v4689_v9 = vpop.eup %4688  ;;  %4698 = vrcp.f32 %v763_v44  ;;  %v765_v49 = vadd.f32 1.0, %v4687_v45 }
 0x521   :  { %4700 = vrcp.f32 %v764_v3  ;;  %v766_v52 = vadd.f32 1.0, %v4689_v9 }
 0x522   :  { %4702 = vrcp.f32 %v765_v49 }
 0x523   :  { %4704 = vrcp.f32 %v766_v52 }
 0x526   :  { %v5477_v50 = vpop.eup %4690 }
 0x527   :  { %v5480_v36 = vpop.eup %4692 }
 0x528   :  { %v5484_v37 = vpop.eup %4694 }
 0x529   :  { %v5488_v62 = vpop.eup %4696 }
 0x52a   :  { %v5492_v2 = vpop.eup %4698 }
 0x52b   :  { %v5496_v6 = vpop.eup %4700 }
 0x52c   :  { %v5500_v55 = vpop.eup %4702 }
 0x52d   :  { %v5504_v24 = vpop.eup %4704 }
 0x57c   :  { %v786_v28 = vpop.permute.xlu1 %785 }
 0x57d   :  { %v808_v54 = vmul.f32 %v5477_v50, %v786_v28 }
 0x57e   :  { %v788_v29 = vpop.permute.xlu0 %787 }
 0x57f   :  { %v809_v58 = vmul.f32 %v5480_v36, %v788_v29  ;;  %825 = vrot.lane.b32.xlu1 %v808_v54, %s5114_s19 }
 0x580   :  { %v784_v46 = vpop.permute.xlu1 %783 }
 0x581   :  { %v807_v56 = vmul.f32 %v5484_v37, %v784_v46  ;;  %827 = vrot.lane.b32.xlu0 %v809_v58, %s5114_s19 }
 0x582   :  { %v790_v63 = vpop.permute.xlu0 %789 }
 0x583   :  { %v810_v1 = vmul.f32 %v5488_v62, %v790_v63  ;;  %823 = vrot.lane.b32.xlu1 %v807_v56, %s5114_s19 }
 0x584   :  { %v792_v4 = vpop.permute.xlu1 %791 }
 0x585   :  { %v811_v15 = vmul.f32 %v5492_v2, %v792_v4  ;;  %829 = vrot.lane.b32.xlu0 %v810_v1, %s5114_s19 }
 0x586   :  { %v794_v17 = vpop.permute.xlu0 %793 }
 0x587   :  { %v812_v51 = vmul.f32 %v5496_v6, %v794_v17  ;;  %831 = vrot.lane.b32.xlu1 %v811_v15, %s5114_s19 }
 0x588   :  { %v796_v18 = vpop.permute.xlu1 %795 }
 0x589   :  { %v813_v53 = vmul.f32 %v5500_v55, %v796_v18  ;;  %833 = vrot.lane.b32.xlu0 %v812_v51, %s5114_s19 }
 0x58a   :  { %v798_v25 = vpop.permute.xlu0 %797 }
 0x58b   :  { %v814_v47 = vmul.f32 %v5504_v24, %v798_v25  ;;  %835 = vrot.lane.b32.xlu1 %v813_v53, %s5114_s19 }
 0x58d   :  { %837 = vrot.lane.b32.xlu0 %v814_v47, %s5114_s19 }
 0x5f1   :  { %v826_v59 = vpop.permute.xlu1 %825 }
 0x5f2   :  { %v848_v8 = vadd.f32 %v826_v59, %v5318_v60 }
 0x5f3   :  { %v828_v30 = vpop.permute.xlu0 %827 }
 0x5f4   :  { %4706 = vtanh.f32 %v848_v8  ;;  %v849_v14 = vadd.f32 %v828_v30, %v5329_v12 }
 0x5f5   :  { %v824_v13 = vpop.permute.xlu1 %823 }
 0x5f6   :  { %4708 = vtanh.f32 %v849_v14  ;;  %v847_v10 = vadd.f32 %v824_v13, %v5320_v61 }
 0x5f7   :  { %v830_v34 = vpop.permute.xlu0 %829 }
 0x5f8   :  { %4710 = vtanh.f32 %v847_v10  ;;  %v850_v35 = vadd.f32 %v830_v34, %v5327_v0 }
 0x5f9   :  { %v832_v7 = vpop.permute.xlu1 %831 }
 0x5fa   :  { %4712 = vtanh.f32 %v850_v35  ;;  %v851_v38 = vadd.f32 %v832_v7, %v5339_v21 }
 0x5fb   :  { %v834_v39 = vpop.permute.xlu0 %833 }
 0x5fc   :  { %4714 = vtanh.f32 %v851_v38  ;;  %v852_v41 = vadd.f32 %v834_v39, %v5337_v16 }
 0x5fd   :  { %v836_v42 = vpop.permute.xlu1 %835 }
 0x5fe   :  { %v5515_v43 = vpop.eup %4706  ;;  %4716 = vtanh.f32 %v852_v41  ;;  %v853_v44 = vadd.f32 %v836_v42, %v5349_v31 }
 0x5ff   :  { %v838_v45 = vpop.permute.xlu0 %837  ;;  %v872_v3 = vrot.slane %v5515_v43, 1 }
 0x600   :  { %v5519_v9 = vpop.eup %4708  ;;  %4718 = vtanh.f32 %v853_v44  ;;  %v854_v49 = vadd.f32 %v838_v45, %v5347_v27 }
 0x601   :  { %v888_v52 = vsub.f32 %v5421_v26, %v872_v3  ;;  %v873_v28 = vrot.slane %v5519_v9, 1 }
 0x602   :  { %v5524_v54 = vpop.eup %4710  ;;  %4720 = vtanh.f32 %v854_v49 }
 0x603   :  { %v904_v29 = vrot.slane %v888_v52, 7  ;;  %v889_v58 = vsub.f32 %v5427_v32, %v873_v28  ;;  %v871_v46 = vrot.slane %v5524_v54, 1 }
 0x604   :  { %v5528_v56 = vpop.eup %4712 }
 0x605   :  { %913 = vrot.lane.b32.xlu1 %v904_v29, %s5115_s22  ;;  %v905_v63 = vrot.slane %v889_v58, 7  ;;  %v887_v1 = vsub.f32 %v5425_v57, %v871_v46  ;;  %v874_v4 = vrot.slane %v5528_v56, 1 }
 0x606   :  { %v5533_v26 = vpop.eup %4714 }
 0x607   :  { %915 = vrot.lane.b32.xlu0 %v905_v63, %s5115_s22  ;;  %v903_v15 = vrot.slane %v887_v1, 7  ;;  %v890_v17 = vsub.f32 %v5423_v5, %v874_v4  ;;  %v875_v32 = vrot.slane %v5533_v26, 1 }
 0x608   :  { %v5538_v51 = vpop.eup %4716 }
 0x609   :  { %911 = vrot.lane.b32.xlu1 %v903_v15, %s5115_s22  ;;  %v906_v18 = vrot.slane %v890_v17, 7  ;;  %v891_v53 = vsub.f32 %v5430_v33, %v875_v32  ;;  %v876_v57 = vrot.slane %v5538_v51, 1 }
 0x60a   :  { %v4719_v25 = vpop.eup %4718 }
 0x60b   :  { %917 = vrot.lane.b32.xlu0 %v906_v18, %s5115_s22  ;;  %v907_v47 = vrot.slane %v891_v53, 7  ;;  %v892_v59 = vsub.f32 %v5438_v40, %v876_v57  ;;  %v877_v8 = vrot.slane %v4719_v25, 1 }
 0x60c   :  { %v4721_v30 = vpop.eup %4720 }
 0x60d   :  { %919 = vrot.lane.b32.xlu1 %v907_v47, %s5115_s22  ;;  %v908_v5 = vrot.slane %v892_v59, 7  ;;  %v893_v14 = vsub.f32 %v5443_v11, %v877_v8  ;;  %v878_v13 = vrot.slane %v4721_v30, 1 }
 0x60f   :  { %921 = vrot.lane.b32.xlu0 %v908_v5, %s5115_s22  ;;  %v909_v10 = vrot.slane %v893_v14, 7  ;;  %v894_v33 = vsub.f32 %v5445_v48, %v878_v13 }
 0x611   :  { %923 = vrot.lane.b32.xlu1 %v909_v10, %s5115_s22  ;;  %v910_v34 = vrot.slane %v894_v33, 7 }
 0x613   :  { %925 = vrot.lane.b32.xlu0 %v910_v34, %s5115_s22 }
 0x677   :  { %v914_v35 = vpop.permute.xlu1 %913 }
 0x678   :  { %v936_v40 = vmul.f32 %v5477_v50, %v914_v35 }
 0x679   :  { %v916_v7 = vpop.permute.xlu0 %915 }
 0x67a   :  { %v937_v38 = vmul.f32 %v5480_v36, %v916_v7  ;;  %953 = vrot.lane.b32.xlu1 %v936_v40, %s5116_s23 }
 0x67b   :  { %v912_v11 = vpop.permute.xlu1 %911 }
 0x67c   :  { %v935_v39 = vmul.f32 %v5484_v37, %v912_v11  ;;  %955 = vrot.lane.b32.xlu0 %v937_v38, %s5116_s23 }
 0x67d   :  { %v918_v41 = vpop.permute.xlu0 %917 }
 0x67e   :  { %v938_v48 = vmul.f32 %v5488_v62, %v918_v41  ;;  %951 = vrot.lane.b32.xlu1 %v935_v39, %s5116_s23 }
 0x67f   :  { %v920_v42 = vpop.permute.xlu1 %919 }
 0x680   :  { %v939_v44 = vmul.f32 %v5492_v2, %v920_v42  ;;  %957 = vrot.lane.b32.xlu0 %v938_v48, %s5116_s23 }
 0x681   :  { %v922_v50 = vpop.permute.xlu0 %921 }
 0x682   :  { %v940_v36 = vmul.f32 %v5496_v6, %v922_v50  ;;  %959 = vrot.lane.b32.xlu1 %v939_v44, %s5116_s23 }
 0x683   :  { %v924_v45 = vpop.permute.xlu1 %923 }
 0x684   :  { %v941_v37 = vmul.f32 %v5500_v55, %v924_v45  ;;  %961 = vrot.lane.b32.xlu0 %v940_v36, %s5116_s23 }
 0x685   :  { %v926_v3 = vpop.permute.xlu0 %925 }
 0x686   :  { %v942_v62 = vmul.f32 %v5504_v24, %v926_v3  ;;  %963 = vrot.lane.b32.xlu1 %v941_v37, %s5116_s23 }
 0x688   :  { %965 = vrot.lane.b32.xlu0 %v942_v62, %s5116_s23 }
 0x6ec   :  { %v954_v2 = vpop.permute.xlu1 %953 }
 0x6ed   :  { %v5574_v55 = vadd.f32 %v5515_v43, %v954_v2 }
 0x6ee   :  { %v956_v49 = vpop.permute.xlu0 %955 }
 0x6ef   :  { %v5568_v52 = vadd.f32 %v5519_v9, %v956_v49 }
 0x6f0   :  { %v952_v6 = vpop.permute.xlu1 %951 }
 0x6f1   :  { %v5571_v28 = vadd.f32 %v5524_v54, %v952_v6  ;;  %v993_v46 = vrot.slane %v5568_v52, 7 }
 0x6f2   :  { %v958_v29 = vpop.permute.xlu0 %957 }
 0x6f3   :  { %v991_v58 = vrot.slane %v5571_v28, 1  ;;  %v5578_v24 = vadd.f32 %v5528_v56, %v958_v29 }
 0x6f4   :  { %v960_v63 = vpop.permute.xlu1 %959 }
 0x6f5   :  { %v992_v9 = vsel %vm617_vm3, %v5574_v55, %v991_v58  ;;  %v995_v1 = vrot.slane %v5578_v24, 6  ;;  %v5585_v54 = vadd.f32 %v5533_v26, %v960_v63 }
 0x6f6   :  { %v994_v4 = vsel %vm620_vm4, %v993_v46, %v992_v9  ;;  %v962_v43 = vpop.permute.xlu0 %961 }
 0x6f7   :  { %v996_v15 = vsel %vm623_vm5, %v995_v1, %v994_v4  ;;  %v997_v17 = vrot.slane %v5585_v54, 5  ;;  %v5591_v56 = vadd.f32 %v5538_v51, %v962_v43 }
 0x6f8   :  { %v964_v32 = vpop.permute.xlu1 %963 }
 0x6f9   :  { %v998_v18 = vsel %vm626_vm6, %v997_v17, %v996_v15  ;;  %v999_v53 = vrot.slane %v5591_v56, 4  ;;  %v5595_v57 = vadd.f32 %v4719_v25, %v964_v32 }
 0x6fa   :  { %v966_v47 = vpop.permute.xlu0 %965 }
 0x6fb   :  { %v1001_v26 = vrot.slane %v5595_v57, 3  ;;  %v5598_v59 = vadd.f32 %v4721_v30, %v966_v47  ;;  %v1000_v8 = vsel %vm629_vm7, %v999_v53, %v998_v18  ;;  %v5615_v30 = vld [vmem:[%s6662_s1 + $0x3] ss:$0 sm:$0xff] }
 0x6fd   :  { %v1003_v5 = vrot.slane %v5598_v59, 2  ;;  %v1002_v14 = vsel %vm632_vm8, %v1001_v26, %v1000_v8 }
 0x6ff   :  { %v1004_v51 = vsel %vm635_vm9, %v1003_v5, %v1002_v14 }
 0x700   :  { %1005 = vrot.lane.b32.xlu1 %v1004_v51, %s5114_s19 }
 0x772   :  { %v1006_v13 = vpop.permute.xlu1 %1005 }
 0x773   :  { %4241 = vmatmul.mubr.msk.f32.vlgmr.msra.gmra.mrb[8].mxu0 %vm294_vm10, %v1006_v13 }
 0x774   :  { %4475 = vmatpush3.bf16.msra.mxu0 %v5195_v20  ;;  %4262 = vmatprep.mubr.msk.f32.mxu0 %vm5112_vm1, %v5113_v22 }
 0x775   :  { %4476 = vmatprep.subr.bf16.mxu0 %v5111_v19 }
 0x778   :  { %4478 = vmatpush3.bf16.msra.mxu0 %v5200_v23 }
 0x779   :  { %4485 = vmatprep.subr.bf16.mxu0 %v5111_v19 }
 0x846   :  { %v1075_v25 = vpop.f32.mrb[8].mxu0 }
 0x847   :  { %v1076_v10 = vadd.f32 %v5615_v30, %v1075_v25  ;;  %v4242_v33 = vpop.f32.mrb[9].mxu0 }
 0x849   :  { %1155 = vrot.lane.b32.xlu1 %v1076_v10, %s5114_s19  ;;  %v1080_v34 = vrot.slane %v1076_v10, 6  ;;  %v1081_v35 = vrot.slane %v1076_v10, 7  ;;  %v1082_v40 = vrot.slane %v1076_v10, 1  ;;  %v1084_v7 = vrot.slane %v1076_v10, 3 }
 0x84a   :  { %v1083_v38 = vrot.slane %v1076_v10, 2  ;;  %v1086_v11 = vrot.slane %v1076_v10, 5  ;;  %v1085_v39 = vrot.slane %v1076_v10, 4  ;;  %v1097_v41 = vadd.f32 %v1076_v10, %v5329_v12 }
 0x84b   :  { %1151 = vrot.lane.b32.xlu0 %v1080_v34, %s5114_s19  ;;  %v1095_v48 = vadd.f32 %v1080_v34, %v5320_v61  ;;  %v1096_v42 = vadd.f32 %v1081_v35, %v5318_v60  ;;  %v1098_v36 = vadd.f32 %v1082_v40, %v5327_v0  ;;  %v1100_v37 = vadd.f32 %v1084_v7, %v5337_v16 }
 0x84c   :  { %v4015_v44 = vmul.f32 -1.442695, %v1097_v41  ;;  %v1099_v62 = vadd.f32 %v1083_v38, %v5339_v21  ;;  %v1102_v49 = vadd.f32 %v1086_v11, %v5347_v27  ;;  %v1101_v29 = vadd.f32 %v1085_v39, %v5349_v31 }
 0x84d   :  { %1153 = vrot.lane.b32.xlu1 %v1081_v35, %s5114_s19  ;;  %v4013_v50 = vmul.f32 -1.442695, %v1095_v48  ;;  %v4014_v45 = vmul.f32 -1.442695, %v1096_v42  ;;  %v4016_v3 = vmul.f32 -1.442695, %v1098_v36 }
 0x84e   :  { %4722 = vpow2.f32 %v4015_v44  ;;  %v4018_v2 = vmul.f32 -1.442695, %v1100_v37  ;;  %v4017_v6 = vmul.f32 -1.442695, %v1099_v62  ;;  %v4020_v58 = vmul.f32 -1.442695, %v1102_v49 }
 0x84f   :  { %1157 = vrot.lane.b32.xlu0 %v1082_v40, %s5114_s19  ;;  %4724 = vpow2.f32 %v4013_v50  ;;  %v4019_v63 = vmul.f32 -1.442695, %v1101_v29 }
 0x850   :  { %4726 = vpow2.f32 %v4014_v45 }
 0x851   :  { %1161 = vrot.lane.b32.xlu1 %v1084_v7, %s5114_s19  ;;  %4728 = vpow2.f32 %v4016_v3 }
 0x852   :  { %4730 = vpow2.f32 %v4018_v2 }
 0x853   :  { %1159 = vrot.lane.b32.xlu0 %v1083_v38, %s5114_s19  ;;  %4732 = vpow2.f32 %v4017_v6 }
 0x854   :  { %4734 = vpow2.f32 %v4020_v58 }
 0x855   :  { %1165 = vrot.lane.b32.xlu1 %v1086_v11, %s5114_s19  ;;  %4736 = vpow2.f32 %v4019_v63 }
 0x857   :  { %1163 = vrot.lane.b32.xlu0 %v1085_v39, %s5114_s19 }
 0x858   :  { %v4723_v46 = vpop.eup %4722 }
 0x859   :  { %v4725_v9 = vpop.eup %4724  ;;  %v1129_v1 = vadd.f32 1.0, %v4723_v46 }
 0x85a   :  { %v4727_v4 = vpop.eup %4726  ;;  %v1127_v43 = vadd.f32 1.0, %v4725_v9 }
 0x85b   :  { %v4729_v15 = vpop.eup %4728  ;;  %v1128_v17 = vadd.f32 1.0, %v4727_v4  ;;  %4738 = vrcp.f32 %v1129_v1 }
 0x85c   :  { %v4731_v32 = vpop.eup %4730  ;;  %4740 = vrcp.f32 %v1127_v43  ;;  %v1130_v18 = vadd.f32 1.0, %v4729_v15 }
 0x85d   :  { %v4733_v53 = vpop.eup %4732  ;;  %4742 = vrcp.f32 %v1128_v17  ;;  %v1132_v47 = vadd.f32 1.0, %v4731_v32 }
 0x85e   :  { %v4735_v26 = vpop.eup %4734  ;;  %4744 = vrcp.f32 %v1130_v18  ;;  %v1131_v8 = vadd.f32 1.0, %v4733_v53 }
 0x85f   :  { %v4737_v5 = vpop.eup %4736  ;;  %4746 = vrcp.f32 %v1132_v47  ;;  %v1134_v14 = vadd.f32 1.0, %v4735_v26 }
 0x860   :  { %4748 = vrcp.f32 %v1131_v8  ;;  %v1133_v13 = vadd.f32 1.0, %v4737_v5 }
 0x861   :  { %4750 = vrcp.f32 %v1134_v14 }
 0x862   :  { %4752 = vrcp.f32 %v1133_v13 }
 0x865   :  { %v5634_v51 = vpop.eup %4738 }
 0x866   :  { %v5637_v33 = vpop.eup %4740 }
 0x867   :  { %v5641_v40 = vpop.eup %4742 }
 0x868   :  { %v5645_v11 = vpop.eup %4744 }
 0x869   :  { %v5649_v48 = vpop.eup %4746 }
 0x86a   :  { %v5653_v50 = vpop.eup %4748 }
 0x86b   :  { %v5657_v37 = vpop.eup %4750 }
 0x86c   :  { %v5661_v2 = vpop.eup %4752 }
 0x8bb   :  { %v1156_v25 = vpop.permute.xlu1 %1155 }
 0x8bc   :  { %v1177_v10 = vmul.f32 %v5634_v51, %v1156_v25 }
 0x8bd   :  { %v1152_v34 = vpop.permute.xlu0 %1151 }
 0x8be   :  { %v1175_v35 = vmul.f32 %v5637_v33, %v1152_v34  ;;  %1195 = vrot.lane.b32.xlu1 %v1177_v10, %s5114_s19 }
 0x8bf   :  { %v1154_v7 = vpop.permute.xlu1 %1153 }
 0x8c0   :  { %v1176_v38 = vmul.f32 %v5641_v40, %v1154_v7  ;;  %1191 = vrot.lane.b32.xlu0 %v1175_v35, %s5114_s19 }
 0x8c1   :  { %v1158_v39 = vpop.permute.xlu0 %1157 }
 0x8c2   :  { %v1178_v41 = vmul.f32 %v5645_v11, %v1158_v39  ;;  %1193 = vrot.lane.b32.xlu1 %v1176_v38, %s5114_s19 }
 0x8c3   :  { %v1162_v42 = vpop.permute.xlu1 %1161 }
 0x8c4   :  { %v1180_v44 = vmul.f32 %v5649_v48, %v1162_v42  ;;  %1197 = vrot.lane.b32.xlu0 %v1178_v41, %s5114_s19 }
 0x8c5   :  { %v1160_v36 = vpop.permute.xlu0 %1159 }
 0x8c6   :  { %v1179_v45 = vmul.f32 %v5653_v50, %v1160_v36  ;;  %1201 = vrot.lane.b32.xlu1 %v1180_v44, %s5114_s19 }
 0x8c7   :  { %v1166_v3 = vpop.permute.xlu1 %1165 }
 0x8c8   :  { %v1182_v62 = vmul.f32 %v5657_v37, %v1166_v3  ;;  %1199 = vrot.lane.b32.xlu0 %v1179_v45, %s5114_s19 }
 0x8c9   :  { %v1164_v49 = vpop.permute.xlu0 %1163 }
 0x8ca   :  { %v1181_v6 = vmul.f32 %v5661_v2, %v1164_v49  ;;  %1205 = vrot.lane.b32.xlu1 %v1182_v62, %s5114_s19 }
 0x8cc   :  { %1203 = vrot.lane.b32.xlu0 %v1181_v6, %s5114_s19 }
 0x930   :  { %v1196_v29 = vpop.permute.xlu1 %1195 }
 0x931   :  { %v1217_v58 = vadd.f32 %v1196_v29, %v5329_v12 }
 0x932   :  { %v1192_v46 = vpop.permute.xlu0 %1191 }
 0x933   :  { %4754 = vtanh.f32 %v1217_v58  ;;  %v1215_v63 = vadd.f32 %v1192_v46, %v5320_v61 }
 0x934   :  { %v1194_v9 = vpop.permute.xlu1 %1193 }
 0x935   :  { %4756 = vtanh.f32 %v1215_v63  ;;  %v1216_v1 = vadd.f32 %v1194_v9, %v5318_v60 }
 0x936   :  { %v1198_v4 = vpop.permute.xlu0 %1197 }
 0x937   :  { %4758 = vtanh.f32 %v1216_v1  ;;  %v1218_v43 = vadd.f32 %v1198_v4, %v5327_v0 }
 0x938   :  { %v1202_v15 = vpop.permute.xlu1 %1201 }
 0x939   :  { %4760 = vtanh.f32 %v1218_v43  ;;  %v1220_v17 = vadd.f32 %v1202_v15, %v5337_v16 }
 0x93a   :  { %v1200_v32 = vpop.permute.xlu0 %1199 }
 0x93b   :  { %4762 = vtanh.f32 %v1220_v17  ;;  %v1219_v18 = vadd.f32 %v1200_v32, %v5339_v21 }
 0x93c   :  { %v1206_v53 = vpop.permute.xlu1 %1205 }
 0x93d   :  { %v5672_v47 = vpop.eup %4754  ;;  %4764 = vtanh.f32 %v1219_v18  ;;  %v1222_v26 = vadd.f32 %v1206_v53, %v5347_v27 }
 0x93e   :  { %v1204_v8 = vpop.permute.xlu0 %1203  ;;  %v1241_v5 = vrot.slane %v5672_v47, 1 }
 0x93f   :  { %v5676_v14 = vpop.eup %4756  ;;  %4766 = vtanh.f32 %v1222_v26  ;;  %v1221_v13 = vadd.f32 %v1204_v8, %v5349_v31 }
 0x940   :  { %v1257_v25 = vsub.f32 %v5568_v52, %v1241_v5  ;;  %v1239_v10 = vrot.slane %v5676_v14, 1 }
 0x941   :  { %v5681_v34 = vpop.eup %4758  ;;  %4768 = vtanh.f32 %v1221_v13 }
 0x942   :  { %v1273_v35 = vrot.slane %v1257_v25, 7  ;;  %v1255_v7 = vsub.f32 %v5571_v28, %v1239_v10  ;;  %v1240_v38 = vrot.slane %v5681_v34, 1 }
 0x943   :  { %v5685_v39 = vpop.eup %4760 }
 0x944   :  { %1283 = vrot.lane.b32.xlu1 %v1273_v35, %s5115_s22  ;;  %v1271_v41 = vrot.slane %v1255_v7, 7  ;;  %v1256_v42 = vsub.f32 %v5574_v55, %v1240_v38  ;;  %v1242_v44 = vrot.slane %v5685_v39, 1 }
 0x945   :  { %v5690_v52 = vpop.eup %4762 }
 0x946   :  { %1279 = vrot.lane.b32.xlu0 %v1271_v41, %s5115_s22  ;;  %v1272_v36 = vrot.slane %v1256_v42, 7  ;;  %v1258_v45 = vsub.f32 %v5578_v24, %v1242_v44  ;;  %v1244_v28 = vrot.slane %v5690_v52, 1 }
 0x947   :  { %v4765_v3 = vpop.eup %4764 }
 0x948   :  { %1281 = vrot.lane.b32.xlu1 %v1272_v36, %s5115_s22  ;;  %v1274_v62 = vrot.slane %v1258_v45, 7  ;;  %v1260_v49 = vsub.f32 %v5591_v56, %v1244_v28  ;;  %v1243_v6 = vrot.slane %v4765_v3, 1 }
 0x949   :  { %v4767_v29 = vpop.eup %4766 }
 0x94a   :  { %1285 = vrot.lane.b32.xlu0 %v1274_v62, %s5115_s22  ;;  %v1276_v55 = vrot.slane %v1260_v49, 7  ;;  %v1259_v58 = vsub.f32 %v5585_v54, %v1243_v6  ;;  %v1246_v46 = vrot.slane %v4767_v29, 1 }
 0x94b   :  { %v4769_v63 = vpop.eup %4768 }
 0x94c   :  { %1289 = vrot.lane.b32.xlu1 %v1276_v55, %s5115_s22  ;;  %v1275_v24 = vrot.slane %v1259_v58, 7  ;;  %v1262_v9 = vsub.f32 %v5598_v59, %v1246_v46  ;;  %v1245_v1 = vrot.slane %v4769_v63, 1 }
 0x94e   :  { %1287 = vrot.lane.b32.xlu0 %v1275_v24, %s5115_s22  ;;  %v1278_v4 = vrot.slane %v1262_v9, 7  ;;  %v1261_v56 = vsub.f32 %v5595_v57, %v1245_v1 }
 0x950   :  { %1293 = vrot.lane.b32.xlu1 %v1278_v4, %s5115_s22  ;;  %v1277_v43 = vrot.slane %v1261_v56, 7 }
 0x952   :  { %1291 = vrot.lane.b32.xlu0 %v1277_v43, %s5115_s22 }
 0x9b6   :  { %v1284_v15 = vpop.permute.xlu1 %1283 }
 0x9b7   :  { %v1305_v54 = vmul.f32 %v5634_v51, %v1284_v15 }
 0x9b8   :  { %v1280_v17 = vpop.permute.xlu0 %1279 }
 0x9b9   :  { %v1303_v32 = vmul.f32 %v5637_v33, %v1280_v17  ;;  %1323 = vrot.lane.b32.xlu1 %v1305_v54, %s5116_s23 }
 0x9ba   :  { %v1282_v59 = vpop.permute.xlu1 %1281 }
 0x9bb   :  { %v1304_v18 = vmul.f32 %v5641_v40, %v1282_v59  ;;  %1319 = vrot.lane.b32.xlu0 %v1303_v32, %s5116_s23 }
 0x9bc   :  { %v1286_v53 = vpop.permute.xlu0 %1285 }
 0x9bd   :  { %v1306_v57 = vmul.f32 %v5645_v11, %v1286_v53  ;;  %1321 = vrot.lane.b32.xlu1 %v1304_v18, %s5116_s23 }
 0x9be   :  { %v1290_v26 = vpop.permute.xlu1 %1289 }
 0x9bf   :  { %v1308_v8 = vmul.f32 %v5649_v48, %v1290_v26  ;;  %1325 = vrot.lane.b32.xlu0 %v1306_v57, %s5116_s23 }
 0x9c0   :  { %v1288_v51 = vpop.permute.xlu0 %1287 }
 0x9c1   :  { %v1307_v33 = vmul.f32 %v5653_v50, %v1288_v51  ;;  %1329 = vrot.lane.b32.xlu1 %v1308_v8, %s5116_s23 }
 0x9c2   :  { %v1294_v5 = vpop.permute.xlu1 %1293 }
 0x9c3   :  { %v1310_v40 = vmul.f32 %v5657_v37, %v1294_v5  ;;  %1327 = vrot.lane.b32.xlu0 %v1307_v33, %s5116_s23 }
 0x9c4   :  { %v1292_v13 = vpop.permute.xlu0 %1291 }
 0x9c5   :  { %v1309_v11 = vmul.f32 %v5661_v2, %v1292_v13  ;;  %1333 = vrot.lane.b32.xlu1 %v1310_v40, %s5116_s23 }
 0x9c7   :  { %1331 = vrot.lane.b32.xlu0 %v1309_v11, %s5116_s23 }
 0xa2b   :  { %v1324_v48 = vpop.permute.xlu1 %1323 }
 0xa2c   :  { %v5733_v42 = vadd.f32 %v5672_v47, %v1324_v48 }
 0xa2d   :  { %v1320_v25 = vpop.permute.xlu0 %1319 }
 0xa2e   :  { %v5722_v10 = vadd.f32 %v5676_v14, %v1320_v25 }
 0xa2f   :  { %v1322_v50 = vpop.permute.xlu1 %1321 }
 0xa30   :  { %v5725_v35 = vadd.f32 %v5681_v34, %v1322_v50  ;;  %v1359_v37 = vrot.slane %v5722_v10, 2 }
 0xa31   :  { %v1326_v7 = vpop.permute.xlu0 %1325 }
 0xa32   :  { %v1360_v38 = vrot.slane %v5725_v35, 1  ;;  %v5730_v2 = vadd.f32 %v5685_v39, %v1326_v7 }
 0xa33   :  { %v1330_v41 = vpop.permute.xlu1 %1329 }
 0xa34   :  { %v1361_v44 = vsel %vm617_vm3, %v1360_v38, %v1359_v37  ;;  %v1363_v14 = vrot.slane %v5730_v2, 7  ;;  %v5742_v28 = vadd.f32 %v5690_v52, %v1330_v41 }
 0xa35   :  { %v1328_v36 = vpop.permute.xlu0 %1327  ;;  %v1362_v34 = vsel %vm620_vm4, %v5733_v42, %v1361_v44 }
 0xa36   :  { %v5739_v45 = vadd.f32 %v4765_v3, %v1328_v36  ;;  %v1364_v49 = vsel %vm623_vm5, %v1363_v14, %v1362_v34  ;;  %v1367_v46 = vrot.slane %v5742_v28, 5 }
 0xa37   :  { %v1334_v62 = vpop.permute.xlu1 %1333 }
 0xa38   :  { %v1365_v39 = vrot.slane %v5739_v45, 6  ;;  %v5746_v47 = vadd.f32 %v4767_v29, %v1334_v62 }
 0xa39   :  { %v1332_v6 = vpop.permute.xlu0 %1331 }
 0xa3a   :  { %v1366_v55 = vsel %vm626_vm6, %v1365_v39, %v1364_v49  ;;  %v5749_v58 = vadd.f32 %v4769_v63, %v1332_v6  ;;  %v1371_v24 = vrot.slane %v5746_v47, 3 }
 0xa3b   :  { %v1368_v52 = vsel %vm629_vm7, %v1367_v46, %v1366_v55 }
 0xa3c   :  { %v1369_v3 = vrot.slane %v5749_v58, 4 }
 0xa3e   :  { %v1370_v9 = vsel %vm632_vm8, %v1369_v3, %v1368_v52 }
 0xa3f   :  { %v1372_v1 = vsel %vm635_vm9, %v1371_v24, %v1370_v9 }
 0xa40   :  { %1373 = vrot.lane.b32.xlu0 %v1372_v1, %s5114_s19 }
 0xab2   :  { %v1374_v29 = vpop.permute.xlu0 %1373 }
 0xab3   :  { %4252 = vmatmul.mubr.msk.f32.vlgmr.msra.gmra.mrb[4].mxu1 %vm294_vm10, %v1374_v29 }
 0xab4   :  { %4481 = vmatpush3.bf16.msra.mxu1 %v5195_v20  ;;  %4273 = vmatprep.mubr.msk.f32.mxu1 %vm5112_vm1, %v5113_v22 }
 0xab5   :  { %4482 = vmatprep.subr.bf16.mxu1 %v5111_v19 }
 0xab8   :  { %4484 = vmatpush3.bf16.msra.mxu1 %v5200_v23 }
 0xab9   :  { %4491 = vmatprep.subr.bf16.mxu1 %v5111_v19 }
 0xb86   :  { %v1443_v63 = vpop.f32.mrb[4].mxu1 }
 0xb87   :  { %v1444_v4 = vadd.f32 %v5615_v30, %v1443_v63  ;;  %v4253_v56 = vpop.f32.mrb[5].mxu1 }
 0xb89   :  { %1525 = vrot.lane.b32.xlu1 %v1444_v4, %s5114_s19  ;;  %v1449_v43 = vrot.slane %v1444_v4, 6  ;;  %v1448_v15 = vrot.slane %v1444_v4, 5  ;;  %v1451_v54 = vrot.slane %v1444_v4, 1  ;;  %v1450_v17 = vrot.slane %v1444_v4, 7 }
 0xb8a   :  { %v1452_v32 = vrot.slane %v1444_v4, 2  ;;  %v1453_v59 = vrot.slane %v1444_v4, 3  ;;  %v1454_v18 = vrot.slane %v1444_v4, 4  ;;  %v1466_v53 = vadd.f32 %v1444_v4, %v5327_v0 }
 0xb8b   :  { %1521 = vrot.lane.b32.xlu0 %v1449_v43, %s5114_s19  ;;  %v1464_v57 = vadd.f32 %v1449_v43, %v5318_v60  ;;  %v1463_v26 = vadd.f32 %v1448_v15, %v5320_v61  ;;  %v1467_v33 = vadd.f32 %v1451_v54, %v5339_v21  ;;  %v1465_v40 = vadd.f32 %v1450_v17, %v5329_v12 }
 0xb8c   :  { %v4025_v8 = vmul.f32 -1.442695, %v1466_v53  ;;  %v1468_v11 = vadd.f32 %v1452_v32, %v5337_v16  ;;  %v1469_v25 = vadd.f32 %v1453_v59, %v5349_v31  ;;  %v1470_v7 = vadd.f32 %v1454_v18, %v5347_v27 }
 0xb8d   :  { %1519 = vrot.lane.b32.xlu1 %v1448_v15, %s5114_s19  ;;  %v4023_v51 = vmul.f32 -1.442695, %v1464_v57  ;;  %v4022_v5 = vmul.f32 -1.442695, %v1463_v26  ;;  %v4026_v13 = vmul.f32 -1.442695, %v1467_v33 }
 0xb8e   :  { %4770 = vpow2.f32 %v4025_v8  ;;  %v4024_v48 = vmul.f32 -1.442695, %v1465_v40  ;;  %v4027_v50 = vmul.f32 -1.442695, %v1468_v11  ;;  %v4028_v37 = vmul.f32 -1.442695, %v1469_v25 }
 0xb8f   :  { %1527 = vrot.lane.b32.xlu0 %v1451_v54, %s5114_s19  ;;  %4772 = vpow2.f32 %v4023_v51  ;;  %v4029_v41 = vmul.f32 -1.442695, %v1470_v7 }
 0xb90   :  { %4774 = vpow2.f32 %v4022_v5 }
 0xb91   :  { %1523 = vrot.lane.b32.xlu1 %v1450_v17, %s5114_s19  ;;  %4776 = vpow2.f32 %v4026_v13 }
 0xb92   :  { %4778 = vpow2.f32 %v4024_v48 }
 0xb93   :  { %1529 = vrot.lane.b32.xlu0 %v1452_v32, %s5114_s19  ;;  %4780 = vpow2.f32 %v4027_v50 }
 0xb94   :  { %4782 = vpow2.f32 %v4028_v37 }
 0xb95   :  { %1531 = vrot.lane.b32.xlu1 %v1453_v59, %s5114_s19  ;;  %4784 = vpow2.f32 %v4029_v41 }
 0xb97   :  { %1533 = vrot.lane.b32.xlu0 %v1454_v18, %s5114_s19 }
 0xb98   :  { %v4771_v38 = vpop.eup %4770 }
 0xb99   :  { %v4773_v44 = vpop.eup %4772  ;;  %v1498_v14 = vadd.f32 1.0, %v4771_v38 }
 0xb9a   :  { %v4775_v36 = vpop.eup %4774  ;;  %v1496_v34 = vadd.f32 1.0, %v4773_v44 }
 0xb9b   :  { %v4777_v62 = vpop.eup %4776  ;;  %4786 = vrcp.f32 %v1498_v14  ;;  %v1495_v39 = vadd.f32 1.0, %v4775_v36 }
 0xb9c   :  { %v4779_v49 = vpop.eup %4778  ;;  %4788 = vrcp.f32 %v1496_v34  ;;  %v1499_v6 = vadd.f32 1.0, %v4777_v62 }
 0xb9d   :  { %v4781_v55 = vpop.eup %4780  ;;  %4790 = vrcp.f32 %v1495_v39  ;;  %v1497_v46 = vadd.f32 1.0, %v4779_v49 }
 0xb9e   :  { %v4783_v3 = vpop.eup %4782  ;;  %4792 = vrcp.f32 %v1499_v6  ;;  %v1500_v24 = vadd.f32 1.0, %v4781_v55 }
 0xb9f   :  { %v4785_v52 = vpop.eup %4784  ;;  %4794 = vrcp.f32 %v1497_v46  ;;  %v1501_v9 = vadd.f32 1.0, %v4783_v3 }
 0xba0   :  { %4796 = vrcp.f32 %v1500_v24  ;;  %v1502_v63 = vadd.f32 1.0, %v4785_v52 }
 0xba1   :  { %4798 = vrcp.f32 %v1501_v9 }
 0xba2   :  { %4800 = vrcp.f32 %v1502_v63 }
 0xba5   :  { %v5782_v1 = vpop.eup %4786 }
 0xba6   :  { %v5785_v56 = vpop.eup %4788 }
 0xba7   :  { %v5789_v54 = vpop.eup %4790 }
 0xba8   :  { %v5793_v59 = vpop.eup %4792 }
 0xba9   :  { %v5797_v57 = vpop.eup %4794 }
 0xbaa   :  { %v5801_v51 = vpop.eup %4796 }
 0xbab   :  { %v5805_v40 = vpop.eup %4798 }
 0xbac   :  { %v5809_v48 = vpop.eup %4800 }
 0xbfb   :  { %v1526_v29 = vpop.permute.xlu1 %1525 }
 0xbfc   :  { %v1546_v4 = vmul.f32 %v5782_v1, %v1526_v29 }
 0xbfd   :  { %v1522_v43 = vpop.permute.xlu0 %1521 }
 0xbfe   :  { %v1544_v15 = vmul.f32 %v5785_v56, %v1522_v43  ;;  %1565 = vrot.lane.b32.xlu1 %v1546_v4, %s5114_s19 }
 0xbff   :  { %v1520_v17 = vpop.permute.xlu1 %1519 }
 0xc00   :  { %v1543_v32 = vmul.f32 %v5789_v54, %v1520_v17  ;;  %1561 = vrot.lane.b32.xlu0 %v1544_v15, %s5114_s19 }
 0xc01   :  { %v1528_v18 = vpop.permute.xlu0 %1527 }
 0xc02   :  { %v1547_v53 = vmul.f32 %v5793_v59, %v1528_v18  ;;  %1559 = vrot.lane.b32.xlu1 %v1543_v32, %s5114_s19 }
 0xc03   :  { %v1524_v26 = vpop.permute.xlu1 %1523 }
 0xc04   :  { %v1545_v8 = vmul.f32 %v5797_v57, %v1524_v26  ;;  %1567 = vrot.lane.b32.xlu0 %v1547_v53, %s5114_s19 }
 0xc05   :  { %v1530_v33 = vpop.permute.xlu0 %1529 }
 0xc06   :  { %v1548_v5 = vmul.f32 %v5801_v51, %v1530_v33  ;;  %1563 = vrot.lane.b32.xlu1 %v1545_v8, %s5114_s19 }
 0xc07   :  { %v1532_v13 = vpop.permute.xlu1 %1531 }
 0xc08   :  { %v1549_v11 = vmul.f32 %v5805_v40, %v1532_v13  ;;  %1569 = vrot.lane.b32.xlu0 %v1548_v5, %s5114_s19 }
 0xc09   :  { %v1534_v25 = vpop.permute.xlu0 %1533 }
 0xc0a   :  { %v1550_v50 = vmul.f32 %v5809_v48, %v1534_v25  ;;  %1571 = vrot.lane.b32.xlu1 %v1549_v11, %s5114_s19 }
 0xc0c   :  { %1573 = vrot.lane.b32.xlu0 %v1550_v50, %s5114_s19 }
 0xc70   :  { %v1566_v7 = vpop.permute.xlu1 %1565 }
 0xc71   :  { %v1586_v37 = vadd.f32 %v1566_v7, %v5327_v0 }
 0xc72   :  { %v1562_v38 = vpop.permute.xlu0 %1561 }
 0xc73   :  { %4802 = vtanh.f32 %v1586_v37  ;;  %v1584_v41 = vadd.f32 %v1562_v38, %v5318_v60 }
 0xc74   :  { %v1560_v44 = vpop.permute.xlu1 %1559 }
 0xc75   :  { %4804 = vtanh.f32 %v1584_v41  ;;  %v1583_v14 = vadd.f32 %v1560_v44, %v5320_v61 }
 0xc76   :  { %v1568_v36 = vpop.permute.xlu0 %1567 }
 0xc77   :  { %4806 = vtanh.f32 %v1583_v14  ;;  %v1587_v34 = vadd.f32 %v1568_v36, %v5339_v21 }
 0xc78   :  { %v1564_v62 = vpop.permute.xlu1 %1563 }
 0xc79   :  { %4808 = vtanh.f32 %v1587_v34  ;;  %v1585_v39 = vadd.f32 %v1564_v62, %v5329_v12 }
 0xc7a   :  { %v1570_v49 = vpop.permute.xlu0 %1569 }
 0xc7b   :  { %4810 = vtanh.f32 %v1585_v39  ;;  %v1588_v6 = vadd.f32 %v1570_v49, %v5337_v16 }
 0xc7c   :  { %v1572_v55 = vpop.permute.xlu1 %1571 }
 0xc7d   :  { %v5820_v46 = vpop.eup %4802  ;;  %4812 = vtanh.f32 %v1588_v6  ;;  %v1589_v3 = vadd.f32 %v1572_v55, %v5349_v31 }
 0xc7e   :  { %v1574_v24 = vpop.permute.xlu0 %1573  ;;  %v1610_v52 = vrot.slane %v5820_v46, 1 }
 0xc7f   :  { %v5824_v9 = vpop.eup %4804  ;;  %4814 = vtanh.f32 %v1589_v3  ;;  %v1590_v29 = vadd.f32 %v1574_v24, %v5347_v27 }
 0xc80   :  { %v1626_v63 = vsub.f32 %v5730_v2, %v1610_v52  ;;  %v1608_v4 = vrot.slane %v5824_v9, 1 }
 0xc81   :  { %v5829_v43 = vpop.eup %4806  ;;  %4816 = vtanh.f32 %v1590_v29 }
 0xc82   :  { %v1642_v15 = vrot.slane %v1626_v63, 7  ;;  %v1624_v17 = vsub.f32 %v5725_v35, %v1608_v4  ;;  %v1607_v32 = vrot.slane %v5829_v43, 1 }
 0xc83   :  { %v5833_v18 = vpop.eup %4808 }
 0xc84   :  { %1653 = vrot.lane.b32.xlu1 %v1642_v15, %s5115_s22  ;;  %v1640_v53 = vrot.slane %v1624_v17, 7  ;;  %v1623_v26 = vsub.f32 %v5722_v10, %v1607_v32  ;;  %v1611_v8 = vrot.slane %v5833_v18, 1 }
 0xc85   :  { %v4811_v2 = vpop.eup %4810 }
 0xc86   :  { %1649 = vrot.lane.b32.xlu0 %v1640_v53, %s5115_s22  ;;  %v1639_v33 = vrot.slane %v1623_v26, 7  ;;  %v1627_v5 = vsub.f32 %v5739_v45, %v1611_v8  ;;  %v1609_v13 = vrot.slane %v4811_v2, 1 }
 0xc87   :  { %v4813_v11 = vpop.eup %4812 }
 0xc88   :  { %1647 = vrot.lane.b32.xlu1 %v1639_v33, %s5115_s22  ;;  %v1643_v35 = vrot.slane %v1627_v5, 7  ;;  %v1625_v25 = vsub.f32 %v5733_v42, %v1609_v13  ;;  %v1612_v50 = vrot.slane %v4813_v11, 1 }
 0xc89   :  { %v4815_v7 = vpop.eup %4814 }
 0xc8a   :  { %1655 = vrot.lane.b32.xlu0 %v1643_v35, %s5115_s22  ;;  %v1641_v10 = vrot.slane %v1625_v25, 7  ;;  %v1628_v37 = vsub.f32 %v5742_v28, %v1612_v50  ;;  %v1613_v38 = vrot.slane %v4815_v7, 1 }
 0xc8b   :  { %v4817_v41 = vpop.eup %4816 }
 0xc8c   :  { %1651 = vrot.lane.b32.xlu1 %v1641_v10, %s5115_s22  ;;  %v1644_v44 = vrot.slane %v1628_v37, 7  ;;  %v1629_v45 = vsub.f32 %v5749_v58, %v1613_v38  ;;  %v1614_v14 = vrot.slane %v4817_v41, 1 }
 0xc8e   :  { %1657 = vrot.lane.b32.xlu0 %v1644_v44, %s5115_s22  ;;  %v1645_v36 = vrot.slane %v1629_v45, 7  ;;  %v1630_v42 = vsub.f32 %v5746_v47, %v1614_v14 }
 0xc90   :  { %1659 = vrot.lane.b32.xlu1 %v1645_v36, %s5115_s22  ;;  %v1646_v34 = vrot.slane %v1630_v42, 7 }
 0xc92   :  { %1661 = vrot.lane.b32.xlu0 %v1646_v34, %s5115_s22 }
 0xcf6   :  { %v1654_v62 = vpop.permute.xlu1 %1653 }
 0xcf7   :  { %v1674_v28 = vmul.f32 %v5782_v1, %v1654_v62 }
 0xcf8   :  { %v1650_v39 = vpop.permute.xlu0 %1649 }
 0xcf9   :  { %v1672_v49 = vmul.f32 %v5785_v56, %v1650_v39  ;;  %1693 = vrot.lane.b32.xlu1 %v1674_v28, %s5116_s23 }
 0xcfa   :  { %v1648_v58 = vpop.permute.xlu1 %1647 }
 0xcfb   :  { %v1671_v6 = vmul.f32 %v5789_v54, %v1648_v58  ;;  %1689 = vrot.lane.b32.xlu0 %v1672_v49, %s5116_s23 }
 0xcfc   :  { %v1656_v55 = vpop.permute.xlu0 %1655 }
 0xcfd   :  { %v1675_v47 = vmul.f32 %v5793_v59, %v1656_v55  ;;  %1687 = vrot.lane.b32.xlu1 %v1671_v6, %s5116_s23 }
 0xcfe   :  { %v1652_v3 = vpop.permute.xlu1 %1651 }
 0xcff   :  { %v1673_v24 = vmul.f32 %v5797_v57, %v1652_v3  ;;  %1695 = vrot.lane.b32.xlu0 %v1675_v47, %s5116_s23 }
 0xd00   :  { %v1658_v1 = vpop.permute.xlu0 %1657 }
 0xd01   :  { %v1676_v56 = vmul.f32 %v5801_v51, %v1658_v1  ;;  %1691 = vrot.lane.b32.xlu1 %v1673_v24, %s5116_s23 }
 0xd02   :  { %v1660_v52 = vpop.permute.xlu1 %1659 }
 0xd03   :  { %v1677_v54 = vmul.f32 %v5805_v40, %v1660_v52  ;;  %1697 = vrot.lane.b32.xlu0 %v1676_v56, %s5116_s23 }
 0xd04   :  { %v1662_v29 = vpop.permute.xlu0 %1661 }
 0xd05   :  { %v1678_v59 = vmul.f32 %v5809_v48, %v1662_v29  ;;  %1699 = vrot.lane.b32.xlu1 %v1677_v54, %s5116_s23 }
 0xd07   :  { %1701 = vrot.lane.b32.xlu0 %v1678_v59, %s5116_s23 }
 0xd6b   :  { %v1694_v57 = vpop.permute.xlu1 %1693 }
 0xd6d   :  { %v1690_v63 = vpop.permute.xlu0 %1689 }
 0xd6e   :  { %v5870_v51 = vadd.f32 %v5824_v9, %v1690_v63 }
 0xd6f   :  { %v1688_v4 = vpop.permute.xlu1 %1687 }
 0xd70   :  { %v5867_v15 = vadd.f32 %v5829_v43, %v1688_v4  ;;  %v1728_v26 = vrot.slane %v5870_v51, 2  ;;  %v5883_v43 = vadd.f32 %v5820_v46, %v1694_v57 }
 0xd71   :  { %v1696_v17 = vpop.permute.xlu0 %1695 }
 0xd72   :  { %v1727_v40 = vrot.slane %v5867_v15, 3  ;;  %v5874_v53 = vadd.f32 %v5833_v18, %v1696_v17 }
 0xd73   :  { %v1692_v32 = vpop.permute.xlu1 %1691 }
 0xd74   :  { %v5876_v48 = vadd.f32 %v4811_v2, %v1692_v32  ;;  %v1729_v9 = vsel %vm617_vm3, %v1728_v26, %v1727_v40  ;;  %v1733_v35 = vrot.slane %v5874_v53, 7 }
 0xd75   :  { %v1698_v8 = vpop.permute.xlu0 %1697 }
 0xd76   :  { %v1730_v33 = vrot.slane %v5876_v48, 1  ;;  %v5880_v5 = vadd.f32 %v4813_v11, %v1698_v8 }
 0xd77   :  { %v1700_v13 = vpop.permute.xlu1 %1699 }
 0xd78   :  { %v1731_v18 = vsel %vm620_vm4, %v1730_v33, %v1729_v9  ;;  %v1735_v2 = vrot.slane %v5880_v5, 6  ;;  %v5889_v25 = vadd.f32 %v4815_v7, %v1700_v13 }
 0xd79   :  { %v1732_v50 = vsel %vm623_vm5, %v5883_v43, %v1731_v18  ;;  %v1702_v10 = vpop.permute.xlu0 %1701 }
 0xd7a   :  { %v1737_v11 = vrot.slane %v5889_v25, 5  ;;  %v5894_v37 = vadd.f32 %v4817_v41, %v1702_v10  ;;  %v1734_v46 = vsel %vm626_vm6, %v1733_v35, %v1732_v50 }
 0xd7b   :  { %v1736_v38 = vsel %vm629_vm7, %v1735_v2, %v1734_v46 }
 0xd7c   :  { %v1739_v44 = vrot.slane %v5894_v37, 4  ;;  %v1738_v45 = vsel %vm632_vm8, %v1737_v11, %v1736_v38 }
 0xd7e   :  { %v1740_v14 = vsel %vm635_vm9, %v1739_v44, %v1738_v45 }
 0xd7f   :  { %1741 = vrot.lane.b32.xlu1 %v1740_v14, %s5114_s19 }
 0xdf1   :  { %v1742_v7 = vpop.permute.xlu1 %1741 }
 0xdf2   :  { %4263 = vmatmul.mubr.msk.f32.vlgmr.msra.gmra.mrb[10].mxu0 %vm294_vm10, %v1742_v7 }
 0xdf3   :  { %4487 = vmatpush3.bf16.msra.mxu0 %v5195_v20  ;;  %4284 = vmatprep.mubr.msk.f32.mxu0 %vm5112_vm1, %v5113_v22 }
 0xdf4   :  { %4488 = vmatprep.subr.bf16.mxu0 %v5111_v19 }
 0xdf7   :  { %4490 = vmatpush3.bf16.msra.mxu0 %v5200_v23 }
 0xdf8   :  { %4497 = vmatprep.subr.bf16.mxu0 %v5111_v19 }
 0xec5   :  { %v1811_v41 = vpop.f32.mrb[10].mxu0 }
 0xec6   :  { %v1812_v36 = vadd.f32 %v5615_v30, %v1811_v41  ;;  %v4264_v42 = vpop.f32.mrb[11].mxu0 }
 0xec8   :  { %1895 = vrot.lane.b32.xlu1 %v1812_v36, %s5114_s19  ;;  %v1816_v34 = vrot.slane %v1812_v36, 4  ;;  %v1817_v62 = vrot.slane %v1812_v36, 5  ;;  %v1818_v28 = vrot.slane %v1812_v36, 6  ;;  %v1819_v39 = vrot.slane %v1812_v36, 7 }
 0xec9   :  { %v1820_v49 = vrot.slane %v1812_v36, 1  ;;  %v1822_v58 = vrot.slane %v1812_v36, 3  ;;  %v1821_v30 = vrot.slane %v1812_v36, 2  ;;  %v1835_v6 = vadd.f32 %v1812_v36, %v5339_v21 }
 0xeca   :  { %1887 = vrot.lane.b32.xlu0 %v1816_v34, %s5114_s19  ;;  %v1831_v55 = vadd.f32 %v1816_v34, %v5320_v61  ;;  %v1832_v47 = vadd.f32 %v1817_v62, %v5318_v60  ;;  %v1833_v1 = vadd.f32 %v1818_v28, %v5329_v12  ;;  %v1834_v52 = vadd.f32 %v1819_v39, %v5327_v0 }
 0xecb   :  { %v4035_v3 = vmul.f32 -1.442695, %v1835_v6  ;;  %v1836_v29 = vadd.f32 %v1820_v49, %v5337_v16  ;;  %v1838_v57 = vadd.f32 %v1822_v58, %v5347_v27  ;;  %v1837_v4 = vadd.f32 %v1821_v30, %v5349_v31 }
 0xecc   :  { %1889 = vrot.lane.b32.xlu1 %v1817_v62, %s5114_s19  ;;  %v4031_v24 = vmul.f32 -1.442695, %v1831_v55  ;;  %v4032_v56 = vmul.f32 -1.442695, %v1832_v47  ;;  %v4033_v54 = vmul.f32 -1.442695, %v1833_v1 }
 0xecd   :  { %4818 = vpow2.f32 %v4035_v3  ;;  %v4034_v59 = vmul.f32 -1.442695, %v1834_v52  ;;  %v4036_v63 = vmul.f32 -1.442695, %v1836_v29  ;;  %v4038_v17 = vmul.f32 -1.442695, %v1838_v57 }
 0xece   :  { %1891 = vrot.lane.b32.xlu0 %v1818_v28, %s5114_s19  ;;  %4820 = vpow2.f32 %v4031_v24  ;;  %v4037_v32 = vmul.f32 -1.442695, %v1837_v4 }
 0xecf   :  { %4822 = vpow2.f32 %v4032_v56 }
 0xed0   :  { %1893 = vrot.lane.b32.xlu1 %v1819_v39, %s5114_s19  ;;  %4824 = vpow2.f32 %v4033_v54 }
 0xed1   :  { %4826 = vpow2.f32 %v4034_v59 }
 0xed2   :  { %1897 = vrot.lane.b32.xlu0 %v1820_v49, %s5114_s19  ;;  %4828 = vpow2.f32 %v4036_v63 }
 0xed3   :  { %4830 = vpow2.f32 %v4038_v17 }
 0xed4   :  { %1901 = vrot.lane.b32.xlu1 %v1822_v58, %s5114_s19  ;;  %4832 = vpow2.f32 %v4037_v32 }
 0xed6   :  { %1899 = vrot.lane.b32.xlu0 %v1821_v30, %s5114_s19 }
 0xed7   :  { %v4819_v40 = vpop.eup %4818 }
 0xed8   :  { %v4821_v26 = vpop.eup %4820  ;;  %v1867_v8 = vadd.f32 1.0, %v4819_v40 }
 0xed9   :  { %v4823_v33 = vpop.eup %4822  ;;  %v1863_v9 = vadd.f32 1.0, %v4821_v26 }
 0xeda   :  { %v4825_v13 = vpop.eup %4824  ;;  %4834 = vrcp.f32 %v1867_v8  ;;  %v1864_v35 = vadd.f32 1.0, %v4823_v33 }
 0xedb   :  { %v4827_v18 = vpop.eup %4826  ;;  %4836 = vrcp.f32 %v1863_v9  ;;  %v1865_v2 = vadd.f32 1.0, %v4825_v13 }
 0xedc   :  { %v4829_v50 = vpop.eup %4828  ;;  %4838 = vrcp.f32 %v1864_v35  ;;  %v1866_v10 = vadd.f32 1.0, %v4827_v18 }
 0xedd   :  { %v4831_v11 = vpop.eup %4830  ;;  %4840 = vrcp.f32 %v1865_v2  ;;  %v1868_v46 = vadd.f32 1.0, %v4829_v50 }
 0xede   :  { %v4833_v38 = vpop.eup %4832  ;;  %4842 = vrcp.f32 %v1866_v10  ;;  %v1870_v44 = vadd.f32 1.0, %v4831_v11 }
 0xedf   :  { %4844 = vrcp.f32 %v1868_v46  ;;  %v1869_v7 = vadd.f32 1.0, %v4833_v38 }
 0xee0   :  { %4846 = vrcp.f32 %v1870_v44 }
 0xee1   :  { %4848 = vrcp.f32 %v1869_v7 }
 0xee4   :  { %v5926_v45 = vpop.eup %4834 }
 0xee5   :  { %v5929_v36 = vpop.eup %4836 }
 0xee6   :  { %v5933_v62 = vpop.eup %4838 }
 0xee7   :  { %v5937_v49 = vpop.eup %4840 }
 0xee8   :  { %v5941_v6 = vpop.eup %4842 }
 0xee9   :  { %v5945_v3 = vpop.eup %4844 }
 0xeea   :  { %v5949_v56 = vpop.eup %4846 }
 0xeeb   :  { %v5953_v29 = vpop.eup %4848 }
 0xf3a   :  { %v1896_v14 = vpop.permute.xlu1 %1895 }
 0xf3b   :  { %v1915_v41 = vmul.f32 %v5926_v45, %v1896_v14 }
 0xf3c   :  { %v1888_v42 = vpop.permute.xlu0 %1887 }
 0xf3d   :  { %v1911_v34 = vmul.f32 %v5929_v36, %v1888_v42  ;;  %1935 = vrot.lane.b32.xlu1 %v1915_v41, %s5114_s19 }
 0xf3e   :  { %v1890_v28 = vpop.permute.xlu1 %1889 }
 0xf3f   :  { %v1912_v39 = vmul.f32 %v5933_v62, %v1890_v28  ;;  %1927 = vrot.lane.b32.xlu0 %v1911_v34, %s5114_s19 }
 0xf40   :  { %v1892_v58 = vpop.permute.xlu0 %1891 }
 0xf41   :  { %v1913_v30 = vmul.f32 %v5937_v49, %v1892_v58  ;;  %1929 = vrot.lane.b32.xlu1 %v1912_v39, %s5114_s19 }
 0xf42   :  { %v1894_v55 = vpop.permute.xlu1 %1893 }
 0xf43   :  { %v1914_v47 = vmul.f32 %v5941_v6, %v1894_v55  ;;  %1931 = vrot.lane.b32.xlu0 %v1913_v30, %s5114_s19 }
 0xf44   :  { %v1898_v24 = vpop.permute.xlu0 %1897 }
 0xf45   :  { %v1916_v1 = vmul.f32 %v5945_v3, %v1898_v24  ;;  %1933 = vrot.lane.b32.xlu1 %v1914_v47, %s5114_s19 }
 0xf46   :  { %v1902_v52 = vpop.permute.xlu1 %1901 }
 0xf47   :  { %v1918_v54 = vmul.f32 %v5949_v56, %v1902_v52  ;;  %1937 = vrot.lane.b32.xlu0 %v1916_v1, %s5114_s19 }
 0xf48   :  { %v1900_v59 = vpop.permute.xlu0 %1899 }
 0xf49   :  { %v1917_v57 = vmul.f32 %v5953_v29, %v1900_v59  ;;  %1941 = vrot.lane.b32.xlu1 %v1918_v54, %s5114_s19 }
 0xf4b   :  { %1939 = vrot.lane.b32.xlu0 %v1917_v57, %s5114_s19 }
 0xfaf   :  { %v1936_v63 = vpop.permute.xlu1 %1935 }
 0xfb0   :  { %v1955_v4 = vadd.f32 %v1936_v63, %v5339_v21 }
 0xfb1   :  { %v1928_v17 = vpop.permute.xlu0 %1927 }
 0xfb2   :  { %4850 = vtanh.f32 %v1955_v4  ;;  %v1951_v40 = vadd.f32 %v1928_v17, %v5320_v61 }
 0xfb3   :  { %v1930_v32 = vpop.permute.xlu1 %1929 }
 0xfb4   :  { %4852 = vtanh.f32 %v1951_v40  ;;  %v1952_v26 = vadd.f32 %v1930_v32, %v5318_v60 }
 0xfb5   :  { %v1932_v8 = vpop.permute.xlu0 %1931 }
 0xfb6   :  { %4854 = vtanh.f32 %v1952_v26  ;;  %v1953_v33 = vadd.f32 %v1932_v8, %v5329_v12 }
 0xfb7   :  { %v1934_v9 = vpop.permute.xlu1 %1933 }
 0xfb8   :  { %4856 = vtanh.f32 %v1953_v33  ;;  %v1954_v13 = vadd.f32 %v1934_v9, %v5327_v0 }
 0xfb9   :  { %v1938_v35 = vpop.permute.xlu0 %1937 }
 0xfba   :  { %4858 = vtanh.f32 %v1954_v13  ;;  %v1956_v18 = vadd.f32 %v1938_v35, %v5337_v16 }
 0xfbb   :  { %v1942_v2 = vpop.permute.xlu1 %1941 }
 0xfbc   :  { %v5964_v50 = vpop.eup %4850  ;;  %4860 = vtanh.f32 %v1956_v18  ;;  %v1958_v10 = vadd.f32 %v1942_v2, %v5347_v27 }
 0xfbd   :  { %v1940_v11 = vpop.permute.xlu0 %1939  ;;  %v1979_v46 = vrot.slane %v5964_v50, 1 }
 0xfbe   :  { %v5968_v38 = vpop.eup %4852  ;;  %4862 = vtanh.f32 %v1958_v10  ;;  %v1957_v44 = vadd.f32 %v1940_v11, %v5349_v31 }
 0xfbf   :  { %v1995_v14 = vsub.f32 %v5874_v53, %v1979_v46  ;;  %v1975_v7 = vrot.slane %v5968_v38, 1 }
 0xfc0   :  { %v5973_v41 = vpop.eup %4854  ;;  %4864 = vtanh.f32 %v1957_v44 }
 0xfc1   :  { %v2011_v42 = vrot.slane %v1995_v14, 7  ;;  %v1991_v34 = vsub.f32 %v5867_v15, %v1975_v7  ;;  %v1976_v28 = vrot.slane %v5973_v41, 1 }
 0xfc2   :  { %v5977_v39 = vpop.eup %4856 }
 0xfc3   :  { %2023 = vrot.lane.b32.xlu1 %v2011_v42, %s5115_s22  ;;  %v2007_v58 = vrot.slane %v1991_v34, 7  ;;  %v1992_v30 = vsub.f32 %v5870_v51, %v1976_v28  ;;  %v1977_v55 = vrot.slane %v5977_v39, 1 }
 0xfc4   :  { %v4859_v53 = vpop.eup %4858 }
 0xfc5   :  { %2015 = vrot.lane.b32.xlu0 %v2007_v58, %s5115_s22  ;;  %v2008_v47 = vrot.slane %v1992_v30, 7  ;;  %v1993_v24 = vsub.f32 %v5876_v48, %v1977_v55  ;;  %v1978_v1 = vrot.slane %v4859_v53, 1 }
 0xfc6   :  { %v4861_v52 = vpop.eup %4860 }
 0xfc7   :  { %2017 = vrot.lane.b32.xlu1 %v2008_v47, %s5115_s22  ;;  %v2009_v15 = vrot.slane %v1993_v24, 7  ;;  %v1994_v54 = vsub.f32 %v5883_v43, %v1978_v1  ;;  %v1980_v59 = vrot.slane %v4861_v52, 1 }
 0xfc8   :  { %v4863_v57 = vpop.eup %4862 }
 0xfc9   :  { %2019 = vrot.lane.b32.xlu0 %v2009_v15, %s5115_s22  ;;  %v2010_v51 = vrot.slane %v1994_v54, 7  ;;  %v1996_v63 = vsub.f32 %v5880_v5, %v1980_v59  ;;  %v1982_v4 = vrot.slane %v4863_v57, 1 }
 0xfca   :  { %v4865_v17 = vpop.eup %4864 }
 0xfcb   :  { %2021 = vrot.lane.b32.xlu1 %v2010_v51, %s5115_s22  ;;  %v2012_v40 = vrot.slane %v1996_v63, 7  ;;  %v1998_v48 = vsub.f32 %v5894_v37, %v1982_v4  ;;  %v1981_v32 = vrot.slane %v4865_v17, 1 }
 0xfcd   :  { %2025 = vrot.lane.b32.xlu0 %v2012_v40, %s5115_s22  ;;  %v2014_v26 = vrot.slane %v1998_v48, 7  ;;  %v1997_v43 = vsub.f32 %v5889_v25, %v1981_v32  ;;  %v6056_v32 = vld [vmem:[%s6662_s1 + $0x3] ss:$0 sm:$0xff] }
 0xfcf   :  { %2029 = vrot.lane.b32.xlu1 %v2014_v26, %s5115_s22  ;;  %v2013_v8 = vrot.slane %v1997_v43, 7 }
 0xfd1   :  { %2027 = vrot.lane.b32.xlu0 %v2013_v8, %s5115_s22 }
0x1035   :  { %v2024_v33 = vpop.permute.xlu1 %2023 }
0x1036   :  { %v2043_v5 = vmul.f32 %v5926_v45, %v2024_v33 }
0x1037   :  { %v2016_v9 = vpop.permute.xlu0 %2015 }
0x1038   :  { %v2039_v13 = vmul.f32 %v5929_v36, %v2016_v9  ;;  %2063 = vrot.lane.b32.xlu1 %v2043_v5, %s5116_s23 }
0x1039   :  { %v2018_v37 = vpop.permute.xlu1 %2017 }
0x103a   :  { %v2040_v35 = vmul.f32 %v5933_v62, %v2018_v37  ;;  %2055 = vrot.lane.b32.xlu0 %v2039_v13, %s5116_s23 }
0x103b   :  { %v2020_v18 = vpop.permute.xlu0 %2019 }
0x103c   :  { %v2041_v25 = vmul.f32 %v5937_v49, %v2020_v18  ;;  %2057 = vrot.lane.b32.xlu1 %v2040_v35, %s5116_s23 }
0x103d   :  { %v2022_v2 = vpop.permute.xlu1 %2021 }
0x103e   :  { %v2042_v10 = vmul.f32 %v5941_v6, %v2022_v2  ;;  %2059 = vrot.lane.b32.xlu0 %v2041_v25, %s5116_s23 }
0x103f   :  { %v2026_v45 = vpop.permute.xlu0 %2025 }
0x1040   :  { %v2044_v36 = vmul.f32 %v5945_v3, %v2026_v45  ;;  %2061 = vrot.lane.b32.xlu1 %v2042_v10, %s5116_s23 }
0x1041   :  { %v2030_v11 = vpop.permute.xlu1 %2029 }
0x1042   :  { %v2046_v62 = vmul.f32 %v5949_v56, %v2030_v11  ;;  %2065 = vrot.lane.b32.xlu0 %v2044_v36, %s5116_s23 }
0x1043   :  { %v2028_v46 = vpop.permute.xlu0 %2027 }
0x1044   :  { %v2045_v49 = vmul.f32 %v5953_v29, %v2028_v46  ;;  %2069 = vrot.lane.b32.xlu1 %v2046_v62, %s5116_s23 }
0x1046   :  { %2067 = vrot.lane.b32.xlu0 %v2045_v49, %s5116_s23 }
0x10aa   :  { %v2064_v6 = vpop.permute.xlu1 %2063 }
0x10ab   :  { %v6030_v15 = vadd.f32 %v5964_v50, %v2064_v6 }
0x10ac   :  { %v2056_v44 = vpop.permute.xlu0 %2055 }
0x10ad   :  { %v6011_v14 = vadd.f32 %v5968_v38, %v2056_v44 }
0x10ae   :  { %v2058_v3 = vpop.permute.xlu1 %2057 }
0x10af   :  { %v6014_v7 = vadd.f32 %v5973_v41, %v2058_v3  ;;  %v2095_v56 = vrot.slane %v6011_v14, 4 }
0x10b0   :  { %v2060_v42 = vpop.permute.xlu0 %2059 }
0x10b1   :  { %v2096_v34 = vrot.slane %v6014_v7, 3  ;;  %v6019_v29 = vadd.f32 %v5977_v39, %v2060_v42 }
0x10b2   :  { %v2062_v28 = vpop.permute.xlu1 %2061 }
0x10b3   :  { %v2097_v58 = vsel %vm617_vm3, %v2096_v34, %v2095_v56  ;;  %v2098_v30 = vrot.slane %v6019_v29, 2  ;;  %v6023_v55 = vadd.f32 %v4859_v53, %v2062_v28 }
0x10b4   :  { %v2066_v38 = vpop.permute.xlu0 %2065 }
0x10b5   :  { %v2099_v47 = vsel %vm620_vm4, %v2098_v30, %v2097_v58  ;;  %v2100_v41 = vrot.slane %v6023_v55, 1  ;;  %v6027_v24 = vadd.f32 %v4861_v52, %v2066_v38 }
0x10b6   :  { %v2070_v1 = vpop.permute.xlu1 %2069 }
0x10b7   :  { %v2101_v39 = vsel %vm623_vm5, %v2100_v41, %v2099_v47  ;;  %v2103_v54 = vrot.slane %v6027_v24, 7  ;;  %v6034_v59 = vadd.f32 %v4863_v57, %v2070_v1 }
0x10b8   :  { %v2068_v51 = vpop.permute.xlu0 %2067  ;;  %v2102_v63 = vsel %vm626_vm6, %v6030_v15, %v2101_v39 }
0x10b9   :  { %v6036_v53 = vadd.f32 %v4865_v17, %v2068_v51  ;;  %v2107_v52 = vrot.slane %v6034_v59, 5  ;;  %v2104_v40 = vsel %vm629_vm7, %v2103_v54, %v2102_v63 }
0x10bb   :  { %v2105_v4 = vrot.slane %v6036_v53, 6 }
0x10bd   :  { %v2106_v50 = vsel %vm632_vm8, %v2105_v4, %v2104_v40 }
0x10be   :  { %v2108_v48 = vsel %vm635_vm9, %v2107_v52, %v2106_v50 }
0x10bf   :  { %2109 = vrot.lane.b32.xlu0 %v2108_v48, %s5114_s19 }
0x1131   :  { %v2110_v57 = vpop.permute.xlu0 %2109 }
0x1132   :  { %4274 = vmatmul.mubr.msk.f32.vlgmr.msra.gmra.mrb[6].mxu1 %vm294_vm10, %v2110_v57 }
0x1133   :  { %4493 = vmatpush3.bf16.msra.mxu1 %v5195_v20  ;;  %4295 = vmatprep.mubr.msk.f32.mxu1 %vm5112_vm1, %v5113_v22 }
0x1134   :  { %4494 = vmatprep.subr.bf16.mxu1 %v5111_v19 }
0x1137   :  { %4496 = vmatpush3.bf16.msra.mxu1 %v5200_v23 }
0x1138   :  { %4503 = vmatprep.subr.bf16.mxu1 %v5111_v19 }
0x1205   :  { %v2179_v17 = vpop.f32.mrb[6].mxu1 }
0x1206   :  { %v2180_v26 = vadd.f32 %v6056_v32, %v2179_v17  ;;  %v4275_v43 = vpop.f32.mrb[7].mxu1 }
0x1208   :  { %v2185_v8 = vrot.slane %v2180_v26, 4  ;;  %v2184_v20 = vrot.slane %v2180_v26, 3  ;;  %v2187_v33 = vrot.slane %v2180_v26, 6  ;;  %v2186_v5 = vrot.slane %v2180_v26, 5 }
0x1209   :  { %v2189_v23 = vrot.slane %v2180_v26, 1  ;;  %v2188_v9 = vrot.slane %v2180_v26, 7  ;;  %v2190_v13 = vrot.slane %v2180_v26, 2  ;;  %v2204_v44 = vadd.f32 %v2180_v26, %v5337_v16 }
0x120a   :  { %2257 = vrot.lane.b32.xlu0 %v2185_v8, %s5114_s19  ;;  %2255 = vrot.lane.b32.xlu1 %v2184_v20, %s5114_s19  ;;  %v2200_v37 = vadd.f32 %v2185_v8, %v5318_v60  ;;  %v2199_v35 = vadd.f32 %v2184_v20, %v5320_v61  ;;  %v2202_v25 = vadd.f32 %v2187_v33, %v5327_v0 }
0x120b   :  { %v2201_v10 = vadd.f32 %v2186_v5, %v5329_v12  ;;  %v2205_v36 = vadd.f32 %v2189_v23, %v5349_v31  ;;  %v2203_v62 = vadd.f32 %v2188_v9, %v5339_v21  ;;  %v2206_v49 = vadd.f32 %v2190_v13, %v5347_v27 }
0x120c   :  { %v4041_v18 = vmul.f32 -1.442695, %v2200_v37  ;;  %v4040_v2 = vmul.f32 -1.442695, %v2199_v35  ;;  %v4043_v45 = vmul.f32 -1.442695, %v2202_v25 }
0x120d   :  { %v4042_v11 = vmul.f32 -1.442695, %v2201_v10  ;;  %v4046_v46 = vmul.f32 -1.442695, %v2205_v36  ;;  %v4044_v6 = vmul.f32 -1.442695, %v2203_v62 }
0x120e   :  { %2261 = vrot.lane.b32.xlu0 %v2187_v33, %s5114_s19  ;;  %2259 = vrot.lane.b32.xlu1 %v2186_v5, %s5114_s19  ;;  %4866 = vpow2.f32 %v4041_v18  ;;  %v4047_v3 = vmul.f32 -1.442695, %v2206_v49  ;;  %v4045_v42 = vmul.f32 -1.442695, %v2204_v44 }
0x120f   :  { %4868 = vpow2.f32 %v4040_v2 }
0x1210   :  { %4870 = vpow2.f32 %v4043_v45 }
0x1211   :  { %4872 = vpow2.f32 %v4042_v11 }
0x1212   :  { %2267 = vrot.lane.b32.xlu0 %v2189_v23, %s5114_s19  ;;  %2263 = vrot.lane.b32.xlu1 %v2188_v9, %s5114_s19  ;;  %4874 = vpow2.f32 %v4046_v46 }
0x1213   :  { %4876 = vpow2.f32 %v4044_v6 }
0x1214   :  { %4878 = vpow2.f32 %v4047_v3 }
0x1215   :  { %4880 = vpow2.f32 %v4045_v42 }
0x1216   :  { %2269 = vrot.lane.b32.xlu0 %v2190_v13, %s5114_s19  ;;  %2265 = vrot.lane.b32.xlu1 %v2180_v26, %s5114_s19 }
0x1218   :  { %v4867_v56 = vpop.eup %4866 }
0x1219   :  { %v4869_v34 = vpop.eup %4868  ;;  %v2232_v28 = vadd.f32 1.0, %v4867_v56 }
0x121a   :  { %v4871_v58 = vpop.eup %4870  ;;  %v2231_v30 = vadd.f32 1.0, %v4869_v34 }
0x121b   :  { %v4873_v38 = vpop.eup %4872  ;;  %4882 = vrcp.f32 %v2232_v28  ;;  %v2234_v47 = vadd.f32 1.0, %v4871_v58 }
0x121c   :  { %v4875_v41 = vpop.eup %4874  ;;  %4884 = vrcp.f32 %v2231_v30  ;;  %v2233_v1 = vadd.f32 1.0, %v4873_v38 }
0x121d   :  { %v4877_v39 = vpop.eup %4876  ;;  %4886 = vrcp.f32 %v2234_v47  ;;  %v2237_v54 = vadd.f32 1.0, %v4875_v41 }
0x121e   :  { %v4879_v51 = vpop.eup %4878  ;;  %4888 = vrcp.f32 %v2233_v1  ;;  %v2235_v63 = vadd.f32 1.0, %v4877_v39 }
0x121f   :  { %v4881_v4 = vpop.eup %4880  ;;  %4890 = vrcp.f32 %v2237_v54  ;;  %v2238_v52 = vadd.f32 1.0, %v4879_v51 }
0x1220   :  { %4892 = vrcp.f32 %v2235_v63  ;;  %v2236_v40 = vadd.f32 1.0, %v4881_v4 }
0x1221   :  { %4894 = vrcp.f32 %v2238_v52 }
0x1222   :  { %4896 = vrcp.f32 %v2236_v40 }
0x1225   :  { %v6075_v50 = vpop.eup %4882 }
0x1226   :  { %v6077_v48 = vpop.eup %4884 }
0x1227   :  { %v6081_v8 = vpop.eup %4886 }
0x1228   :  { %v6085_v20 = vpop.eup %4888 }
0x1229   :  { %v6089_v13 = vpop.eup %4890 }
0x122a   :  { %v6093_v37 = vpop.eup %4892 }
0x122b   :  { %v6097_v10 = vpop.eup %4894 }
0x122c   :  { %v6101_v45 = vpop.eup %4896 }
0x127c   :  { %v2258_v57 = vpop.permute.xlu0 %2257  ;;  %v2256_v17 = vpop.permute.xlu1 %2255 }
0x127d   :  { %v2280_v26 = vmul.f32 %v6075_v50, %v2258_v57  ;;  %v2279_v43 = vmul.f32 %v6077_v48, %v2256_v17 }
0x127f   :  { %2297 = vrot.lane.b32.xlu0 %v2280_v26, %s5114_s19  ;;  %2295 = vrot.lane.b32.xlu1 %v2279_v43, %s5114_s19 }
0x1280   :  { %v2262_v33 = vpop.permute.xlu0 %2261  ;;  %v2260_v5 = vpop.permute.xlu1 %2259 }
0x1281   :  { %v2282_v23 = vmul.f32 %v6081_v8, %v2262_v33  ;;  %v2281_v9 = vmul.f32 %v6085_v20, %v2260_v5 }
0x1283   :  { %2301 = vrot.lane.b32.xlu0 %v2282_v23, %s5114_s19  ;;  %2299 = vrot.lane.b32.xlu1 %v2281_v9, %s5114_s19 }
0x1284   :  { %v2268_v35 = vpop.permute.xlu0 %2267  ;;  %v2264_v18 = vpop.permute.xlu1 %2263 }
0x1285   :  { %v2285_v25 = vmul.f32 %v6089_v13, %v2268_v35  ;;  %v2283_v2 = vmul.f32 %v6093_v37, %v2264_v18 }
0x1287   :  { %2307 = vrot.lane.b32.xlu0 %v2285_v25, %s5114_s19  ;;  %2303 = vrot.lane.b32.xlu1 %v2283_v2, %s5114_s19 }
0x1288   :  { %v2270_v36 = vpop.permute.xlu0 %2269  ;;  %v2266_v11 = vpop.permute.xlu1 %2265 }
0x1289   :  { %v2286_v62 = vmul.f32 %v6097_v10, %v2270_v36  ;;  %v2284_v46 = vmul.f32 %v6101_v45, %v2266_v11 }
0x128b   :  { %2309 = vrot.lane.b32.xlu0 %v2286_v62, %s5114_s19  ;;  %2305 = vrot.lane.b32.xlu1 %v2284_v46, %s5114_s19 }
0x12f1   :  { %v2298_v49 = vpop.permute.xlu0 %2297  ;;  %v2296_v6 = vpop.permute.xlu1 %2295 }
0x12f2   :  { %v2320_v44 = vadd.f32 %v2298_v49, %v5318_v60  ;;  %v2319_v3 = vadd.f32 %v2296_v6, %v5320_v61 }
0x12f4   :  { %4898 = vtanh.f32 %v2320_v44 }
0x12f5   :  { %4900 = vtanh.f32 %v2319_v3  ;;  %v2302_v42 = vpop.permute.xlu0 %2301  ;;  %v2300_v56 = vpop.permute.xlu1 %2299 }
0x12f6   :  { %v2322_v34 = vadd.f32 %v2302_v42, %v5327_v0  ;;  %v2321_v28 = vadd.f32 %v2300_v56, %v5329_v12 }
0x12f8   :  { %4902 = vtanh.f32 %v2322_v34 }
0x12f9   :  { %4904 = vtanh.f32 %v2321_v28  ;;  %v2308_v58 = vpop.permute.xlu0 %2307  ;;  %v2304_v30 = vpop.permute.xlu1 %2303 }
0x12fa   :  { %v2325_v38 = vadd.f32 %v2308_v58, %v5349_v31  ;;  %v2323_v47 = vadd.f32 %v2304_v30, %v5339_v21 }
0x12fc   :  { %4906 = vtanh.f32 %v2325_v38 }
0x12fd   :  { %4908 = vtanh.f32 %v2323_v47  ;;  %v2310_v41 = vpop.permute.xlu0 %2309  ;;  %v2306_v1 = vpop.permute.xlu1 %2305 }
0x12fe   :  { %v6113_v39 = vpop.eup %4898  ;;  %v2326_v54 = vadd.f32 %v2310_v41, %v5347_v27  ;;  %v2324_v51 = vadd.f32 %v2306_v1, %v5337_v16 }
0x12ff   :  { %v6117_v63 = vpop.eup %4900  ;;  %v2344_v4 = vrot.slane %v6113_v39, 1 }
0x1300   :  { %4910 = vtanh.f32 %v2326_v54  ;;  %v2343_v52 = vrot.slane %v6117_v63, 1 }
0x1301   :  { %4912 = vtanh.f32 %v2324_v51  ;;  %v2360_v40 = vsub.f32 %v6014_v7, %v2344_v4 }
0x1302   :  { %v6122_v57 = vpop.eup %4902  ;;  %v2359_v17 = vsub.f32 %v6011_v14, %v2343_v52 }
0x1303   :  { %v6125_v26 = vpop.eup %4904  ;;  %v2376_v43 = vrot.slane %v2360_v40, 7  ;;  %v2346_v33 = vrot.slane %v6122_v57, 1 }
0x1304   :  { %v2375_v5 = vrot.slane %v2359_v17, 7  ;;  %v2345_v23 = vrot.slane %v6125_v26, 1 }
0x1305   :  { %2385 = vrot.lane.b32.xlu0 %v2376_v43, %s5115_s22  ;;  %v2362_v9 = vsub.f32 %v6023_v55, %v2346_v33 }
0x1306   :  { %v6131_v35 = vpop.eup %4906  ;;  %2383 = vrot.lane.b32.xlu1 %v2375_v5, %s5115_s22  ;;  %v2361_v7 = vsub.f32 %v6019_v29, %v2345_v23 }
0x1307   :  { %v6135_v18 = vpop.eup %4908  ;;  %v2378_v14 = vrot.slane %v2362_v9, 7  ;;  %v2349_v25 = vrot.slane %v6131_v35, 1 }
0x1308   :  { %v2377_v2 = vrot.slane %v2361_v7, 7  ;;  %v2347_v36 = vrot.slane %v6135_v18, 1 }
0x1309   :  { %2389 = vrot.lane.b32.xlu0 %v2378_v14, %s5115_s22  ;;  %v2365_v11 = vsub.f32 %v6036_v53, %v2349_v25 }
0x130a   :  { %v4911_v62 = vpop.eup %4910  ;;  %2387 = vrot.lane.b32.xlu1 %v2377_v2, %s5115_s22  ;;  %v2363_v55 = vsub.f32 %v6030_v15, %v2347_v36 }
0x130b   :  { %v4913_v46 = vpop.eup %4912  ;;  %v2381_v49 = vrot.slane %v2365_v11, 7  ;;  %v2350_v29 = vrot.slane %v4911_v62, 1 }
0x130c   :  { %v2379_v6 = vrot.slane %v2363_v55, 7  ;;  %v2348_v44 = vrot.slane %v4913_v46, 1 }
0x130d   :  { %2395 = vrot.lane.b32.xlu0 %v2381_v49, %s5115_s22  ;;  %v2366_v3 = vsub.f32 %v6034_v59, %v2350_v29 }
0x130e   :  { %2391 = vrot.lane.b32.xlu1 %v2379_v6, %s5115_s22  ;;  %v2364_v42 = vsub.f32 %v6027_v24, %v2348_v44 }
0x130f   :  { %v2382_v56 = vrot.slane %v2366_v3, 7 }
0x1310   :  { %v2380_v53 = vrot.slane %v2364_v42, 7 }
0x1311   :  { %2397 = vrot.lane.b32.xlu0 %v2382_v56, %s5115_s22 }
0x1312   :  { %2393 = vrot.lane.b32.xlu1 %v2380_v53, %s5115_s22 }
0x1377   :  { %v2386_v15 = vpop.permute.xlu0 %2385 }
0x1378   :  { %v2408_v34 = vmul.f32 %v6075_v50, %v2386_v15  ;;  %v2384_v28 = vpop.permute.xlu1 %2383 }
0x1379   :  { %v2407_v58 = vmul.f32 %v6077_v48, %v2384_v28 }
0x137a   :  { %2425 = vrot.lane.b32.xlu0 %v2408_v34, %s5116_s23 }
0x137b   :  { %2423 = vrot.lane.b32.xlu1 %v2407_v58, %s5116_s23  ;;  %v2390_v59 = vpop.permute.xlu0 %2389 }
0x137c   :  { %v2410_v30 = vmul.f32 %v6081_v8, %v2390_v59  ;;  %v2388_v24 = vpop.permute.xlu1 %2387 }
0x137d   :  { %v2409_v38 = vmul.f32 %v6085_v20, %v2388_v24 }
0x137e   :  { %2429 = vrot.lane.b32.xlu0 %v2410_v30, %s5116_s23 }
0x137f   :  { %2427 = vrot.lane.b32.xlu1 %v2409_v38, %s5116_s23  ;;  %v2396_v47 = vpop.permute.xlu0 %2395 }
0x1380   :  { %v2413_v50 = vmul.f32 %v6089_v13, %v2396_v47  ;;  %v2392_v41 = vpop.permute.xlu1 %2391 }
0x1381   :  { %v2411_v48 = vmul.f32 %v6093_v37, %v2392_v41 }
0x1382   :  { %2435 = vrot.lane.b32.xlu0 %v2413_v50, %s5116_s23 }
0x1383   :  { %2431 = vrot.lane.b32.xlu1 %v2411_v48, %s5116_s23  ;;  %v2398_v1 = vpop.permute.xlu0 %2397 }
0x1384   :  { %v2414_v8 = vmul.f32 %v6097_v10, %v2398_v1  ;;  %v2394_v54 = vpop.permute.xlu1 %2393 }
0x1385   :  { %v2412_v20 = vmul.f32 %v6101_v45, %v2394_v54 }
0x1386   :  { %2437 = vrot.lane.b32.xlu0 %v2414_v8, %s5116_s23 }
0x1387   :  { %2433 = vrot.lane.b32.xlu1 %v2412_v20, %s5116_s23 }
0x13ec   :  { %v2426_v51 = vpop.permute.xlu0 %2425 }
0x13ed   :  { %v6166_v13 = vadd.f32 %v6113_v39, %v2426_v51  ;;  %v2424_v4 = vpop.permute.xlu1 %2423 }
0x13ee   :  { %v6169_v37 = vadd.f32 %v6117_v63, %v2424_v4 }
0x13ef   :  { %v2464_v40 = vrot.slane %v6166_v13, 4 }
0x13f0   :  { %v2430_v52 = vpop.permute.xlu0 %2429  ;;  %v2463_v10 = vrot.slane %v6169_v37, 5 }
0x13f1   :  { %v6174_v17 = vadd.f32 %v6122_v57, %v2430_v52  ;;  %v2428_v45 = vpop.permute.xlu1 %2427 }
0x13f2   :  { %v6177_v43 = vadd.f32 %v6125_v26, %v2428_v45  ;;  %v2465_v5 = vsel %vm617_vm3, %v2464_v40, %v2463_v10 }
0x13f3   :  { %v2468_v63 = vrot.slane %v6174_v17, 2 }
0x13f4   :  { %v2466_v33 = vrot.slane %v6177_v43, 3  ;;  %v2436_v39 = vpop.permute.xlu0 %2435 }
0x13f5   :  { %v2432_v23 = vpop.permute.xlu1 %2431  ;;  %v6187_v57 = vadd.f32 %v6131_v35, %v2436_v39 }
0x13f6   :  { %v2467_v9 = vsel %vm620_vm4, %v2466_v33, %v2465_v5  ;;  %v6184_v7 = vadd.f32 %v6135_v18, %v2432_v23 }
0x13f7   :  { %v2469_v25 = vsel %vm623_vm5, %v2468_v63, %v2467_v9  ;;  %v2473_v49 = vrot.slane %v6187_v57, 7 }
0x13f8   :  { %v2470_v14 = vrot.slane %v6184_v7, 1  ;;  %v2438_v26 = vpop.permute.xlu0 %2437 }
0x13f9   :  { %v6191_v2 = vadd.f32 %v4911_v62, %v2438_v26  ;;  %v2434_v36 = vpop.permute.xlu1 %2433 }
0x13fa   :  { %v2471_v11 = vsel %vm626_vm6, %v2470_v14, %v2469_v25  ;;  %v6194_v55 = vadd.f32 %v4913_v46, %v2434_v36 }
0x13fb   :  { %v2475_v18 = vrot.slane %v6191_v2, 6 }
0x13fc   :  { %v2472_v35 = vsel %vm629_vm7, %v6194_v55, %v2471_v11 }
0x13fd   :  { %v2474_v29 = vsel %vm632_vm8, %v2473_v49, %v2472_v35 }
0x13fe   :  { %v2476_v6 = vsel %vm635_vm9, %v2475_v18, %v2474_v29 }
0x13ff   :  { %2477 = vrot.lane.b32.xlu1 %v2476_v6, %s5114_s19 }
0x1471   :  { %v2478_v62 = vpop.permute.xlu1 %2477 }
0x1472   :  { %4285 = vmatmul.mubr.msk.f32.vlgmr.msra.gmra.mrb[12].mxu0 %vm294_vm10, %v2478_v62 }
0x1473   :  { %4306 = vmatprep.mubr.msk.f32.mxu0 %vm5112_vm1, %v5113_v22 }
0x1545   :  { %v2547_v46 = vpop.f32.mrb[12].mxu0 }
0x1546   :  { %v2548_v44 = vadd.f32 %v6056_v32, %v2547_v46  ;;  %v4286_v3 = vpop.f32.mrb[13].mxu0 }
0x1548   :  { %v2553_v42 = vrot.slane %v2548_v44, 3  ;;  %v2552_v56 = vrot.slane %v2548_v44, 2  ;;  %v2555_v53 = vrot.slane %v2548_v44, 5  ;;  %v2554_v15 = vrot.slane %v2548_v44, 4 }
0x1549   :  { %v2557_v34 = vrot.slane %v2548_v44, 7  ;;  %v2556_v28 = vrot.slane %v2548_v44, 6  ;;  %v2558_v58 = vrot.slane %v2548_v44, 1  ;;  %v2573_v4 = vadd.f32 %v2548_v44, %v5349_v31 }
0x154a   :  { %2625 = vrot.lane.b32.xlu1 %v2553_v42, %s5114_s19  ;;  %2623 = vrot.lane.b32.xlu0 %v2552_v56, %s5114_s19  ;;  %v2568_v59 = vadd.f32 %v2553_v42, %v5318_v60  ;;  %v2567_v30 = vadd.f32 %v2552_v56, %v5320_v61  ;;  %v2570_v38 = vadd.f32 %v2555_v53, %v5327_v0 }
0x154b   :  { %v2569_v50 = vadd.f32 %v2554_v15, %v5329_v12  ;;  %v2572_v48 = vadd.f32 %v2557_v34, %v5337_v16  ;;  %v2571_v8 = vadd.f32 %v2556_v28, %v5339_v21  ;;  %v2574_v20 = vadd.f32 %v2558_v58, %v5347_v27 }
0x154c   :  { %v4050_v24 = vmul.f32 -1.442695, %v2568_v59  ;;  %v4049_v47 = vmul.f32 -1.442695, %v2567_v30  ;;  %v4052_v41 = vmul.f32 -1.442695, %v2570_v38 }
0x154d   :  { %v4051_v1 = vmul.f32 -1.442695, %v2569_v50  ;;  %v4054_v54 = vmul.f32 -1.442695, %v2572_v48  ;;  %v4053_v51 = vmul.f32 -1.442695, %v2571_v8 }
0x154e   :  { %2629 = vrot.lane.b32.xlu1 %v2555_v53, %s5114_s19  ;;  %2627 = vrot.lane.b32.xlu0 %v2554_v15, %s5114_s19  ;;  %4914 = vpow2.f32 %v4050_v24  ;;  %v4056_v52 = vmul.f32 -1.442695, %v2574_v20  ;;  %v4055_v40 = vmul.f32 -1.442695, %v2573_v4 }
0x154f   :  { %4916 = vpow2.f32 %v4049_v47 }
0x1550   :  { %4918 = vpow2.f32 %v4052_v41 }
0x1551   :  { %4920 = vpow2.f32 %v4051_v1 }
0x1552   :  { %2633 = vrot.lane.b32.xlu1 %v2557_v34, %s5114_s19  ;;  %2631 = vrot.lane.b32.xlu0 %v2556_v28, %s5114_s19  ;;  %4922 = vpow2.f32 %v4054_v54 }
0x1553   :  { %4924 = vpow2.f32 %v4053_v51 }
0x1554   :  { %4926 = vpow2.f32 %v4056_v52 }
0x1555   :  { %4928 = vpow2.f32 %v4055_v40 }
0x1556   :  { %2635 = vrot.lane.b32.xlu1 %v2548_v44, %s5114_s19  ;;  %2637 = vrot.lane.b32.xlu0 %v2558_v58, %s5114_s19 }
0x1558   :  { %v4915_v10 = vpop.eup %4914 }
0x1559   :  { %v4917_v45 = vpop.eup %4916  ;;  %v2600_v33 = vadd.f32 1.0, %v4915_v10 }
0x155a   :  { %v4919_v39 = vpop.eup %4918  ;;  %v2599_v5 = vadd.f32 1.0, %v4917_v45 }
0x155b   :  { %v4921_v63 = vpop.eup %4920  ;;  %4930 = vrcp.f32 %v2600_v33  ;;  %v2602_v23 = vadd.f32 1.0, %v4919_v39 }
0x155c   :  { %v4923_v9 = vpop.eup %4922  ;;  %4932 = vrcp.f32 %v2599_v5  ;;  %v2601_v14 = vadd.f32 1.0, %v4921_v63 }
0x155d   :  { %v4925_v26 = vpop.eup %4924  ;;  %4934 = vrcp.f32 %v2602_v23  ;;  %v2604_v25 = vadd.f32 1.0, %v4923_v9 }
0x155e   :  { %v4927_v36 = vpop.eup %4926  ;;  %4936 = vrcp.f32 %v2601_v14  ;;  %v2603_v11 = vadd.f32 1.0, %v4925_v26 }
0x155f   :  { %v4929_v49 = vpop.eup %4928  ;;  %4938 = vrcp.f32 %v2604_v25  ;;  %v2606_v18 = vadd.f32 1.0, %v4927_v36 }
0x1560   :  { %4940 = vrcp.f32 %v2603_v11  ;;  %v2605_v35 = vadd.f32 1.0, %v4929_v49 }
0x1561   :  { %4942 = vrcp.f32 %v2606_v18 }
0x1562   :  { %4944 = vrcp.f32 %v2605_v35 }
0x1565   :  { %v6223_v29 = vpop.eup %4930 }
0x1566   :  { %v6225_v6 = vpop.eup %4932 }
0x1567   :  { %v6229_v42 = vpop.eup %4934 }
0x1568   :  { %v6233_v56 = vpop.eup %4936 }
0x1569   :  { %v6237_v58 = vpop.eup %4938 }
0x156a   :  { %v6241_v59 = vpop.eup %4940 }
0x156b   :  { %v6245_v50 = vpop.eup %4942 }
0x156c   :  { %v6249_v41 = vpop.eup %4944 }
0x15bc   :  { %v2626_v62 = vpop.permute.xlu1 %2625  ;;  %v2624_v46 = vpop.permute.xlu0 %2623 }
0x15bd   :  { %v2648_v44 = vmul.f32 %v6223_v29, %v2626_v62  ;;  %v2647_v3 = vmul.f32 %v6225_v6, %v2624_v46 }
0x15bf   :  { %2665 = vrot.lane.b32.xlu1 %v2648_v44, %s5114_s19  ;;  %2663 = vrot.lane.b32.xlu0 %v2647_v3, %s5114_s19 }
0x15c0   :  { %v2630_v53 = vpop.permute.xlu1 %2629  ;;  %v2628_v15 = vpop.permute.xlu0 %2627 }
0x15c1   :  { %v2650_v34 = vmul.f32 %v6229_v42, %v2630_v53  ;;  %v2649_v28 = vmul.f32 %v6233_v56, %v2628_v15 }
0x15c3   :  { %2669 = vrot.lane.b32.xlu1 %v2650_v34, %s5114_s19  ;;  %2667 = vrot.lane.b32.xlu0 %v2649_v28, %s5114_s19 }
0x15c4   :  { %v2634_v30 = vpop.permute.xlu1 %2633  ;;  %v2632_v24 = vpop.permute.xlu0 %2631 }
0x15c5   :  { %v2652_v38 = vmul.f32 %v6237_v58, %v2634_v30  ;;  %v2651_v47 = vmul.f32 %v6241_v59, %v2632_v24 }
0x15c7   :  { %2673 = vrot.lane.b32.xlu1 %v2652_v38, %s5114_s19  ;;  %2671 = vrot.lane.b32.xlu0 %v2651_v47, %s5114_s19 }
0x15c8   :  { %v2636_v48 = vpop.permute.xlu1 %2635  ;;  %v2638_v1 = vpop.permute.xlu0 %2637 }
0x15c9   :  { %v2653_v8 = vmul.f32 %v6249_v41, %v2636_v48  ;;  %v2654_v54 = vmul.f32 %v6245_v50, %v2638_v1 }
0x15cb   :  { %2675 = vrot.lane.b32.xlu1 %v2653_v8, %s5114_s19  ;;  %2677 = vrot.lane.b32.xlu0 %v2654_v54, %s5114_s19 }
0x1631   :  { %v2666_v20 = vpop.permute.xlu1 %2665  ;;  %v2664_v51 = vpop.permute.xlu0 %2663 }
0x1632   :  { %v2688_v4 = vadd.f32 %v2666_v20, %v5318_v60  ;;  %v2687_v52 = vadd.f32 %v2664_v51, %v5320_v61 }
0x1634   :  { %4946 = vtanh.f32 %v2688_v4 }
0x1635   :  { %4948 = vtanh.f32 %v2687_v52  ;;  %v2670_v40 = vpop.permute.xlu1 %2669  ;;  %v2668_v10 = vpop.permute.xlu0 %2667 }
0x1636   :  { %v2690_v45 = vadd.f32 %v2670_v40, %v5327_v0  ;;  %v2689_v33 = vadd.f32 %v2668_v10, %v5329_v12 }
0x1638   :  { %4950 = vtanh.f32 %v2690_v45 }
0x1639   :  { %4952 = vtanh.f32 %v2689_v33  ;;  %v2674_v39 = vpop.permute.xlu1 %2673  ;;  %v2672_v5 = vpop.permute.xlu0 %2671 }
0x163a   :  { %v2692_v63 = vadd.f32 %v2674_v39, %v5337_v16  ;;  %v2691_v23 = vadd.f32 %v2672_v5, %v5339_v21 }
0x163c   :  { %4954 = vtanh.f32 %v2692_v63 }
0x163d   :  { %4956 = vtanh.f32 %v2691_v23  ;;  %v2676_v9 = vpop.permute.xlu1 %2675  ;;  %v2678_v14 = vpop.permute.xlu0 %2677 }
0x163e   :  { %v6261_v26 = vpop.eup %4946  ;;  %v2693_v25 = vadd.f32 %v2676_v9, %v5349_v31  ;;  %v2694_v36 = vadd.f32 %v2678_v14, %v5347_v27 }
0x163f   :  { %v6265_v11 = vpop.eup %4948  ;;  %v2712_v49 = vrot.slane %v6261_v26, 1 }
0x1640   :  { %4958 = vtanh.f32 %v2693_v25  ;;  %v2711_v18 = vrot.slane %v6265_v11, 1 }
0x1641   :  { %4960 = vtanh.f32 %v2694_v36  ;;  %v2728_v35 = vsub.f32 %v6166_v13, %v2712_v49 }
0x1642   :  { %v6270_v62 = vpop.eup %4950  ;;  %v2727_v46 = vsub.f32 %v6169_v37, %v2711_v18 }
0x1643   :  { %v6273_v44 = vpop.eup %4952  ;;  %v2744_v3 = vrot.slane %v2728_v35, 7  ;;  %v2714_v53 = vrot.slane %v6270_v62, 1 }
0x1644   :  { %v2743_v15 = vrot.slane %v2727_v46, 7  ;;  %v2713_v34 = vrot.slane %v6273_v44, 1 }
0x1645   :  { %2753 = vrot.lane.b32.xlu1 %v2744_v3, %s5115_s22  ;;  %v2730_v28 = vsub.f32 %v6174_v17, %v2714_v53 }
0x1646   :  { %v6279_v30 = vpop.eup %4954  ;;  %2751 = vrot.lane.b32.xlu0 %v2743_v15, %s5115_s22  ;;  %v2729_v13 = vsub.f32 %v6177_v43, %v2713_v34 }
0x1647   :  { %v6283_v24 = vpop.eup %4956  ;;  %v2746_v37 = vrot.slane %v2730_v28, 7  ;;  %v2716_v38 = vrot.slane %v6279_v30, 1 }
0x1648   :  { %v2745_v47 = vrot.slane %v2729_v13, 7  ;;  %v2715_v48 = vrot.slane %v6283_v24, 1 }
0x1649   :  { %2757 = vrot.lane.b32.xlu1 %v2746_v37, %s5115_s22  ;;  %v2732_v1 = vsub.f32 %v6194_v55, %v2716_v38 }
0x164a   :  { %v6289_v8 = vpop.eup %4958  ;;  %2755 = vrot.lane.b32.xlu0 %v2745_v47, %s5115_s22  ;;  %v2731_v17 = vsub.f32 %v6184_v7, %v2715_v48 }
0x164b   :  { %v6293_v54 = vpop.eup %4960  ;;  %v2748_v43 = vrot.slane %v2732_v1, 7  ;;  %v2717_v20 = vrot.slane %v6289_v8, 1 }
0x164c   :  { %v2747_v51 = vrot.slane %v2731_v17, 7  ;;  %v2718_v4 = vrot.slane %v6293_v54, 1 }
0x164d   :  { %2761 = vrot.lane.b32.xlu1 %v2748_v43, %s5115_s22  ;;  %v2733_v52 = vsub.f32 %v6187_v57, %v2717_v20 }
0x164e   :  { %2759 = vrot.lane.b32.xlu0 %v2747_v51, %s5115_s22  ;;  %v2734_v55 = vsub.f32 %v6191_v2, %v2718_v4 }
0x164f   :  { %v2749_v40 = vrot.slane %v2733_v52, 7 }
0x1650   :  { %v2750_v10 = vrot.slane %v2734_v55, 7 }
0x1651   :  { %2763 = vrot.lane.b32.xlu1 %v2749_v40, %s5115_s22 }
0x1652   :  { %2765 = vrot.lane.b32.xlu0 %v2750_v10, %s5115_s22 }
0x16b7   :  { %v2754_v7 = vpop.permute.xlu1 %2753 }
0x16b8   :  { %v2776_v45 = vmul.f32 %v6223_v29, %v2754_v7  ;;  %v2752_v33 = vpop.permute.xlu0 %2751 }
0x16b9   :  { %v2775_v39 = vmul.f32 %v6225_v6, %v2752_v33 }
0x16ba   :  { %2793 = vrot.lane.b32.xlu1 %v2776_v45, %s5116_s23 }
0x16bb   :  { %2791 = vrot.lane.b32.xlu0 %v2775_v39, %s5116_s23  ;;  %v2758_v57 = vpop.permute.xlu1 %2757 }
0x16bc   :  { %v2778_v5 = vmul.f32 %v6229_v42, %v2758_v57  ;;  %v2756_v2 = vpop.permute.xlu0 %2755 }
0x16bd   :  { %v2777_v63 = vmul.f32 %v6233_v56, %v2756_v2 }
0x16be   :  { %2797 = vrot.lane.b32.xlu1 %v2778_v5, %s5116_s23 }
0x16bf   :  { %2795 = vrot.lane.b32.xlu0 %v2777_v63, %s5116_s23  ;;  %v2762_v23 = vpop.permute.xlu1 %2761 }
0x16c0   :  { %v2780_v29 = vmul.f32 %v6237_v58, %v2762_v23  ;;  %v2760_v9 = vpop.permute.xlu0 %2759 }
0x16c1   :  { %v2779_v6 = vmul.f32 %v6241_v59, %v2760_v9 }
0x16c2   :  { %2801 = vrot.lane.b32.xlu1 %v2780_v29, %s5116_s23 }
0x16c3   :  { %2799 = vrot.lane.b32.xlu0 %v2779_v6, %s5116_s23  ;;  %v2764_v14 = vpop.permute.xlu1 %2763 }
0x16c4   :  { %v2781_v42 = vmul.f32 %v6249_v41, %v2764_v14  ;;  %v2766_v25 = vpop.permute.xlu0 %2765 }
0x16c5   :  { %v2782_v56 = vmul.f32 %v6245_v50, %v2766_v25 }
0x16c6   :  { %2803 = vrot.lane.b32.xlu1 %v2781_v42, %s5116_s23 }
0x16c7   :  { %2805 = vrot.lane.b32.xlu0 %v2782_v56, %s5116_s23 }
0x172c   :  { %v2794_v36 = vpop.permute.xlu1 %2793 }
0x172d   :  { %v6320_v58 = vadd.f32 %v6261_v26, %v2794_v36  ;;  %v2792_v49 = vpop.permute.xlu0 %2791 }
0x172e   :  { %v6323_v59 = vadd.f32 %v6265_v11, %v2792_v49 }
0x172f   :  { %v2832_v35 = vrot.slane %v6320_v58, 5 }
0x1730   :  { %v2798_v18 = vpop.permute.xlu1 %2797  ;;  %v2831_v41 = vrot.slane %v6323_v59, 6 }
0x1731   :  { %v6328_v46 = vadd.f32 %v6270_v62, %v2798_v18  ;;  %v2796_v50 = vpop.permute.xlu0 %2795 }
0x1732   :  { %v6331_v3 = vadd.f32 %v6273_v44, %v2796_v50  ;;  %v2833_v15 = vsel %vm617_vm3, %v2832_v35, %v2831_v41 }
0x1733   :  { %v2836_v11 = vrot.slane %v6328_v46, 3 }
0x1734   :  { %v2834_v53 = vrot.slane %v6331_v3, 4  ;;  %v2802_v26 = vpop.permute.xlu1 %2801 }
0x1735   :  { %v6337_v34 = vadd.f32 %v6279_v30, %v2802_v26  ;;  %v2800_v28 = vpop.permute.xlu0 %2799 }
0x1736   :  { %v2835_v13 = vsel %vm620_vm4, %v2834_v53, %v2833_v15  ;;  %v6341_v62 = vadd.f32 %v6283_v24, %v2800_v28 }
0x1737   :  { %v2840_v37 = vrot.slane %v6337_v34, 1  ;;  %v2837_v47 = vsel %vm623_vm5, %v2836_v11, %v2835_v13 }
0x1738   :  { %v2838_v44 = vrot.slane %v6341_v62, 2  ;;  %v2804_v38 = vpop.permute.xlu1 %2803 }
0x1739   :  { %v6347_v48 = vadd.f32 %v6289_v8, %v2804_v38  ;;  %v2806_v1 = vpop.permute.xlu0 %2805 }
0x173a   :  { %v2839_v30 = vsel %vm626_vm6, %v2838_v44, %v2837_v47  ;;  %v6351_v17 = vadd.f32 %v6293_v54, %v2806_v1 }
0x173b   :  { %v2841_v43 = vsel %vm629_vm7, %v2840_v37, %v2839_v30 }
0x173c   :  { %v2842_v24 = vsel %vm632_vm8, %v6347_v48, %v2841_v43  ;;  %v2843_v20 = vrot.slane %v6351_v17, 7 }
0x173e   :  { %v2844_v51 = vsel %vm635_vm9, %v2843_v20, %v2842_v24 }
0x173f   :  { %2845 = vrot.lane.b32.xlu0 %v2844_v51, %s5114_s19 }
0x17b1   :  { %v2846_v4 = vpop.permute.xlu0 %2845 }
0x17b2   :  { %4296 = vmatmul.mubr.msk.f32.vlgmr.msra.gmra.mrb[8].mxu1 %vm294_vm10, %v2846_v4 }
0x17b3   :  { %4341 = vmatprep.mubr.msk.f32.mxu1 %vm5112_vm1, %v5113_v22 }
0x1885   :  { %v2915_v8 = vpop.f32.mrb[8].mxu1 }
0x1886   :  { %v2916_v54 = vadd.f32 %v6056_v32, %v2915_v8  ;;  %v4297_v52 = vpop.f32.mrb[9].mxu1 }
0x1888   :  { %v2922_v55 = vrot.slane %v2916_v54, 3  ;;  %v2921_v40 = vrot.slane %v2916_v54, 2  ;;  %v2924_v10 = vrot.slane %v2916_v54, 5  ;;  %v2923_v7 = vrot.slane %v2916_v54, 4 }
0x1889   :  { %v2926_v45 = vrot.slane %v2916_v54, 7  ;;  %v2925_v33 = vrot.slane %v2916_v54, 6  ;;  %v2920_v32 = vrot.slane %v2916_v54, 1  ;;  %v2942_v36 = vadd.f32 %v2916_v54, %v5347_v27 }
0x188a   :  { %2995 = vrot.lane.b32.xlu0 %v2922_v55, %s5114_s19  ;;  %2993 = vrot.lane.b32.xlu1 %v2921_v40, %s5114_s19  ;;  %v2937_v39 = vadd.f32 %v2922_v55, %v5329_v12  ;;  %v2936_v57 = vadd.f32 %v2921_v40, %v5318_v60  ;;  %v2939_v2 = vadd.f32 %v2924_v10, %v5339_v21 }
0x188b   :  { %v2938_v23 = vadd.f32 %v2923_v7, %v5327_v0  ;;  %v2941_v9 = vadd.f32 %v2926_v45, %v5349_v31  ;;  %v2940_v14 = vadd.f32 %v2925_v33, %v5337_v16  ;;  %v2935_v25 = vadd.f32 %v2920_v32, %v5320_v61 }
0x188c   :  { %v4060_v5 = vmul.f32 -1.442695, %v2937_v39  ;;  %v4059_v63 = vmul.f32 -1.442695, %v2936_v57  ;;  %v4062_v29 = vmul.f32 -1.442695, %v2939_v2 }
0x188d   :  { %v4061_v6 = vmul.f32 -1.442695, %v2938_v23  ;;  %v4064_v42 = vmul.f32 -1.442695, %v2941_v9  ;;  %v4063_v56 = vmul.f32 -1.442695, %v2940_v14 }
0x188e   :  { %2999 = vrot.lane.b32.xlu0 %v2924_v10, %s5114_s19  ;;  %2997 = vrot.lane.b32.xlu1 %v2923_v7, %s5114_s19  ;;  %4962 = vpow2.f32 %v4060_v5  ;;  %v4058_v49 = vmul.f32 -1.442695, %v2935_v25  ;;  %v4065_v18 = vmul.f32 -1.442695, %v2942_v36 }
0x188f   :  { %4964 = vpow2.f32 %v4059_v63 }
0x1890   :  { %4966 = vpow2.f32 %v4062_v29 }
0x1891   :  { %4968 = vpow2.f32 %v4061_v6 }
0x1892   :  { %3003 = vrot.lane.b32.xlu0 %v2926_v45, %s5114_s19  ;;  %3001 = vrot.lane.b32.xlu1 %v2925_v33, %s5114_s19  ;;  %4970 = vpow2.f32 %v4064_v42 }
0x1893   :  { %4972 = vpow2.f32 %v4063_v56 }
0x1894   :  { %4974 = vpow2.f32 %v4058_v49 }
0x1895   :  { %4976 = vpow2.f32 %v4065_v18 }
0x1896   :  { %3005 = vrot.lane.b32.xlu1 %v2916_v54, %s5114_s19  ;;  %2991 = vrot.lane.b32.xlu0 %v2920_v32, %s5114_s19 }
0x1898   :  { %v4963_v35 = vpop.eup %4962 }
0x1899   :  { %v4965_v41 = vpop.eup %4964  ;;  %v2969_v50 = vadd.f32 1.0, %v4963_v35 }
0x189a   :  { %v4967_v53 = vpop.eup %4966  ;;  %v2968_v26 = vadd.f32 1.0, %v4965_v41 }
0x189b   :  { %v4969_v15 = vpop.eup %4968  ;;  %4978 = vrcp.f32 %v2969_v50  ;;  %v2971_v11 = vadd.f32 1.0, %v4967_v53 }
0x189c   :  { %v4971_v28 = vpop.eup %4970  ;;  %4980 = vrcp.f32 %v2968_v26  ;;  %v2970_v13 = vadd.f32 1.0, %v4969_v15 }
0x189d   :  { %v4973_v37 = vpop.eup %4972  ;;  %4982 = vrcp.f32 %v2971_v11  ;;  %v2973_v44 = vadd.f32 1.0, %v4971_v28 }
0x189e   :  { %v4975_v38 = vpop.eup %4974  ;;  %4984 = vrcp.f32 %v2970_v13  ;;  %v2972_v47 = vadd.f32 1.0, %v4973_v37 }
0x189f   :  { %v4977_v1 = vpop.eup %4976  ;;  %4986 = vrcp.f32 %v2973_v44  ;;  %v2967_v30 = vadd.f32 1.0, %v4975_v38 }
0x18a0   :  { %4988 = vrcp.f32 %v2972_v47  ;;  %v2974_v43 = vadd.f32 1.0, %v4977_v1 }
0x18a1   :  { %4990 = vrcp.f32 %v2967_v30 }
0x18a2   :  { %4992 = vrcp.f32 %v2974_v43 }
0x18a5   :  { %v6379_v24 = vpop.eup %4978 }
0x18a6   :  { %v6381_v20 = vpop.eup %4980 }
0x18a7   :  { %v6385_v52 = vpop.eup %4982 }
0x18a8   :  { %v6389_v55 = vpop.eup %4984 }
0x18a9   :  { %v6393_v33 = vpop.eup %4986 }
0x18aa   :  { %v6397_v32 = vpop.eup %4988 }
0x18ab   :  { %v6401_v63 = vpop.eup %4990 }
0x18ac   :  { %v6405_v23 = vpop.eup %4992 }
0x18fc   :  { %v2996_v51 = vpop.permute.xlu0 %2995  ;;  %v2994_v4 = vpop.permute.xlu1 %2993 }
0x18fd   :  { %v3017_v8 = vmul.f32 %v6379_v24, %v2996_v51  ;;  %v3016_v54 = vmul.f32 %v6381_v20, %v2994_v4 }
0x18ff   :  { %3033 = vrot.lane.b32.xlu1 %v3016_v54, %s5114_s19  ;;  %3035 = vrot.lane.b32.xlu0 %v3017_v8, %s5114_s19 }
0x1900   :  { %v3000_v40 = vpop.permute.xlu0 %2999  ;;  %v2998_v10 = vpop.permute.xlu1 %2997 }
0x1901   :  { %v3019_v7 = vmul.f32 %v6385_v52, %v3000_v40  ;;  %v3018_v45 = vmul.f32 %v6389_v55, %v2998_v10 }
0x1903   :  { %3037 = vrot.lane.b32.xlu1 %v3018_v45, %s5114_s19  ;;  %3039 = vrot.lane.b32.xlu0 %v3019_v7, %s5114_s19 }
0x1904   :  { %v3004_v39 = vpop.permute.xlu0 %3003  ;;  %v3002_v57 = vpop.permute.xlu1 %3001 }
0x1905   :  { %v3021_v5 = vmul.f32 %v6393_v33, %v3004_v39  ;;  %v3020_v2 = vmul.f32 %v6397_v32, %v3002_v57 }
0x1907   :  { %3041 = vrot.lane.b32.xlu1 %v3020_v2, %s5114_s19  ;;  %3043 = vrot.lane.b32.xlu0 %v3021_v5, %s5114_s19 }
0x1908   :  { %v3006_v29 = vpop.permute.xlu1 %3005  ;;  %v2992_v9 = vpop.permute.xlu0 %2991 }
0x1909   :  { %v3022_v6 = vmul.f32 %v6405_v23, %v3006_v29  ;;  %v3015_v14 = vmul.f32 %v6401_v63, %v2992_v9 }
0x190b   :  { %3045 = vrot.lane.b32.xlu1 %v3022_v6, %s5114_s19  ;;  %3031 = vrot.lane.b32.xlu0 %v3015_v14, %s5114_s19 }
0x1971   :  { %v3034_v42 = vpop.permute.xlu1 %3033  ;;  %v3036_v25 = vpop.permute.xlu0 %3035 }
0x1972   :  { %v3056_v56 = vadd.f32 %v3034_v42, %v5318_v60  ;;  %v3057_v36 = vadd.f32 %v3036_v25, %v5329_v12 }
0x1974   :  { %4994 = vtanh.f32 %v3056_v56 }
0x1975   :  { %4996 = vtanh.f32 %v3057_v36  ;;  %v3038_v49 = vpop.permute.xlu1 %3037  ;;  %v3040_v18 = vpop.permute.xlu0 %3039 }
0x1976   :  { %v3058_v35 = vadd.f32 %v3038_v49, %v5327_v0  ;;  %v3059_v41 = vadd.f32 %v3040_v18, %v5339_v21 }
0x1978   :  { %4998 = vtanh.f32 %v3058_v35 }
0x1979   :  { %5000 = vtanh.f32 %v3059_v41  ;;  %v3042_v50 = vpop.permute.xlu1 %3041  ;;  %v3044_v53 = vpop.permute.xlu0 %3043 }
0x197a   :  { %v3060_v26 = vadd.f32 %v3042_v50, %v5337_v16  ;;  %v3061_v15 = vadd.f32 %v3044_v53, %v5349_v31 }
0x197c   :  { %5002 = vtanh.f32 %v3060_v26 }
0x197d   :  { %5004 = vtanh.f32 %v3061_v15  ;;  %v3046_v60 = vpop.permute.xlu1 %3045  ;;  %v3032_v12 = vpop.permute.xlu0 %3031 }
0x197e   :  { %v6417_v11 = vpop.eup %4994  ;;  %v3062_v28 = vadd.f32 %v3046_v60, %v5347_v27  ;;  %v3055_v0 = vadd.f32 %v3032_v12, %v5320_v61 }
0x197f   :  { %v6421_v13 = vpop.eup %4996  ;;  %v3080_v21 = vrot.slane %v6417_v11, 1 }
0x1980   :  { %5006 = vtanh.f32 %v3062_v28  ;;  %v3081_v37 = vrot.slane %v6421_v13, 1 }
0x1981   :  { %5008 = vtanh.f32 %v3055_v0  ;;  %v3096_v16 = vsub.f32 %v6320_v58, %v3080_v21 }
0x1982   :  { %v6426_v31 = vpop.eup %4998  ;;  %v3097_v44 = vsub.f32 %v6331_v3, %v3081_v37 }
0x1983   :  { %v6429_v38 = vpop.eup %5000  ;;  %v3112_v47 = vrot.slane %v3096_v16, 7  ;;  %v3082_v27 = vrot.slane %v6426_v31, 1 }
0x1984   :  { %v3113_v61 = vrot.slane %v3097_v44, 7  ;;  %v3083_v1 = vrot.slane %v6429_v38, 1 }
0x1985   :  { %3121 = vrot.lane.b32.xlu1 %v3112_v47, %s5115_s22  ;;  %v3098_v30 = vsub.f32 %v6328_v46, %v3082_v27 }
0x1986   :  { %v6435_v43 = vpop.eup %5002  ;;  %3123 = vrot.lane.b32.xlu0 %v3113_v61, %s5115_s22  ;;  %v3099_v58 = vsub.f32 %v6341_v62, %v3083_v1 }
0x1987   :  { %v6439_v51 = vpop.eup %5004  ;;  %v3114_v3 = vrot.slane %v3098_v30, 7  ;;  %v3084_v4 = vrot.slane %v6435_v43, 1 }
0x1988   :  { %v3115_v8 = vrot.slane %v3099_v58, 7  ;;  %v3085_v54 = vrot.slane %v6439_v51, 1 }
0x1989   :  { %3125 = vrot.lane.b32.xlu1 %v3114_v3, %s5115_s22  ;;  %v3100_v40 = vsub.f32 %v6337_v34, %v3084_v4 }
0x198a   :  { %v6445_v10 = vpop.eup %5006  ;;  %3127 = vrot.lane.b32.xlu0 %v3115_v8, %s5115_s22  ;;  %v3101_v46 = vsub.f32 %v6347_v48, %v3085_v54 }
0x198b   :  { %v5009_v7 = vpop.eup %5008  ;;  %v3116_v62 = vrot.slane %v3100_v40, 7  ;;  %v3086_v45 = vrot.slane %v6445_v10, 1 }
0x198c   :  { %v3117_v39 = vrot.slane %v3101_v46, 7  ;;  %v3079_v57 = vrot.slane %v5009_v7, 1 }
0x198d   :  { %3129 = vrot.lane.b32.xlu1 %v3116_v62, %s5115_s22  ;;  %v3102_v5 = vsub.f32 %v6351_v17, %v3086_v45 }
0x198e   :  { %3131 = vrot.lane.b32.xlu0 %v3117_v39, %s5115_s22  ;;  %v3095_v34 = vsub.f32 %v6323_v59, %v3079_v57 }
0x198f   :  { %v3118_v2 = vrot.slane %v3102_v5, 7 }
0x1990   :  { %v3111_v29 = vrot.slane %v3095_v34, 7 }
0x1991   :  { %3133 = vrot.lane.b32.xlu1 %v3118_v2, %s5115_s22 }
0x1992   :  { %3119 = vrot.lane.b32.xlu0 %v3111_v29, %s5115_s22 }
0x19f7   :  { %v3122_v48 = vpop.permute.xlu1 %3121 }
0x19f8   :  { %v3144_v9 = vmul.f32 %v6381_v20, %v3122_v48  ;;  %v3124_v6 = vpop.permute.xlu0 %3123 }
0x19f9   :  { %v3145_v14 = vmul.f32 %v6379_v24, %v3124_v6 }
0x19fa   :  { %3161 = vrot.lane.b32.xlu1 %v3144_v9, %s5116_s23 }
0x19fb   :  { %3163 = vrot.lane.b32.xlu0 %v3145_v14, %s5116_s23  ;;  %v3126_v17 = vpop.permute.xlu1 %3125 }
0x19fc   :  { %v3146_v42 = vmul.f32 %v6389_v55, %v3126_v17  ;;  %v3128_v59 = vpop.permute.xlu0 %3127 }
0x19fd   :  { %v3147_v25 = vmul.f32 %v6385_v52, %v3128_v59 }
0x19fe   :  { %3165 = vrot.lane.b32.xlu1 %v3146_v42, %s5116_s23 }
0x19ff   :  { %3167 = vrot.lane.b32.xlu0 %v3147_v25, %s5116_s23  ;;  %v3130_v56 = vpop.permute.xlu1 %3129 }
0x1a00   :  { %v3148_v20 = vmul.f32 %v6397_v32, %v3130_v56  ;;  %v3132_v36 = vpop.permute.xlu0 %3131 }
0x1a01   :  { %v3149_v24 = vmul.f32 %v6393_v33, %v3132_v36 }
0x1a02   :  { %3169 = vrot.lane.b32.xlu1 %v3148_v20, %s5116_s23 }
0x1a03   :  { %3171 = vrot.lane.b32.xlu0 %v3149_v24, %s5116_s23  ;;  %v3134_v49 = vpop.permute.xlu1 %3133 }
0x1a04   :  { %v3150_v55 = vmul.f32 %v6405_v23, %v3134_v49  ;;  %v3120_v18 = vpop.permute.xlu0 %3119 }
0x1a05   :  { %v3143_v52 = vmul.f32 %v6401_v63, %v3120_v18 }
0x1a06   :  { %3173 = vrot.lane.b32.xlu1 %v3150_v55, %s5116_s23 }
0x1a07   :  { %3159 = vrot.lane.b32.xlu0 %v3143_v52, %s5116_s23 }
0x1a6c   :  { %v3162_v35 = vpop.permute.xlu1 %3161 }
0x1a6d   :  { %v3184_v32 = vadd.f32 %v6417_v11, %v3162_v35  ;;  %v3164_v41 = vpop.permute.xlu0 %3163 }
0x1a6e   :  { %v3185_v33 = vadd.f32 %v6421_v13, %v3164_v41 }
0x1a6f   :  { %v3199_v50 = vrot.slane %v3184_v32, 7 }
0x1a70   :  { %v3200_v53 = vrot.slane %v3185_v33, 6  ;;  %v3166_v26 = vpop.permute.xlu1 %3165 }
0x1a71   :  { %v3186_v15 = vadd.f32 %v6426_v31, %v3166_v26  ;;  %v3168_v60 = vpop.permute.xlu0 %3167 }
0x1a72   :  { %v3187_v23 = vadd.f32 %v6429_v38, %v3168_v60  ;;  %v3201_v63 = vsel %vm617_vm3, %v3200_v53, %v3199_v50 }
0x1a73   :  { %v3202_v12 = vrot.slane %v3186_v15, 5 }
0x1a74   :  { %v3204_v28 = vrot.slane %v3187_v23, 4  ;;  %v3170_v0 = vpop.permute.xlu1 %3169 }
0x1a75   :  { %v3203_v21 = vsel %vm620_vm4, %v3202_v12, %v3201_v63  ;;  %v3188_v11 = vadd.f32 %v6435_v43, %v3170_v0  ;;  %v3172_v37 = vpop.permute.xlu0 %3171 }
0x1a76   :  { %v3189_v13 = vadd.f32 %v6439_v51, %v3172_v37  ;;  %v3205_v44 = vsel %vm623_vm5, %v3204_v28, %v3203_v21  ;;  %v4067_v37 = vld [vmem:[%s6662_s1 + $0x1] ss:$0 sm:$0xff] }
0x1a77   :  { %v3206_v16 = vrot.slane %v3188_v11, 3 }
0x1a78   :  { %v3208_v47 = vrot.slane %v3189_v13, 2  ;;  %v3174_v31 = vpop.permute.xlu1 %3173 }
0x1a79   :  { %v3207_v27 = vsel %vm626_vm6, %v3206_v16, %v3205_v44  ;;  %v3190_v38 = vadd.f32 %v6445_v10, %v3174_v31  ;;  %v3160_v61 = vpop.permute.xlu0 %3159 }
0x1a7a   :  { %v3183_v1 = vadd.f32 %v5009_v7, %v3160_v61  ;;  %v3209_v58 = vsel %vm629_vm7, %v3208_v47, %v3207_v27 }
0x1a7b   :  { %v3210_v30 = vrot.slane %v3190_v38, 1 }
0x1a7c   :  { %3212 = vrot.lane.b32.xlu0 %v3183_v1, %s5114_s19 }
0x1a7d   :  { %v3211_v43 = vsel %vm632_vm8, %v3210_v30, %v3209_v58  ;;  %v3367_v30 = vld [vmem:[#allocation2 + $0x30] sm:$0xff]  ;;  %v3368_v58 = vld [vmem:[#allocation2 + $0x38] sm:$0xff] }
0x1a7e   :  { %3214 = vrot.lane.b32.xlu1 %v3211_v43, %s5114_s19 }
0x1aee   :  { %v3213_v51 = vpop.permute.xlu0 %3212 }
0x1aef   :  { %3219 = vst.msk [vmem:[#allocation6 - $0x7] sm:$0x80] %vm3218_vm11, %v3213_v51  ;;  %v3224_v3 = vsel %vm3218_vm11, %v3213_v51, 0.0 }
0x1af0   :  { %3225 = vadd.xlane.f32.xlu0 %v3224_v3  ;;  %v3215_v4 = vpop.permute.xlu1 %3214  ;;  %v3369_v3 = vld [vmem:[#allocation2 + $0x40] sm:$0xff] }
0x1af1   :  { %3221 = vst.msk [vmem:[#allocation6 + $0x1] sm:$0x7f] %vm3220_vm12, %v3215_v4  ;;  %v3227_v8 = vsel %vm3220_vm12, %v3215_v4, 0.0 }
0x1af2   :  { %3228 = vadd.xlane.f32.xlu1 %v3227_v8 }
0x1b7d   :  { %v3226_v54 = vpop.xlane.xlu0 %3225 }
0x1b7e   :  { %v3231_v40 = vmul.f32 0.03125, %v3226_v54  ;;  %v4501_v54 = vpack.c.bf16 %v3369_v3, %v3368_v58  ;;  %v3487_v3 = vld [vmem:[#allocation2 + $0x48] sm:$0xff] }
0x1b7f   :  { %v3229_v10 = vpop.xlane.xlu1 %3228 }
0x1b80   :  { %v3250_v46 = vsub.f32 %v3183_v1, %v3231_v40  ;;  %v3232_v7 = vmul.f32 0.03125, %v3229_v10  ;;  %v3366_v1 = vld [vmem:[#allocation2 + $0x28] sm:$0xff] }
0x1b81   :  { %v4498_v51 = vpack.c.bf16 %v3367_v30, %v3366_v1 }
0x1b82   :  { %v3258_v62 = vmul.f32 %v3250_v46, %v3250_v46  ;;  %v3235_v45 = vrot.slane %v3232_v7, 1  ;;  %v3236_v39 = vrot.slane %v3232_v7, 2  ;;  %v3237_v57 = vrot.slane %v3232_v7, 3 }
0x1b83   :  { %v3238_v5 = vrot.slane %v3232_v7, 4  ;;  %v3239_v34 = vrot.slane %v3232_v7, 5  ;;  %v3240_v2 = vrot.slane %v3232_v7, 6  ;;  %v3241_v29 = vrot.slane %v3232_v7, 7  ;;  %4499 = vmatpush3.bf16.msra.mxu0 %v4498_v51 }
0x1b84   :  { %3287 = vrot.lane.b32.xlu1 %v3258_v62, %s5114_s19  ;;  %v6492_v48 = vsub.f32 %v3184_v32, %v3235_v45  ;;  %v6494_v9 = vsub.f32 %v3185_v33, %v3236_v39  ;;  %v6496_v6 = vsub.f32 %v3186_v15, %v3237_v57  ;;  %4500 = vmatprep.subr.bf16.mxu0 %v5111_v19 }
0x1b85   :  { %v6498_v14 = vsub.f32 %v3187_v23, %v3238_v5  ;;  %v6500_v17 = vsub.f32 %v3188_v11, %v3239_v34  ;;  %v6502_v42 = vsub.f32 %v3189_v13, %v3240_v2  ;;  %v6504_v59 = vsub.f32 %v3190_v38, %v3241_v29  ;;  %v4066_v11 = vld [vmem:[%s6662_s1] ss:$0 sm:$0xff] }
0x1b86   :  { %v3259_v25 = vmul.f32 %v6492_v48, %v6492_v48  ;;  %v3260_v56 = vmul.f32 %v6494_v9, %v6494_v9  ;;  %v3261_v20 = vmul.f32 %v6496_v6, %v6496_v6 }
0x1b87   :  { %v3262_v36 = vmul.f32 %v6498_v14, %v6498_v14  ;;  %v3263_v24 = vmul.f32 %v6500_v17, %v6500_v17  ;;  %v3264_v49 = vmul.f32 %v6502_v42, %v6502_v42  ;;  %v3265_v35 = vmul.f32 %v6504_v59, %v6504_v59  ;;  %4502 = vmatpush3.bf16.msra.mxu0 %v4501_v54  ;;  %v3489_v54 = vld [vmem:[#allocation2 + $0x58] sm:$0xff] }
0x1b88   :  { %v3274_v55 = vrot.slane %v3259_v25, 7  ;;  %v3275_v18 = vrot.slane %v3260_v56, 6  ;;  %v3277_v52 = vrot.slane %v3261_v20, 5  ;;  %4527 = vmatprep.subr.bf16.mxu0 %v5111_v19 }
0x1b89   :  { %v3279_v41 = vrot.slane %v3262_v36, 4  ;;  %v3281_v50 = vrot.slane %v3263_v24, 3  ;;  %v3283_v26 = vrot.slane %v3264_v49, 2  ;;  %v3285_v60 = vrot.slane %v3265_v35, 1 }
0x1b8a   :  { %v3276_v32 = vsel %vm617_vm3, %v3275_v18, %v3274_v55 }
0x1b8b   :  { %v3278_v33 = vsel %vm620_vm4, %v3277_v52, %v3276_v32 }
0x1b8c   :  { %v3280_v53 = vsel %vm623_vm5, %v3279_v41, %v3278_v33 }
0x1b8d   :  { %v3282_v15 = vsel %vm626_vm6, %v3281_v50, %v3280_v53 }
0x1b8e   :  { %v3284_v23 = vsel %vm629_vm7, %v3283_v26, %v3282_v15 }
0x1b8f   :  { %v3286_v12 = vsel %vm632_vm8, %v3285_v60, %v3284_v23 }
0x1b90   :  { %3289 = vrot.lane.b32.xlu0 %v3286_v12, %s5114_s19 }
0x1bf6   :  { %v3288_v63 = vpop.permute.xlu1 %3287 }
0x1bf7   :  { %v3293_v28 = vsel %vm3218_vm11, %v3288_v63, 0.0 }
0x1bf8   :  { %3294 = vadd.xlane.f32.xlu0 %v3293_v28 }
0x1c02   :  { %v3290_v0 = vpop.permute.xlu0 %3289 }
0x1c03   :  { %v3296_v21 = vsel %vm3220_vm12, %v3290_v0, 0.0 }
0x1c04   :  { %3297 = vadd.xlane.f32.xlu1 %v3296_v21 }
0x1c0e   :  { %3335 = vrot.lane.b32.xlu0 %v4066_v11, %s5114_s19 }
0x1c15   :  { %3351 = vrot.lane.b32.xlu1 %v4067_v37, %s5114_s19 }
0x1c85   :  { %v3295_v13 = vpop.xlane.xlu0 %3294 }
0x1c86   :  { %v3299_v16 = vmul.f32 0.03125, %v3295_v13 }
0x1c88   :  { %v3301_v44 = vadd.f32 1e-05, %v3299_v16 }
0x1c89   :  { %v3336_v61 = vpop.permute.xlu0 %3335 }
0x1c8a   :  { %5010 = vrsqrt.f32 %v3301_v44 }
0x1c91   :  { %v3298_v47 = vpop.xlane.xlu1 %3297 }
0x1c92   :  { %v3300_v31 = vmul.f32 0.03125, %v3298_v47 }
0x1c94   :  { %v5011_v27 = vpop.eup %5010  ;;  %v3302_v38 = vadd.f32 1e-05, %v3300_v31 }
0x1c95   :  { %v3322_v43 = vmul.f32 %v5011_v27, %v3250_v46  ;;  %v3352_v4 = vpop.permute.xlu1 %3351 }
0x1c96   :  { %5012 = vrsqrt.f32 %v3302_v38 }
0x1c97   :  { %v3338_v8 = vmul.f32 %v3336_v61, %v3322_v43 }
0x1c99   :  { %v3354_v40 = vadd.f32 %v3352_v4, %v3338_v8 }
0x1c9b   :  { %3607 = vrot.lane.b32.xlu0 %v3354_v40, %s5114_s19 }
0x1c9f   :  { %3613 = vrot.lane.b32.xlu0 %v3354_v40, %s5115_s22 }
0x1ca0   :  { %v5013_v10 = vpop.eup %5012 }
0x1ca1   :  { %v3307_v7 = vrot.slane %v5013_v10, 1  ;;  %v3308_v46 = vrot.slane %v5013_v10, 2  ;;  %v3309_v62 = vrot.slane %v5013_v10, 3  ;;  %v3310_v45 = vrot.slane %v5013_v10, 4 }
0x1ca2   :  { %v3311_v39 = vrot.slane %v5013_v10, 5  ;;  %v3312_v57 = vrot.slane %v5013_v10, 6  ;;  %v3313_v5 = vrot.slane %v5013_v10, 7 }
0x1ca3   :  { %v3323_v34 = vmul.f32 %v3307_v7, %v6492_v48  ;;  %v3324_v2 = vmul.f32 %v3308_v46, %v6494_v9  ;;  %v3325_v29 = vmul.f32 %v3309_v62, %v6496_v6  ;;  %v3326_v25 = vmul.f32 %v3310_v45, %v6498_v14  ;;  %v3491_v7 = vld [vmem:[#allocation2 + $0x68] sm:$0xff]  ;;  %v3492_v46 = vld [vmem:[#allocation2 + $0x70] sm:$0xff]  ;;  %v3493_v45 = vld [vmem:[#allocation2 + $0x78] sm:$0xff] }
0x1ca4   :  { %v3327_v56 = vmul.f32 %v3311_v39, %v6500_v17  ;;  %v3328_v20 = vmul.f32 %v3312_v57, %v6502_v42  ;;  %v3329_v48 = vmul.f32 %v3313_v5, %v6504_v59  ;;  %v3383_v6 = vrot.slane %v3354_v40, 7  ;;  %v3490_v40 = vld [vmem:[#allocation2 + $0x60] sm:$0xff]  ;;  %v3495_v5 = vld [vmem:[#allocation2 + $0x88] sm:$0xff] }
0x1ca5   :  { %v3339_v36 = vmul.f32 %v3336_v61, %v3323_v34  ;;  %v3340_v24 = vmul.f32 %v3336_v61, %v3324_v2  ;;  %v3341_v49 = vmul.f32 %v3336_v61, %v3325_v29  ;;  %v3342_v55 = vmul.f32 %v3336_v61, %v3326_v25  ;;  %v3494_v39 = vld [vmem:[#allocation2 + $0x80] sm:$0xff]  ;;  %v3496_v34 = vld [vmem:[#allocation2 + $0x90] sm:$0xff]  ;;  %v3497_v29 = vld [vmem:[#allocation2 + $0x98] sm:$0xff] }
0x1ca6   :  { %v3343_v18 = vmul.f32 %v3336_v61, %v3327_v56  ;;  %v3344_v52 = vmul.f32 %v3336_v61, %v3328_v20  ;;  %v3345_v15 = vmul.f32 %v3336_v61, %v3329_v48  ;;  %v4507_v10 = vpack.c.bf16 %v3490_v40, %v3489_v54  ;;  %v3498_v25 = vld [vmem:[#allocation2 + $0xa0] sm:$0xff]  ;;  %v3499_v20 = vld [vmem:[#allocation2 + $0xa8] sm:$0xff]  ;;  %v3646_v40 = vld [vmem:[#allocation2 + $0x138] sm:$0xff] }
0x1ca7   :  { %v3355_v35 = vadd.f32 %v3352_v4, %v3339_v36  ;;  %v3356_v32 = vadd.f32 %v3352_v4, %v3340_v24  ;;  %v3357_v41 = vadd.f32 %v3352_v4, %v3341_v49  ;;  %v3358_v9 = vadd.f32 %v3352_v4, %v3342_v55  ;;  %v3500_v36 = vld [vmem:[#allocation2 + $0xb0] sm:$0xff]  ;;  %v3501_v49 = vld [vmem:[#allocation2 + $0xb8] sm:$0xff]  ;;  %v3502_v55 = vld [vmem:[#allocation2 + $0xc0] sm:$0xff] }
0x1ca8   :  { %v3359_v50 = vadd.f32 %v3352_v4, %v3343_v18  ;;  %v3360_v53 = vadd.f32 %v3352_v4, %v3344_v52  ;;  %v3361_v47 = vadd.f32 %v3352_v4, %v3345_v15  ;;  %v3488_v4 = vld [vmem:[#allocation2 + $0x50] sm:$0xff]  ;;  %v4510_v62 = vpack.c.bf16 %v3492_v46, %v3491_v7  ;;  %v4068_v52 = vld [vmem:[%s6662_s1 + $0x4] ss:$0 sm:$0xff]  ;;  %v4070_v46 = vld [vmem:[%s6662_s1 + $0x5] ss:$0 sm:$0xff] }
0x1ca9   :  { %v3384_v33 = vrot.slane %v3355_v35, 6  ;;  %v3386_v14 = vrot.slane %v3356_v32, 5  ;;  %v3594_v17 = vrot.slane %v3355_v35, 7  ;;  %v3595_v26 = vrot.slane %v3356_v32, 6 }
0x1caa   :  { %v3388_v60 = vrot.slane %v3357_v41, 4  ;;  %v3597_v23 = vrot.slane %v3357_v41, 5  ;;  %v3390_v63 = vrot.slane %v3358_v9, 3  ;;  %v3599_v59 = vrot.slane %v3358_v9, 4 }
0x1cab   :  { %v3385_v42 = vsel %vm617_vm3, %v3384_v33, %v3383_v6  ;;  %v3596_v28 = vsel %vm617_vm3, %v3595_v26, %v3594_v17  ;;  %v3392_v21 = vrot.slane %v3359_v50, 2  ;;  %v3601_v37 = vrot.slane %v3359_v50, 3 }
0x1cac   :  { %v3387_v12 = vsel %vm620_vm4, %v3386_v14, %v3385_v42  ;;  %v3598_v11 = vsel %vm620_vm4, %v3597_v23, %v3596_v28  ;;  %v3394_v16 = vrot.slane %v3360_v53, 1  ;;  %v3603_v61 = vrot.slane %v3360_v53, 2 }
0x1cad   :  { %v3389_v0 = vsel %vm623_vm5, %v3388_v60, %v3387_v12  ;;  %v3600_v44 = vsel %vm623_vm5, %v3599_v59, %v3598_v11  ;;  %v3605_v58 = vrot.slane %v3361_v47, 1  ;;  %v4504_v8 = vpack.c.bf16 %v3488_v4, %v3487_v3  ;;  %v3644_v4 = vld [vmem:[#allocation2 + $0x128] sm:$0xff] }
0x1cae   :  { %v3391_v13 = vsel %vm626_vm6, %v3390_v63, %v3389_v0  ;;  %v3602_v27 = vsel %vm626_vm6, %v3601_v37, %v3600_v44  ;;  %v4513_v57 = vpack.c.bf16 %v3494_v39, %v3493_v45  ;;  %v4516_v2 = vpack.c.bf16 %v3496_v34, %v3495_v5  ;;  %v3632_v0 = vld [vmem:[#allocation2 + $0xc8] sm:$0xff]  ;;  %v3634_v37 = vld [vmem:[#allocation2 + $0xd8] sm:$0xff] }
0x1caf   :  { %v3393_v31 = vsel %vm629_vm7, %v3392_v21, %v3391_v13  ;;  %v3604_v30 = vsel %vm629_vm7, %v3603_v61, %v3602_v27  ;;  %4505 = vmatpush3.bf16.msra.mxu1 %v4504_v8  ;;  %v4519_v56 = vpack.c.bf16 %v3498_v25, %v3497_v29  ;;  %v4522_v24 = vpack.c.bf16 %v3500_v36, %v3499_v20  ;;  %v3633_v21 = vld [vmem:[#allocation2 + $0xd0] sm:$0xff]  ;;  %v3635_v13 = vld [vmem:[#allocation2 + $0xe0] sm:$0xff]  ;;  %v3636_v44 = vld [vmem:[#allocation2 + $0xe8] sm:$0xff] }
0x1cb0   :  { %v3395_v38 = vsel %vm632_vm8, %v3394_v16, %v3393_v31  ;;  %v3606_v43 = vsel %vm632_vm8, %v3605_v58, %v3604_v30  ;;  %4506 = vmatprep.subr.bf16.mxu1 %v5111_v19  ;;  %v4525_v18 = vpack.c.bf16 %v3502_v55, %v3501_v49  ;;  %v3362_v53 = vlaneseq  ;;  %v3638_v27 = vld [vmem:[#allocation2 + $0xf8] sm:$0xff]  ;;  %v3641_v30 = vld [vmem:[#allocation2 + $0x110] sm:$0xff] }
0x1cb1   :  { %v3396_v1 = vsel %vm635_vm9, %v3361_v47, %v3395_v38  ;;  %v4528_v11 = vpack.c.bf16 %v3633_v21, %v3632_v0  ;;  %v4531_v16 = vpack.c.bf16 %v3635_v13, %v3634_v37  ;;  %v3637_v47 = vld [vmem:[#allocation2 + $0xf0] sm:$0xff]  ;;  %v3639_v38 = vld [vmem:[#allocation2 + $0x100] sm:$0xff]  ;;  %v3743_v0 = vld [vmem:[#allocation2 + $0x168] sm:$0xff] }
0x1cb2   :  { %3397 = vrot.lane.b32.xlu1 %v3396_v1, %s5114_s19  ;;  %v6578_v42 = vand.u32 127, %v3362_v53  ;;  %v4534_v31 = vpack.c.bf16 %v3637_v47, %v3636_v44  ;;  %v4537_v61 = vpack.c.bf16 %v3639_v38, %v3638_v27  ;;  %v3640_v1 = vld [vmem:[#allocation2 + $0x108] sm:$0xff]  ;;  %v3645_v8 = vld [vmem:[#allocation2 + $0x130] sm:$0xff]  ;;  %v3745_v37 = vld [vmem:[#allocation2 + $0x178] sm:$0xff] }
0x1cb3   :  { %4508 = vmatpush3.bf16.msra.mxu1 %v4507_v10  ;;  %v4540_v58 = vpack.c.bf16 %v3641_v30, %v3640_v1  ;;  %v4546_v54 = vpack.c.bf16 %v3645_v8, %v3644_v4  ;;  %v3647_v10 = vld [vmem:[#allocation2 + $0x140] sm:$0xff]  ;;  %v3744_v21 = vld [vmem:[#allocation2 + $0x170] sm:$0xff] }
0x1cb4   :  { %4509 = vmatprep.subr.bf16.mxu1 %v5111_v19  ;;  %vm3364_vm14 = vcmp.lt.s32.totalorder %v6578_v42, 32  ;;  %v4549_v7 = vpack.c.bf16 %v3647_v10, %v3646_v40  ;;  %v3748_v44 = vld [vmem:[#allocation2 + $0x190] sm:$0xff]  ;;  %v3750_v27 = vld [vmem:[#allocation2 + $0x1a0] sm:$0xff]  ;;  %vm3365_vm3 = vcmp.lt.s32.totalorder %v6578_v42, 16 }
0x1cb5   :  { %v3752_v1 = vld [vmem:[#allocation2 + $0x1b0] sm:$0xff] }
0x1cb6   :  { %3609 = vrot.lane.b32.xlu1 %v3606_v43, %s5114_s19 }
0x1cb7   :  { %4511 = vmatpush3.bf16.msra.mxu1 %v4510_v62 }
0x1cb8   :  { %4512 = vmatprep.subr.bf16.mxu1 %v5111_v19 }
0x1cba   :  { %3615 = vrot.lane.b32.xlu1 %v3606_v43, %s5115_s22  ;;  %v3642_v43 = vld [vmem:[#allocation2 + $0x118] sm:$0xff] }
0x1cbb   :  { %4514 = vmatpush3.bf16.msra.mxu1 %v4513_v57 }
0x1cbc   :  { %4515 = vmatprep.subr.bf16.mxu1 %v5111_v19 }
0x1cbf   :  { %4517 = vmatpush3.bf16.msra.mxu1 %v4516_v2 }
0x1cc0   :  { %4518 = vmatprep.subr.bf16.mxu1 %v5111_v19 }
0x1cc3   :  { %4520 = vmatpush3.bf16.msra.mxu1 %v4519_v56 }
0x1cc4   :  { %4521 = vmatprep.subr.bf16.mxu1 %v5111_v19 }
0x1cc7   :  { %4523 = vmatpush3.bf16.msra.mxu1 %v4522_v24 }
0x1cc8   :  { %4524 = vmatprep.subr.bf16.mxu1 %v5111_v19 }
0x1ccb   :  { %4526 = vmatpush3.bf16.msra.mxu1 %v4525_v18 }
0x1ccc   :  { %4551 = vmatprep.subr.bf16.mxu1 %v5111_v19 }
0x1d0d   :  { %v3608_v56 = vpop.permute.xlu0 %3607 }
0x1d11   :  { %v3614_v24 = vpop.permute.xlu0 %3613 }
0x1d12   :  { %v3619_v18 = vsel %vm294_vm10, %v3608_v56, %v3614_v24  ;;  %v3847_v24 = vld [vmem:[#allocation2 + $0x1d0] sm:$0xff] }
0x1d24   :  { %v3398_v51 = vpop.permute.xlu1 %3397 }
0x1d25   :  { %4307 = vmatmul.mubr.msk.f32.vlgmr.msra.gmra.mrb[14].mxu0 %vm294_vm10, %v3398_v51  ;;  %v3643_v51 = vld [vmem:[#allocation2 + $0x120] sm:$0xff] }
0x1d26   :  { %4376 = vmatprep.mubr.msk.f32.mxu0 %vm5112_vm1, %v5113_v22  ;;  %4529 = vmatpush3.bf16.msra.mxu0 %v4528_v11  ;;  %v4543_v3 = vpack.c.bf16 %v3643_v51, %v3642_v43  ;;  %v4558_v11 = vpack.c.bf16 %v3744_v21, %v3743_v0  ;;  %v3754_v43 = vld [vmem:[#allocation2 + $0x1c0] sm:$0xff] }
0x1d27   :  { %4530 = vmatprep.subr.bf16.mxu0 %v5111_v19 }
0x1d28   :  { %v3610_v29 = vpop.permute.xlu1 %3609 }
0x1d2a   :  { %4532 = vmatpush3.bf16.msra.mxu0 %v4531_v16  ;;  %v3747_v16 = vld [vmem:[#allocation2 + $0x188] sm:$0xff] }
0x1d2b   :  { %4533 = vmatprep.subr.bf16.mxu0 %v5111_v19  ;;  %v4564_v47 = vpack.c.bf16 %v3748_v44, %v3747_v16 }
0x1d2c   :  { %v3616_v20 = vpop.permute.xlu1 %3615 }
0x1d2d   :  { %v3620_v49 = vsel %vm294_vm10, %v3610_v29, %v3616_v20 }
0x1d2e   :  { %4535 = vmatpush3.bf16.msra.mxu0 %v4534_v31  ;;  %v3749_v31 = vld [vmem:[#allocation2 + $0x198] sm:$0xff] }
0x1d2f   :  { %4536 = vmatprep.subr.bf16.mxu0 %v5111_v19  ;;  %v4567_v38 = vpack.c.bf16 %v3750_v27, %v3749_v31 }
0x1d32   :  { %4538 = vmatpush3.bf16.msra.mxu0 %v4537_v61  ;;  %v3751_v61 = vld [vmem:[#allocation2 + $0x1a8] sm:$0xff] }
0x1d33   :  { %4539 = vmatprep.subr.bf16.mxu0 %v5111_v19  ;;  %v4570_v30 = vpack.c.bf16 %v3752_v1, %v3751_v61 }
0x1d36   :  { %4541 = vmatpush3.bf16.msra.mxu0 %v4540_v58  ;;  %v3753_v58 = vld [vmem:[#allocation2 + $0x1b8] sm:$0xff] }
0x1d37   :  { %4542 = vmatprep.subr.bf16.mxu0 %v5111_v19  ;;  %v4573_v51 = vpack.c.bf16 %v3754_v43, %v3753_v58 }
0x1d3a   :  { %4544 = vmatpush3.bf16.msra.mxu0 %v4543_v3  ;;  %v4071_v3 = vld [vmem:[%s6662_s1 + $0x6] ss:$0 sm:$0xff] }
0x1d3b   :  { %4545 = vmatprep.subr.bf16.mxu0 %v5111_v19 }
0x1d3e   :  { %4547 = vmatpush3.bf16.msra.mxu0 %v4546_v54 }
0x1d3f   :  { %4548 = vmatprep.subr.bf16.mxu0 %v5111_v19 }
0x1d42   :  { %4550 = vmatpush3.bf16.msra.mxu0 %v4549_v7 }
0x1d43   :  { %4575 = vmatprep.subr.bf16.mxu0 %v5111_v19 }
0x1df8   :  { %v3467_v35 = vpop.f32.mrb[14].mxu0 }
0x1df9   :  { %v3468_v32 = vadd.f32 %v4068_v52, %v3467_v35  ;;  %v4308_v48 = vpop.f32.mrb[15].mxu0  ;;  %v3623_v35 = vsel %vm3621_vm15, %v3620_v49, 0.0 }
0x1dfa   :  { %v3622_v48 = vsel %vm3621_vm15, %v3619_v18, 0.0  ;;  %v3849_v18 = vld [vmem:[#allocation2 + $0x1e0] sm:$0xff] }
0x1dfb   :  { %v3472_v41 = vand.u32 2147483647, %v3468_v32  ;;  %v3471_v12 = vmax.f32 %v3468_v32, 0.0 }
0x1dfd   :  { %v3473_v9 = vsub.f32 0.0, %v3472_v41 }
0x1dff   :  { %v3474_v33 = vmul.f32 1.442695, %v3473_v9 }
0x1e01   :  { %5014 = vpow2.f32 %v3474_v33  ;;  %v3628_v33 = vrot.slane %v3623_v35, 7  ;;  %v3850_v35 = vld [vmem:[#allocation2 + $0x1e8] sm:$0xff] }
0x1e0b   :  { %v5015_v6 = vpop.eup %5014 }
0x1e0c   :  { %v3476_v50 = vadd.f32 1.0, %v5015_v6  ;;  %v3479_v14 = vmul.f32 -0.5, %v5015_v6  ;;  %v3482_v26 = vand.u32 2147483647, %v5015_v6 }
0x1e0e   :  { %5016 = vlog2.f32 %v3476_v50  ;;  %v3480_v17 = vadd.f32 1.0, %v3479_v14  ;;  %vm3483_vm13 = vcmp.lt.f32.partialorder %v3482_v26, 0.0004427343  ;;  %v3627_v14 = vrot.slane %v3622_v48, 7 }
0x1e10   :  { %v3481_v23 = vmul.f32 %v5015_v6, %v3480_v17  ;;  %v3629_v17 = vsel %vm3626_vm2, %v3627_v14, %v3628_v33 }
0x1e18   :  { %v5017_v15 = vpop.eup %5016 }
0x1e19   :  { %v3478_v60 = vmul.f32 0.6931472, %v5017_v15 }
0x1e1b   :  { %v3484_v63 = vsel %vm3483_vm13, %v3481_v23, %v3478_v60  ;;  %v3739_v60 = vld [vmem:[#allocation2 + $0x148] sm:$0xff]  ;;  %v3740_v23 = vld [vmem:[#allocation2 + $0x150] sm:$0xff] }
0x1e1c   :  { %v3485_v28 = vadd.f32 %v3484_v63, %v3471_v12  ;;  %v3741_v63 = vld [vmem:[#allocation2 + $0x158] sm:$0xff] }
0x1e1e   :  { %v3486_v59 = vsel %vm3364_vm14, %v3471_v12, %v3485_v28  ;;  %v4552_v12 = vpack.c.bf16 %v3740_v23, %v3739_v60  ;;  %v3742_v28 = vld [vmem:[#allocation2 + $0x160] sm:$0xff]  ;;  %v3859_v60 = vld [vmem:[#allocation2 + $0x230] sm:$0xff] }
0x1e1f   :  { %4342 = vmatmul.mubr.f32.vlgmr.msra.gmra.mrb[10].mxu1 %v3486_v59  ;;  %v4555_v59 = vpack.c.bf16 %v3742_v28, %v3741_v63  ;;  %v3861_v63 = vld [vmem:[#allocation2 + $0x240] sm:$0xff] }
0x1e20   :  { %4411 = vmatprep.mubr.msk.f32.mxu1 %vm5112_vm1, %v5113_v22  ;;  %4553 = vmatpush3.bf16.msra.mxu1 %v4552_v12  ;;  %v3860_v12 = vld [vmem:[#allocation2 + $0x238] sm:$0xff] }
0x1e21   :  { %4554 = vmatprep.subr.bf16.mxu1 %v5111_v19  ;;  %v4597_v28 = vpack.c.bf16 %v3861_v63, %v3860_v12 }
0x1e24   :  { %4556 = vmatpush3.bf16.msra.mxu1 %v4555_v59  ;;  %v4072_v59 = vld [vmem:[%s6662_s1 + $0x7] ss:$0 sm:$0xff] }
0x1e25   :  { %4557 = vmatprep.subr.bf16.mxu1 %v5111_v19 }
0x1e28   :  { %4559 = vmatpush3.bf16.msra.mxu1 %v4558_v11 }
0x1e29   :  { %4560 = vmatprep.subr.bf16.mxu1 %v5111_v19 }
0x1ef2   :  { %v3574_v62 = vpop.f32.mrb[10].mxu1 }
0x1ef3   :  { %v3575_v45 = vadd.f32 %v4070_v46, %v3574_v62  ;;  %v4343_v39 = vpop.f32.mrb[11].mxu1 }
0x1ef5   :  { %v3579_v57 = vand.u32 2147483647, %v3575_v45  ;;  %v3578_v6 = vmax.f32 %v3575_v45, 0.0 }
0x1ef7   :  { %v3580_v5 = vsub.f32 0.0, %v3579_v57 }
0x1ef9   :  { %v3581_v34 = vmul.f32 1.442695, %v3580_v5 }
0x1efb   :  { %5018 = vpow2.f32 %v3581_v34 }
0x1f05   :  { %v5019_v2 = vpop.eup %5018 }
0x1f06   :  { %v3583_v25 = vadd.f32 1.0, %v5019_v2  ;;  %v3586_v36 = vmul.f32 -0.5, %v5019_v2  ;;  %v3589_v52 = vand.u32 2147483647, %v5019_v2 }
0x1f08   :  { %5020 = vlog2.f32 %v3583_v25  ;;  %v3587_v55 = vadd.f32 1.0, %v3586_v36  ;;  %vm3590_vm0 = vcmp.lt.f32.partialorder %v3589_v52, 0.0004427343  ;;  %v3846_v36 = vld [vmem:[#allocation2 + $0x1c8] sm:$0xff] }
0x1f09   :  { %v4576_v49 = vpack.c.bf16 %v3847_v24, %v3846_v36 }
0x1f0a   :  { %v3588_v9 = vmul.f32 %v5019_v2, %v3587_v55  ;;  %v3848_v55 = vld [vmem:[#allocation2 + $0x1d8] sm:$0xff] }
0x1f0b   :  { %v4579_v52 = vpack.c.bf16 %v3849_v18, %v3848_v55 }
0x1f12   :  { %v5021_v32 = vpop.eup %5020 }
0x1f13   :  { %v3585_v41 = vmul.f32 0.6931472, %v5021_v32  ;;  %v3851_v32 = vld [vmem:[#allocation2 + $0x1f0] sm:$0xff] }
0x1f14   :  { %v4582_v48 = vpack.c.bf16 %v3851_v32, %v3850_v35 }
0x1f15   :  { %v3591_v50 = vsel %vm3590_vm0, %v3588_v9, %v3585_v41  ;;  %v3852_v41 = vld [vmem:[#allocation2 + $0x1f8] sm:$0xff]  ;;  %v3853_v9 = vld [vmem:[#allocation2 + $0x200] sm:$0xff] }
0x1f16   :  { %v3592_v53 = vadd.f32 %v3591_v50, %v3578_v6  ;;  %v4585_v33 = vpack.c.bf16 %v3853_v9, %v3852_v41  ;;  %v3855_v50 = vld [vmem:[#allocation2 + $0x210] sm:$0xff] }
0x1f18   :  { %v3593_v26 = vsel %vm3364_vm14, %v3578_v6, %v3592_v53  ;;  %v3854_v6 = vld [vmem:[#allocation2 + $0x208] sm:$0xff]  ;;  %v3856_v53 = vld [vmem:[#allocation2 + $0x218] sm:$0xff] }
0x1f19   :  { %v3631_v15 = vadd.f32 %v3629_v17, %v3593_v26  ;;  %v4588_v14 = vpack.c.bf16 %v3855_v50, %v3854_v6  ;;  %v3857_v17 = vld [vmem:[#allocation2 + $0x220] sm:$0xff] }
0x1f1a   :  { %v4591_v26 = vpack.c.bf16 %v3857_v17, %v3856_v53 }
0x1f1b   :  { %4377 = vmatmul.mubr.f32.vlgmr.msra.gmra.mrb[16].mxu0 %v3631_v15  ;;  %v3858_v15 = vld [vmem:[#allocation2 + $0x228] sm:$0xff] }
0x1f1c   :  { %4446 = vmatprep.mubr.msk.f32.mxu0 %vm5112_vm1, %v5113_v22  ;;  %v3746_v22 = vld [vmem:[#allocation2 + $0x180] sm:$0xff]  ;;  %4577 = vmatpush3.bf16.msra.mxu0 %v4576_v49  ;;  %v4594_v23 = vpack.c.bf16 %v3859_v60, %v3858_v15 }
0x1f1d   :  { %v4561_v13 = vpack.c.bf16 %v3746_v22, %v3745_v37  ;;  %4578 = vmatprep.subr.bf16.mxu0 %v5111_v19 }
0x1f1f   :  { %4562 = vmatpush3.bf16.msra.mxu1 %v4561_v13 }
0x1f20   :  { %4563 = vmatprep.subr.bf16.mxu1 %v5111_v19  ;;  %4580 = vmatpush3.bf16.msra.mxu0 %v4579_v52 }
0x1f21   :  { %4581 = vmatprep.subr.bf16.mxu0 %v5111_v19 }
0x1f23   :  { %4565 = vmatpush3.bf16.msra.mxu1 %v4564_v47 }
0x1f24   :  { %4566 = vmatprep.subr.bf16.mxu1 %v5111_v19  ;;  %4583 = vmatpush3.bf16.msra.mxu0 %v4582_v48 }
0x1f25   :  { %4584 = vmatprep.subr.bf16.mxu0 %v5111_v19 }
0x1f27   :  { %4568 = vmatpush3.bf16.msra.mxu1 %v4567_v38 }
0x1f28   :  { %4569 = vmatprep.subr.bf16.mxu1 %v5111_v19  ;;  %4586 = vmatpush3.bf16.msra.mxu0 %v4585_v33 }
0x1f29   :  { %4587 = vmatprep.subr.bf16.mxu0 %v5111_v19 }
0x1f2b   :  { %4571 = vmatpush3.bf16.msra.mxu1 %v4570_v30 }
0x1f2c   :  { %4572 = vmatprep.subr.bf16.mxu1 %v5111_v19  ;;  %4589 = vmatpush3.bf16.msra.mxu0 %v4588_v14 }
0x1f2d   :  { %4590 = vmatprep.subr.bf16.mxu0 %v5111_v19 }
0x1f2f   :  { %4574 = vmatpush3.bf16.msra.mxu1 %v4573_v51 }
0x1f30   :  { %4592 = vmatpush3.bf16.msra.mxu0 %v4591_v26 }
0x1f31   :  { %4593 = vmatprep.subr.bf16.mxu0 %v5111_v19 }
0x1f34   :  { %4595 = vmatpush3.bf16.msra.mxu0 %v4594_v23 }
0x1f35   :  { %4596 = vmatprep.subr.bf16.mxu0 %v5111_v19 }
0x1f38   :  { %4598 = vmatpush3.bf16.msra.mxu0 %v4597_v28 }
0x1fee   :  { %v3719_v4 = vpop.f32.mrb[16].mxu0 }
0x1fef   :  { %v3720_v8 = vadd.f32 %v4071_v3, %v3719_v4  ;;  %v4378_v54 = vpop.f32.mrb[17].mxu0 }
0x1ff1   :  { %v3724_v40 = vand.u32 2147483647, %v3720_v8  ;;  %v3723_v29 = vmax.f32 %v3720_v8, 0.0 }
0x1ff3   :  { %v3725_v10 = vsub.f32 0.0, %v3724_v40 }
0x1ff5   :  { %v3726_v7 = vmul.f32 1.442695, %v3725_v10 }
0x1ff7   :  { %5022 = vpow2.f32 %v3726_v7 }
0x2001   :  { %v5023_v46 = vpop.eup %5022 }
0x2002   :  { %v3728_v62 = vadd.f32 1.0, %v5023_v46  ;;  %v3731_v45 = vmul.f32 -0.5, %v5023_v46  ;;  %v3734_v57 = vand.u32 2147483647, %v5023_v46 }
0x2004   :  { %5024 = vlog2.f32 %v3728_v62  ;;  %v3732_v39 = vadd.f32 1.0, %v3731_v45  ;;  %vm3735_vm1 = vcmp.lt.f32.partialorder %v3734_v57, 0.0004427343 }
0x2006   :  { %v3733_v2 = vmul.f32 %v5023_v46, %v3732_v39 }
0x200e   :  { %v5025_v5 = vpop.eup %5024 }
0x200f   :  { %v3730_v34 = vmul.f32 0.6931472, %v5025_v5 }
0x2011   :  { %v3736_v25 = vsel %vm3735_vm1, %v3733_v2, %v3730_v34 }
0x2012   :  { %v3737_v56 = vadd.f32 %v3736_v25, %v3723_v29 }
0x2014   :  { %v6615_v20 = vsel %vm3365_vm3, %v3723_v29, %v3737_v56 }
0x2015   :  { %4412 = vmatmul.mubr.f32.vlgmr.msra.gmra.mrb[12].mxu1 %v6615_v20 }
0x20e8   :  { %v3826_v0 = vpop.f32.mrb[12].mxu1 }
0x20e9   :  { %v3827_v21 = vadd.f32 %v4072_v59, %v3826_v0  ;;  %v4413_v11 = vpop.f32.mrb[13].mxu1 }
0x20eb   :  { %v3831_v37 = vand.u32 2147483647, %v3827_v21  ;;  %v3830_v1 = vmax.f32 %v3827_v21, 0.0 }
0x20ed   :  { %v3832_v22 = vsub.f32 0.0, %v3831_v37 }
0x20ef   :  { %v3833_v13 = vmul.f32 1.442695, %v3832_v22 }
0x20f1   :  { %5026 = vpow2.f32 %v3833_v13 }
0x20fb   :  { %v5027_v16 = vpop.eup %5026 }
0x20fc   :  { %v3835_v44 = vadd.f32 1.0, %v5027_v16  ;;  %v3838_v47 = vmul.f32 -0.5, %v5027_v16  ;;  %v3841_v27 = vand.u32 2147483647, %v5027_v16 }
0x20fe   :  { %5028 = vlog2.f32 %v3835_v44  ;;  %v3839_v31 = vadd.f32 1.0, %v3838_v47  ;;  %vm3842_vm4 = vcmp.lt.f32.partialorder %v3841_v27, 0.0004427343 }
0x2100   :  { %v3840_v61 = vmul.f32 %v5027_v16, %v3839_v31 }
0x2108   :  { %v5029_v38 = vpop.eup %5028 }
0x2109   :  { %v3837_v19 = vmul.f32 0.6931472, %v5029_v38 }
0x210b   :  { %v3843_v30 = vsel %vm3842_vm4, %v3840_v61, %v3837_v19 }
0x210c   :  { %v3844_v58 = vadd.f32 %v3843_v30, %v3830_v1 }
0x210e   :  { %v3845_v43 = vsel %vm3365_vm3, %v3830_v1, %v3844_v58 }
0x210f   :  { %4447 = vmatmul.mubr.f32.vlgmr.msra.gmra.mrb[18].mxu0 %v3845_v43 }
0x2110   :  { %5069 = shalt.err (!%p5066_p12)
}
0x2111   :  { %s5070_s0 = scalar_lea.hbm %s6665_s4, 128 }
0x2112   :  { %p5071_p13 = scmp.ne.s32.totalorder %s6665_s4, %s5070_s0  ;;  %p5074_p0 = scmp.lt.u32.totalorder %s5070_s0, %s6665_s4 }
0x2114   :  { %p5076_p1 = pnand %p5074_p0, %p5071_p13 }
0x2116   :  { %5079 = shalt.err (!%p5076_p1)
}
0x2117   :  { %3974 = dma.vmem_to_hbm [thread:$0]  %s3972_s14, 128, %s6665_s4, [#allocation7]   ;;  %v4073_v51 = vld [vmem:[%s6662_s1 + $0x8] ss:$0 sm:$0xff] }
0x2118   :  { %s5118_s1 = smov [#allocation5]  }
0x2119   :  { %s3961_s4 = sshll.u32 %s5118_s1, 4  ;;  %s3962_s4 = int_to_ptr.vmem [resolvable:$true] %s3961_s4 }
0x211a   :  { %s5080_s26 = scalar_lea.vmem %s3962_s4, 128  ;;  %p5085_p3 = scmp.lt.s32.totalorder %s3962_s4, %s3962_s4 }
0x211b   :  { %p5081_p2 = scmp.ne.s32.totalorder %s3962_s4, %s5080_s26  ;;  %p5086_p4 = scmp.lt.s32.totalorder %s5080_s26, %s5080_s26 }
0x211d   :  { %p5087_p5 = por %p5086_p4, %p5085_p3 }
0x211f   :  { %p5088_p6 = pnand %p5087_p5, %p5081_p2 }
0x21e2   :  { %v3933_v3 = vpop.f32.mrb[18].mxu0 }
0x21e3   :  { %v3934_v4 = vadd.f32 %v4073_v51, %v3933_v3  ;;  %v4448_v8 = vpop.f32.mrb[19].mxu0 }
0x21e5   :  { %v3938_v54 = vand.u32 2147483647, %v3934_v4  ;;  %v3937_v2 = vmax.f32 %v3934_v4, 0.0 }
0x21e7   :  { %v3939_v40 = vsub.f32 0.0, %v3938_v54 }
0x21e9   :  { %v3940_v10 = vmul.f32 1.442695, %v3939_v40 }
0x21eb   :  { %5030 = vpow2.f32 %v3940_v10 }
0x21f5   :  { %v5031_v7 = vpop.eup %5030 }
0x21f6   :  { %v3942_v46 = vadd.f32 1.0, %v5031_v7  ;;  %v3945_v62 = vmul.f32 -0.5, %v5031_v7  ;;  %v3948_v39 = vand.u32 2147483647, %v5031_v7 }
0x21f8   :  { %5032 = vlog2.f32 %v3942_v46  ;;  %v3946_v45 = vadd.f32 1.0, %v3945_v62  ;;  %vm3949_vm5 = vcmp.lt.f32.partialorder %v3948_v39, 0.0004427343 }
0x21fa   :  { %v3947_v34 = vmul.f32 %v5031_v7, %v3946_v45 }
0x2202   :  { %v5033_v57 = vpop.eup %5032 }
0x2203   :  { %v3944_v5 = vmul.f32 0.6931472, %v5033_v57 }
0x2205   :  { %v3950_v29 = vsel %vm3949_vm5, %v3947_v34, %v3944_v5 }
0x2206   :  { %v3951_v25 = vadd.f32 %v3950_v29, %v3937_v2 }
0x2208   :  { %v3952_v56 = vsel %vm3365_vm3, %v3937_v2, %v3951_v25 }
0x2209   :  { %v3953_v36 = vadd.f32 %v3952_v56, %v6615_v20 }
0x220b   :  { %3954 = vst.msk [vmem:[#allocation5] sm:$0xff] %vm294_vm10, %v3953_v36 }
0x220c   :  { %5091 = shalt.err (!%p5088_p6)
}
0x220d   :  { %s5092_s29 = scalar_lea.hbm %s6664_s3, 128 }
0x220e   :  { %p5093_p7 = scmp.ne.s32.totalorder %s6664_s3, %s5092_s29  ;;  %p5096_p8 = scmp.lt.u32.totalorder %s5092_s29, %s6664_s3 }
0x2210   :  { %p5098_p9 = pnand %p5096_p8, %p5093_p7 }
0x2212   :  { %5101 = shalt.err (!%p5098_p9)
}
0x2213   :  { %3964 = dma.vmem_to_hbm [thread:$0]  %s3962_s4, 128, %s6664_s3, [#allocation4]  }
0x2214   :  { %5104 = dma.done.wait [#allocation4], 128  }
0x2215   :  { %5105 = vsyncadd [#allocation4], 4294967168 }
0x2216   :  { %5106 = dma.done.wait [#allocation7], 128  }
0x2217   :  { %5107 = vsyncadd [#allocation7], 4294967168 }
0x2218   :  { %3981 = vsyncpa [#allocation3], 1 }
0x2219   :  { %3982 = vsyncpa [#allocation4], 1 }
0x221a   :  { %3983 = vsyncpa [#allocation7], 1 }

</bundles_post_ra>
